<compile_context>
chip_gen: v5e
topology: v5e:2x2
jax: 0.10.0
libtpu: 0.0.40
codegen_flags: <defaults>
</compile_context>

<pallas_src>
import functools

import jax
import jax.numpy as jnp
from jax.experimental import pallas as pl
from jax.experimental.pallas import tpu as pltpu

BN_EPS = 1e-5


# ----------------------------- Pallas kernel ------------------------------ #
def _conv_bn_kernel(x_ref, w_ref, sh_ref, *rest, tap_offsets, m_rows,
                    apply_relu, has_residual):
    # x_ref : (1, Lin, Cin)   flattened (spatially padded) activation block
    # w_ref : (T, Cin, Coutp) per-tap weights, BN scale folded, bf16 (resident)
    # sh_ref: (1, Coutp)      folded conv-bias + BN shift, f32 (resident)
    # rest  : [r_ref (1, m_rows, Coutp) residual]  o_ref (1, m_rows, Coutp)
    if has_residual:
        r_ref, o_ref = rest
    else:
        (o_ref,) = rest

    acc = None
    for t, off in enumerate(tap_offsets):
        # Static row-offset slice of the activation block = one conv tap.
        lhs = x_ref[0, off:off + m_rows, :].astype(jnp.bfloat16)
        part = jnp.dot(lhs, w_ref[t], preferred_element_type=jnp.float32)
        acc = part if acc is None else acc + part

    acc = acc + sh_ref[...]                       # folded conv bias + BatchNorm
    if has_residual:
        acc = acc + r_ref[0].astype(jnp.float32)  # shortcut
    if apply_relu:
        acc = jnp.maximum(acc, 0.0)
    o_ref[0] = acc.astype(o_ref.dtype)


def _round_up(x, m):
    return (x + m - 1) // m * m


def _vmem_block_bytes(shape, dtype):
    # Rough padded VMEM footprint of one block buffer.
    shape = tuple(int(d) for d in shape)
    if len(shape) < 2:
        shape = (1,) * (2 - len(shape)) + shape
    lead = 1
    for d in shape[:-2]:
        lead *= d
    return (lead * _round_up(shape[-2], 16) * _round_up(shape[-1], 128)
            * jnp.dtype(dtype).itemsize)


def conv_bn_pallas(x_flat, w_taps, shift, *, m_rows, tap_offsets,
                   residual=None, apply_relu, out_dtype=jnp.bfloat16):
    """out[n, m] = act( sum_t x[n, m + off_t] @ w[t] + shift (+ residual) )."""
    N, Lin, Cin = x_flat.shape
    T, _, Coutp = w_taps.shape
    assert len(tap_offsets) == T
    assert max(tap_offsets) + m_rows <= Lin
    assert Coutp % 128 == 0

    in_specs = [
        pl.BlockSpec((1, Lin, Cin), lambda n: (n, 0, 0)),      # activation
        pl.BlockSpec((T, Cin, Coutp), lambda n: (0, 0, 0)),    # resident weights
        pl.BlockSpec((1, Coutp), lambda n: (0, 0)),            # resident shift
    ]
    args = [x_flat, w_taps, shift]
    if residual is not None:
        assert residual.shape == (N, m_rows, Coutp)
        in_specs.append(pl.BlockSpec((1, m_rows, Coutp), lambda n: (n, 0, 0)))
        args.append(residual)

    # VMEM budget derived from the actual (double-buffered) block bytes.
    est = (2 * _vmem_block_bytes((Lin, Cin), x_flat.dtype)
           + 2 * _vmem_block_bytes((T * Cin, Coutp), w_taps.dtype)
           + 2 * _vmem_block_bytes((1, Coutp), shift.dtype)
           + 2 * _vmem_block_bytes((m_rows, Coutp), out_dtype)
           + 2 * _vmem_block_bytes((m_rows, Coutp), jnp.float32)   # accumulator
           + 2 * _vmem_block_bytes((m_rows, Cin), jnp.float32))    # tap temps
    if residual is not None:
        est += 2 * _vmem_block_bytes((m_rows, Coutp), residual.dtype)
    vmem_limit = int(min(56 * 1024 * 1024, max(32 * 1024 * 1024, 2 * est)))

    kernel = functools.partial(
        _conv_bn_kernel,
        tap_offsets=tuple(int(o) for o in tap_offsets),
        m_rows=int(m_rows),
        apply_relu=apply_relu,
        has_residual=residual is not None)

    return pl.pallas_call(
        kernel,
        out_shape=jax.ShapeDtypeStruct((N, m_rows, Coutp), out_dtype),
        grid=(N,),
        in_specs=in_specs,
        out_specs=pl.BlockSpec((1, m_rows, Coutp), lambda n: (n, 0, 0)),
        compiler_params=pltpu.CompilerParams(
            dimension_semantics=("parallel",),
            vmem_limit_bytes=vmem_limit),
    )(*args)


# ------------------------------ host glue ---------------------------------- #
def _fold_conv_bn(w_oihw, bias, bn, coutp):
    """Inference BN + conv-bias fold: per-tap bf16 weights with BN scale folded
    in (KH*KW, Cin, Coutp) and an f32 (1, Coutp) shift."""
    gamma, beta, mean, var = bn
    scale = gamma / jnp.sqrt(var + BN_EPS)
    shift = beta + (bias - mean) * scale
    cout, cin, kh, kw = w_oihw.shape
    w = jnp.transpose(w_oihw, (2, 3, 1, 0)).reshape(kh * kw, cin, cout)
    w = w * scale[None, None, :]
    pad = coutp - cout
    if pad:
        w = jnp.pad(w, ((0, 0), (0, 0), (0, pad)))
        shift = jnp.pad(shift, (0, pad))
    return w.astype(jnp.bfloat16), shift.reshape(1, coutp).astype(jnp.float32)


def _prep_3x3_s1_input(x_nhwc):
    """Pad (top 1, bottom 2, left 1, right 1) and flatten rows for the
    wide-tap trick.  Returns (x_flat f32, m_rows, Wp, tap_offsets)."""
    n, h, w, _ = x_nhwc.shape
    xp = jnp.pad(x_nhwc.astype(jnp.float32), ((0, 0), (1, 2), (1, 1), (0, 0)))
    wp = w + 2
    x_flat = xp.reshape(n, (h + 3) * wp, xp.shape[-1])
    offs = tuple(kh * wp + kw for kh in range(3) for kw in range(3))
    return x_flat, h * wp, wp, offs


def _im2col_3x3(x_nhwc, stride):
    """bf16 im2col, only used as the strided-conv1 fallback (stride != 1)."""
    n, h, w, c = x_nhwc.shape
    ho = (h - 1) // stride + 1
    wo = (w - 1) // stride + 1
    xp = jnp.pad(x_nhwc.astype(jnp.bfloat16), ((0, 0), (1, 1), (1, 1), (0, 0)))
    taps = [xp[:, kh:kh + (ho - 1) * stride + 1:stride,
               kw:kw + (wo - 1) * stride + 1:stride, :]
            for kh in range(3) for kw in range(3)]
    p = jnp.stack(taps, axis=3).reshape(n, ho * wo, 9 * c)
    return p, ho, wo


def resnet_block_forward(x_nchw, params, stride):
    n, cin, h, w = x_nchw.shape
    cout = params["conv1_w"].shape[0]
    coutp = _round_up(cout, 128)
    x_nhwc = jnp.transpose(x_nchw, (0, 2, 3, 1))                    # NHWC

    # ---- conv1 (3x3, stride, pad=1) + bn1 + relu ----
    w1, sh1 = _fold_conv_bn(params["conv1_w"], params["conv1_b"],
                            params["bn1"], coutp)
    if stride == 1:
        x1f, m1, wp1, offs1 = _prep_3x3_s1_input(x_nhwc)
        y1w = conv_bn_pallas(x1f, w1, sh1, m_rows=m1, tap_offsets=offs1,
                             apply_relu=True, out_dtype=jnp.bfloat16)
        ho, wo = h, w
        y1 = y1w.reshape(n, ho, wp1, coutp)[:, :, :wo, :cout]       # valid cols
    else:
        # TODO(synk): direct strided taps; bf16 im2col GEMM fallback for now.
        p1, ho, wo = _im2col_3x3(x_nhwc, stride)
        y1c = conv_bn_pallas(p1, w1.reshape(1, 9 * cin, coutp), sh1,
                             m_rows=ho * wo, tap_offsets=(0,),
                             apply_relu=True, out_dtype=jnp.bfloat16)
        y1 = y1c.reshape(n, ho, wo, coutp)[:, :, :, :cout]

    # ---- shortcut, produced directly in conv2's wide residual layout ----
    wp2 = wo + 2
    m2 = ho * wp2
    if stride != 1 or cin != cout:
        ws, shs = _fold_conv_bn(params["sc_w"], params["sc_b"],
                                params["bn_sc"], coutp)
        xs = x_nhwc[:, ::stride, ::stride, :].astype(jnp.bfloat16)
        xs = jnp.pad(xs, ((0, 0), (0, 0), (0, 2), (0, 0)))          # wide cols
        xs = xs.reshape(n, m2, cin)
        resid = conv_bn_pallas(xs, ws, shs, m_rows=m2, tap_offsets=(0,),
                               apply_relu=False, out_dtype=jnp.bfloat16)
    else:
        resid = jnp.pad(x_nhwc.astype(jnp.bfloat16),
                        ((0, 0), (0, 0), (0, 2), (0, coutp - cin)))
        resid = resid.reshape(n, m2, coutp)

    # ---- conv2 (3x3, stride 1, pad=1) + bn2 + residual + relu (fused) ----
    w2, sh2 = _fold_conv_bn(params["conv2_w"], params["conv2_b"],
                            params["bn2"], coutp)
    x2f, m2b, wp2b, offs2 = _prep_3x3_s1_input(y1)
    assert (m2b, wp2b) == (m2, wp2)
    y2w = conv_bn_pallas(x2f, w2, sh2, m_rows=m2, tap_offsets=offs2,
                         residual=resid, apply_relu=True,
                         out_dtype=jnp.bfloat16)

    # Single slice of the wide columns / padded channels, fused with the
    # NCHW transpose and the f32 upcast.
    y2 = y2w.reshape(n, ho, wp2, coutp)[:, :, :wo, :cout]
    return jnp.transpose(y2, (0, 3, 1, 2)).astype(jnp.float32)      # NCHW


# --------------------------- pure-JAX references --------------------------- #
def _ref_block(x, params, stride, matched):
    # matched=True mirrors the kernel numerics (BN scale folded into bf16
    # weights, bf16 inputs, f32 accumulation, bf16 intermediates/output).
    def conv(xx, ww, s, pad):
        return jax.lax.conv_general_dilated(
            xx, ww, (s, s), ((pad, pad), (pad, pad)),
            dimension_numbers=("NCHW", "OIHW", "NCHW"),
            preferred_element_type=jnp.float32)

    def bn_apply(z, p):
        g, b, m, v = (t.reshape(1, -1, 1, 1) for t in p)
        return (z - m) / jnp.sqrt(v + BN_EPS) * g + b

    def folded(wt, b, p):
        g, bt, m, v = p
        scale = g / jnp.sqrt(v + BN_EPS)
        return wt * scale.reshape(-1, 1, 1, 1), bt + (b - m) * scale

    if matched:
        bf = jnp.bfloat16

        def conv_bn(xx, wt, b, p, s, pad):
            wf, sh = folded(wt, b, p)
            y = conv(xx.astype(bf), wf.astype(bf), s, pad)
            return y + sh.reshape(1, -1, 1, 1)

        def q(t):
            return t.astype(bf).astype(jnp.float32)

        y1 = q(jax.nn.relu(conv_bn(x, params["conv1_w"], params["conv1_b"],
                                   params["bn1"], stride, 1)))
        out = conv_bn(y1, params["conv2_w"], params["conv2_b"],
                      params["bn2"], 1, 1)
        if "sc_w" in params:
            sc = q(conv_bn(x, params["sc_w"], params["sc_b"],
                           params["bn_sc"], stride, 0))
        else:
            sc = q(x)
        return q(jax.nn.relu(out + sc))

    def conv_bias(xx, wt, b, s, pad):
        return conv(xx, wt, s, pad) + b.reshape(1, -1, 1, 1)

    y1 = jax.nn.relu(bn_apply(conv_bias(x, params["conv1_w"],
                                        params["conv1_b"], stride, 1),
                              params["bn1"]))
    out = bn_apply(conv_bias(y1, params["conv2_w"], params["conv2_b"], 1, 1),
                   params["bn2"])
    if "sc_w" in params:
        sc = bn_apply(conv_bias(x, params["sc_w"], params["sc_b"], stride, 0),
                      params["bn_sc"])
    else:
        sc = x
    return jax.nn.relu(out + sc)


# --------------------------------- main ------------------------------------ #
def _init_params(key, cin, cout, stride):
    ks = jax.random.split(key, 12)

    def bn_params(k):
        k1, k2, k3, k4 = jax.random.split(k, 4)
        gamma = 1.0 + 0.1 * jax.random.normal(k1, (cout,), jnp.float32)
        beta = 0.1 * jax.random.normal(k2, (cout,), jnp.float32)
        mean = 0.1 * jax.random.normal(k3, (cout,), jnp.float32)
        var = jnp.abs(jax.random.normal(k4, (cout,), jnp.float32)) + 0.5
        return (gamma, beta, mean, var)

    params = {
        "conv1_w": jax.random.normal(ks[0], (cout, cin, 3, 3), jnp.float32),
        "conv1_b": jnp.zeros((cout,), jnp.float32),
        "bn1": bn_params(ks[1]),
        "conv2_w": jax.random.normal(ks[2], (cout, cout, 3, 3), jnp.float32),
        "conv2_b": jnp.zeros((cout,), jnp.float32),
        "bn2": bn_params(ks[3]),
    }
    if stride != 1 or cin != cout:
        params["sc_w"] = jax.random.normal(ks[4], (cout, cin, 1, 1), jnp.float32)
        params["sc_b"] = jnp.zeros((cout,), jnp.float32)
        params["bn_sc"] = bn_params(ks[5])
    return params


if __name__ == "__main__":
    key = jax.random.PRNGKey(0)
    kx, kp = jax.random.split(key)

    in_channels, out_channels, stride = 4, 8, 1
    x = jax.random.normal(kx, (2, in_channels, 16, 16), jnp.float32)  # NCHW
    params = _init_params(kp, in_channels, out_channels, stride)

    fwd = jax.jit(functools.partial(resnet_block_forward, stride=stride))
    out = jax.block_until_ready(fwd(x, params))

    # 1) tight check against the matched-precision (bf16-operand) reference
    ref_m = jax.block_until_ready(_ref_block(x, params, stride, True))
    assert out.shape == ref_m.shape, (out.shape, ref_m.shape)
    assert bool(jnp.all(jnp.isfinite(out)))
    assert bool(jnp.allclose(out, ref_m, rtol=2e-2, atol=2e-2)), (
        "mismatch vs matched-precision reference: "
        f"{float(jnp.max(jnp.abs(out - ref_m)))}")

    # 2) sanity check against the full-f32 reference (scale-aware tolerance;
    #    bf16 operands are an intentional precision trade-off)
    ref_f = jax.block_until_ready(_ref_block(x, params, stride, False))
    err_f = float(jnp.max(jnp.abs(out - ref_f)) /
                  jnp.maximum(1.0, jnp.max(jnp.abs(ref_f))))
    assert err_f < 5e-2, f"mismatch vs f32 reference (scaled): {err_f}"

    print("KERNEL_OK")
</pallas_src>

<mosaic_0001>
module attributes {stable_mosaic.version = 11 : i64} {
  func.func @_conv_bn_kernel(%arg0: i32, %arg1: memref<1x342x4xf32, #tpu.memory_space<vmem>>, %arg2: memref<9x4x128xbf16, #tpu.memory_space<vmem>>, %arg3: memref<1x128xf32, #tpu.memory_space<vmem>>, %arg4: memref<1x288x128xbf16, #tpu.memory_space<vmem>>) attributes {dimension_semantics = [#tpu.dimension_semantics<parallel>], iteration_bounds = array<i64: 2>, scalar_prefetch = 0 : i64, scratch_operands = 0 : i64, tpu.core_type = #tpu.core_type<tc>, window_params = [{transform_indices = @transform_0, window_bounds = array<i64: 1, 342, 4>}, {pipeline_mode = #tpu.pipeline_mode<synchronous>, transform_indices = @transform_1, window_bounds = array<i64: 9, 4, 128>}, {pipeline_mode = #tpu.pipeline_mode<synchronous>, transform_indices = @transform_2, window_bounds = array<i64: 1, 128>}, {transform_indices = @transform_3, window_bounds = array<i64: 1, 288, 128>}]} {
    %c0 = arith.constant 0 : index
    %c0_0 = arith.constant 0 : index
    %c0_1 = arith.constant 0 : index
    %0 = vector.load %arg1[%c0, %c0_0, %c0_1] : memref<1x342x4xf32, #tpu.memory_space<vmem>>, vector<1x288x4xf32>
    %1 = vector.shape_cast %0 : vector<1x288x4xf32> to vector<288x4xf32>
    %2 = arith.truncf %1 : vector<288x4xf32> to vector<288x4xbf16>
    %c0_2 = arith.constant 0 : index
    %c0_3 = arith.constant 0 : index
    %c0_4 = arith.constant 0 : index
    %3 = vector.load %arg2[%c0_2, %c0_3, %c0_4] : memref<9x4x128xbf16, #tpu.memory_space<vmem>>, vector<1x4x128xbf16>
    %4 = vector.shape_cast %3 : vector<1x4x128xbf16> to vector<4x128xbf16>
    %cst = arith.constant dense<0.000000e+00> : vector<288x128xf32>
    %5 = tpu.matmul %2, %4, %cst {dimension_numbers = #tpu.dot_dimension_numbers<[1], [0], [0], [1], [0, 0, 1, 1], [], []>} : vector<288x4xbf16>, vector<4x128xbf16>, vector<288x128xf32> -> vector<288x128xf32>
    %c0_5 = arith.constant 0 : index
    %c1 = arith.constant 1 : index
    %c0_6 = arith.constant 0 : index
    %6 = vector.load %arg1[%c0_5, %c1, %c0_6] : memref<1x342x4xf32, #tpu.memory_space<vmem>>, vector<1x288x4xf32>
    %7 = vector.shape_cast %6 : vector<1x288x4xf32> to vector<288x4xf32>
    %8 = arith.truncf %7 : vector<288x4xf32> to vector<288x4xbf16>
    %c1_7 = arith.constant 1 : index
    %c0_8 = arith.constant 0 : index
    %c0_9 = arith.constant 0 : index
    %9 = vector.load %arg2[%c1_7, %c0_8, %c0_9] : memref<9x4x128xbf16, #tpu.memory_space<vmem>>, vector<1x4x128xbf16>
    %10 = vector.shape_cast %9 : vector<1x4x128xbf16> to vector<4x128xbf16>
    %cst_10 = arith.constant dense<0.000000e+00> : vector<288x128xf32>
    %11 = tpu.matmul %8, %10, %cst_10 {dimension_numbers = #tpu.dot_dimension_numbers<[1], [0], [0], [1], [0, 0, 1, 1], [], []>} : vector<288x4xbf16>, vector<4x128xbf16>, vector<288x128xf32> -> vector<288x128xf32>
    %12 = arith.addf %5, %11 : vector<288x128xf32>
    %c0_11 = arith.constant 0 : index
    %c2 = arith.constant 2 : index
    %c0_12 = arith.constant 0 : index
    %13 = vector.load %arg1[%c0_11, %c2, %c0_12] : memref<1x342x4xf32, #tpu.memory_space<vmem>>, vector<1x288x4xf32>
    %14 = vector.shape_cast %13 : vector<1x288x4xf32> to vector<288x4xf32>
    %15 = arith.truncf %14 : vector<288x4xf32> to vector<288x4xbf16>
    %c2_13 = arith.constant 2 : index
    %c0_14 = arith.constant 0 : index
    %c0_15 = arith.constant 0 : index
    %16 = vector.load %arg2[%c2_13, %c0_14, %c0_15] : memref<9x4x128xbf16, #tpu.memory_space<vmem>>, vector<1x4x128xbf16>
    %17 = vector.shape_cast %16 : vector<1x4x128xbf16> to vector<4x128xbf16>
    %cst_16 = arith.constant dense<0.000000e+00> : vector<288x128xf32>
    %18 = tpu.matmul %15, %17, %cst_16 {dimension_numbers = #tpu.dot_dimension_numbers<[1], [0], [0], [1], [0, 0, 1, 1], [], []>} : vector<288x4xbf16>, vector<4x128xbf16>, vector<288x128xf32> -> vector<288x128xf32>
    %19 = arith.addf %12, %18 : vector<288x128xf32>
    %c0_17 = arith.constant 0 : index
    %c18 = arith.constant 18 : index
    %c0_18 = arith.constant 0 : index
    %20 = vector.load %arg1[%c0_17, %c18, %c0_18] : memref<1x342x4xf32, #tpu.memory_space<vmem>>, vector<1x288x4xf32>
    %21 = vector.shape_cast %20 : vector<1x288x4xf32> to vector<288x4xf32>
    %22 = arith.truncf %21 : vector<288x4xf32> to vector<288x4xbf16>
    %c3 = arith.constant 3 : index
    %c0_19 = arith.constant 0 : index
    %c0_20 = arith.constant 0 : index
    %23 = vector.load %arg2[%c3, %c0_19, %c0_20] : memref<9x4x128xbf16, #tpu.memory_space<vmem>>, vector<1x4x128xbf16>
    %24 = vector.shape_cast %23 : vector<1x4x128xbf16> to vector<4x128xbf16>
    %cst_21 = arith.constant dense<0.000000e+00> : vector<288x128xf32>
    %25 = tpu.matmul %22, %24, %cst_21 {dimension_numbers = #tpu.dot_dimension_numbers<[1], [0], [0], [1], [0, 0, 1, 1], [], []>} : vector<288x4xbf16>, vector<4x128xbf16>, vector<288x128xf32> -> vector<288x128xf32>
    %26 = arith.addf %19, %25 : vector<288x128xf32>
    %c0_22 = arith.constant 0 : index
    %c19 = arith.constant 19 : index
    %c0_23 = arith.constant 0 : index
    %27 = vector.load %arg1[%c0_22, %c19, %c0_23] : memref<1x342x4xf32, #tpu.memory_space<vmem>>, vector<1x288x4xf32>
    %28 = vector.shape_cast %27 : vector<1x288x4xf32> to vector<288x4xf32>
    %29 = arith.truncf %28 : vector<288x4xf32> to vector<288x4xbf16>
    %c4 = arith.constant 4 : index
    %c0_24 = arith.constant 0 : index
    %c0_25 = arith.constant 0 : index
    %30 = vector.load %arg2[%c4, %c0_24, %c0_25] : memref<9x4x128xbf16, #tpu.memory_space<vmem>>, vector<1x4x128xbf16>
    %31 = vector.shape_cast %30 : vector<1x4x128xbf16> to vector<4x128xbf16>
    %cst_26 = arith.constant dense<0.000000e+00> : vector<288x128xf32>
    %32 = tpu.matmul %29, %31, %cst_26 {dimension_numbers = #tpu.dot_dimension_numbers<[1], [0], [0], [1], [0, 0, 1, 1], [], []>} : vector<288x4xbf16>, vector<4x128xbf16>, vector<288x128xf32> -> vector<288x128xf32>
    %33 = arith.addf %26, %32 : vector<288x128xf32>
    %c0_27 = arith.constant 0 : index
    %c20 = arith.constant 20 : index
    %c0_28 = arith.constant 0 : index
    %34 = vector.load %arg1[%c0_27, %c20, %c0_28] : memref<1x342x4xf32, #tpu.memory_space<vmem>>, vector<1x288x4xf32>
    %35 = vector.shape_cast %34 : vector<1x288x4xf32> to vector<288x4xf32>
    %36 = arith.truncf %35 : vector<288x4xf32> to vector<288x4xbf16>
    %c5 = arith.constant 5 : index
    %c0_29 = arith.constant 0 : index
    %c0_30 = arith.constant 0 : index
    %37 = vector.load %arg2[%c5, %c0_29, %c0_30] : memref<9x4x128xbf16, #tpu.memory_space<vmem>>, vector<1x4x128xbf16>
    %38 = vector.shape_cast %37 : vector<1x4x128xbf16> to vector<4x128xbf16>
    %cst_31 = arith.constant dense<0.000000e+00> : vector<288x128xf32>
    %39 = tpu.matmul %36, %38, %cst_31 {dimension_numbers = #tpu.dot_dimension_numbers<[1], [0], [0], [1], [0, 0, 1, 1], [], []>} : vector<288x4xbf16>, vector<4x128xbf16>, vector<288x128xf32> -> vector<288x128xf32>
    %40 = arith.addf %33, %39 : vector<288x128xf32>
    %c0_32 = arith.constant 0 : index
    %c36 = arith.constant 36 : index
    %c0_33 = arith.constant 0 : index
    %41 = vector.load %arg1[%c0_32, %c36, %c0_33] : memref<1x342x4xf32, #tpu.memory_space<vmem>>, vector<1x288x4xf32>
    %42 = vector.shape_cast %41 : vector<1x288x4xf32> to vector<288x4xf32>
    %43 = arith.truncf %42 : vector<288x4xf32> to vector<288x4xbf16>
    %c6 = arith.constant 6 : index
    %c0_34 = arith.constant 0 : index
    %c0_35 = arith.constant 0 : index
    %44 = vector.load %arg2[%c6, %c0_34, %c0_35] : memref<9x4x128xbf16, #tpu.memory_space<vmem>>, vector<1x4x128xbf16>
    %45 = vector.shape_cast %44 : vector<1x4x128xbf16> to vector<4x128xbf16>
    %cst_36 = arith.constant dense<0.000000e+00> : vector<288x128xf32>
    %46 = tpu.matmul %43, %45, %cst_36 {dimension_numbers = #tpu.dot_dimension_numbers<[1], [0], [0], [1], [0, 0, 1, 1], [], []>} : vector<288x4xbf16>, vector<4x128xbf16>, vector<288x128xf32> -> vector<288x128xf32>
    %47 = arith.addf %40, %46 : vector<288x128xf32>
    %c0_37 = arith.constant 0 : index
    %c37 = arith.constant 37 : index
    %c0_38 = arith.constant 0 : index
    %48 = vector.load %arg1[%c0_37, %c37, %c0_38] : memref<1x342x4xf32, #tpu.memory_space<vmem>>, vector<1x288x4xf32>
    %49 = vector.shape_cast %48 : vector<1x288x4xf32> to vector<288x4xf32>
    %50 = arith.truncf %49 : vector<288x4xf32> to vector<288x4xbf16>
    %c7 = arith.constant 7 : index
    %c0_39 = arith.constant 0 : index
    %c0_40 = arith.constant 0 : index
    %51 = vector.load %arg2[%c7, %c0_39, %c0_40] : memref<9x4x128xbf16, #tpu.memory_space<vmem>>, vector<1x4x128xbf16>
    %52 = vector.shape_cast %51 : vector<1x4x128xbf16> to vector<4x128xbf16>
    %cst_41 = arith.constant dense<0.000000e+00> : vector<288x128xf32>
    %53 = tpu.matmul %50, %52, %cst_41 {dimension_numbers = #tpu.dot_dimension_numbers<[1], [0], [0], [1], [0, 0, 1, 1], [], []>} : vector<288x4xbf16>, vector<4x128xbf16>, vector<288x128xf32> -> vector<288x128xf32>
    %54 = arith.addf %47, %53 : vector<288x128xf32>
    %c0_42 = arith.constant 0 : index
    %c38 = arith.constant 38 : index
    %c0_43 = arith.constant 0 : index
    %55 = vector.load %arg1[%c0_42, %c38, %c0_43] : memref<1x342x4xf32, #tpu.memory_space<vmem>>, vector<1x288x4xf32>
    %56 = vector.shape_cast %55 : vector<1x288x4xf32> to vector<288x4xf32>
    %57 = arith.truncf %56 : vector<288x4xf32> to vector<288x4xbf16>
    %c8 = arith.constant 8 : index
    %c0_44 = arith.constant 0 : index
    %c0_45 = arith.constant 0 : index
    %58 = vector.load %arg2[%c8, %c0_44, %c0_45] : memref<9x4x128xbf16, #tpu.memory_space<vmem>>, vector<1x4x128xbf16>
    %59 = vector.shape_cast %58 : vector<1x4x128xbf16> to vector<4x128xbf16>
    %cst_46 = arith.constant dense<0.000000e+00> : vector<288x128xf32>
    %60 = tpu.matmul %57, %59, %cst_46 {dimension_numbers = #tpu.dot_dimension_numbers<[1], [0], [0], [1], [0, 0, 1, 1], [], []>} : vector<288x4xbf16>, vector<4x128xbf16>, vector<288x128xf32> -> vector<288x128xf32>
    %61 = arith.addf %54, %60 : vector<288x128xf32>
    %c0_47 = arith.constant 0 : index
    %c0_48 = arith.constant 0 : index
    %62 = vector.load %arg3[%c0_47, %c0_48] : memref<1x128xf32, #tpu.memory_space<vmem>>, vector<1x128xf32>
    %63 = vector.broadcast %62 : vector<1x128xf32> to vector<288x128xf32>
    %64 = arith.addf %61, %63 : vector<288x128xf32>
    %cst_49 = arith.constant 0.000000e+00 : f32
    %65 = vector.broadcast %cst_49 : f32 to vector<288x128xf32>
    %66 = arith.maximumf %64, %65 : vector<288x128xf32>
    %67 = arith.truncf %66 : vector<288x128xf32> to vector<288x128xbf16>
    %c0_50 = arith.constant 0 : index
    %c0_51 = arith.constant 0 : index
    %c0_52 = arith.constant 0 : index
    %68 = vector.load %arg4[%c0_50, %c0_51, %c0_52] : memref<1x288x128xbf16, #tpu.memory_space<vmem>>, vector<1x288x128xbf16>
    %69 = vector.shape_cast %68 : vector<1x288x128xbf16> to vector<288x128xbf16>
    %70 = vector.shape_cast %67 : vector<288x128xbf16> to vector<1x288x128xbf16>
    tpu.vector_store %arg4[%c0_50, %c0_51, %c0_52], %70 {strides = array<i32>} : memref<1x288x128xbf16, #tpu.memory_space<vmem>>, vector<1x288x128xbf16>,
    return
  }
  func.func @transform_0(%arg0: i32) -> (i32, i32, i32) {
    %c0_i32 = arith.constant 0 : i32
    %c0_i32_0 = arith.constant 0 : i32
    %c0_i32_1 = arith.constant 0 : i32
    return %arg0, %c0_i32, %c0_i32_0 : i32, i32, i32
  }
  func.func @transform_1(%arg0: i32) -> (i32, i32, i32) {
    %c0_i32 = arith.constant 0 : i32
    %c0_i32_0 = arith.constant 0 : i32
    %c0_i32_1 = arith.constant 0 : i32
    %c0_i32_2 = arith.constant 0 : i32
    return %c0_i32, %c0_i32_0, %c0_i32_1 : i32, i32, i32
  }
  func.func @transform_2(%arg0: i32) -> (i32, i32) {
    %c0_i32 = arith.constant 0 : i32
    %c0_i32_0 = arith.constant 0 : i32
    %c0_i32_1 = arith.constant 0 : i32
    return %c0_i32, %c0_i32_0 : i32, i32
  }
  func.func @transform_3(%arg0: i32) -> (i32, i32, i32) {
    %c0_i32 = arith.constant 0 : i32
    %c0_i32_0 = arith.constant 0 : i32
    %c0_i32_1 = arith.constant 0 : i32
    return %arg0, %c0_i32, %c0_i32_0 : i32, i32, i32
  }
}

module attributes {stable_mosaic.version = 11 : i64} {
  func.func @_conv_bn_kernel(%arg0: i32, %arg1: memref<1x288x4xbf16, #tpu.memory_space<vmem>>, %arg2: memref<1x4x128xbf16, #tpu.memory_space<vmem>>, %arg3: memref<1x128xf32, #tpu.memory_space<vmem>>, %arg4: memref<1x288x128xbf16, #tpu.memory_space<vmem>>) attributes {dimension_semantics = [#tpu.dimension_semantics<parallel>], iteration_bounds = array<i64: 2>, scalar_prefetch = 0 : i64, scratch_operands = 0 : i64, tpu.core_type = #tpu.core_type<tc>, window_params = [{transform_indices = @transform_0, window_bounds = array<i64: 1, 288, 4>}, {pipeline_mode = #tpu.pipeline_mode<synchronous>, transform_indices = @transform_1, window_bounds = array<i64: 1, 4, 128>}, {pipeline_mode = #tpu.pipeline_mode<synchronous>, transform_indices = @transform_2, window_bounds = array<i64: 1, 128>}, {transform_indices = @transform_3, window_bounds = array<i64: 1, 288, 128>}]} {
    %c0 = arith.constant 0 : index
    %c0_0 = arith.constant 0 : index
    %c0_1 = arith.constant 0 : index
    %0 = vector.load %arg1[%c0, %c0_0, %c0_1] : memref<1x288x4xbf16, #tpu.memory_space<vmem>>, vector<1x288x4xbf16>
    %1 = vector.shape_cast %0 : vector<1x288x4xbf16> to vector<288x4xbf16>
    %c0_2 = arith.constant 0 : index
    %c0_3 = arith.constant 0 : index
    %c0_4 = arith.constant 0 : index
    %2 = vector.load %arg2[%c0_2, %c0_3, %c0_4] : memref<1x4x128xbf16, #tpu.memory_space<vmem>>, vector<1x4x128xbf16>
    %3 = vector.shape_cast %2 : vector<1x4x128xbf16> to vector<4x128xbf16>
    %cst = arith.constant dense<0.000000e+00> : vector<288x128xf32>
    %4 = tpu.matmul %1, %3, %cst {dimension_numbers = #tpu.dot_dimension_numbers<[1], [0], [0], [1], [0, 0, 1, 1], [], []>} : vector<288x4xbf16>, vector<4x128xbf16>, vector<288x128xf32> -> vector<288x128xf32>
    %c0_5 = arith.constant 0 : index
    %c0_6 = arith.constant 0 : index
    %5 = vector.load %arg3[%c0_5, %c0_6] : memref<1x128xf32, #tpu.memory_space<vmem>>, vector<1x128xf32>
    %6 = vector.broadcast %5 : vector<1x128xf32> to vector<288x128xf32>
    %7 = arith.addf %4, %6 : vector<288x128xf32>
    %8 = arith.truncf %7 : vector<288x128xf32> to vector<288x128xbf16>
    %c0_7 = arith.constant 0 : index
    %c0_8 = arith.constant 0 : index
    %c0_9 = arith.constant 0 : index
    %9 = vector.load %arg4[%c0_7, %c0_8, %c0_9] : memref<1x288x128xbf16, #tpu.memory_space<vmem>>, vector<1x288x128xbf16>
    %10 = vector.shape_cast %9 : vector<1x288x128xbf16> to vector<288x128xbf16>
    %11 = vector.shape_cast %8 : vector<288x128xbf16> to vector<1x288x128xbf16>
    tpu.vector_store %arg4[%c0_7, %c0_8, %c0_9], %11 {strides = array<i32>} : memref<1x288x128xbf16, #tpu.memory_space<vmem>>, vector<1x288x128xbf16>,
    return
  }
  func.func @transform_0(%arg0: i32) -> (i32, i32, i32) {
    %c0_i32 = arith.constant 0 : i32
    %c0_i32_0 = arith.constant 0 : i32
    %c0_i32_1 = arith.constant 0 : i32
    return %arg0, %c0_i32, %c0_i32_0 : i32, i32, i32
  }
  func.func @transform_1(%arg0: i32) -> (i32, i32, i32) {
    %c0_i32 = arith.constant 0 : i32
    %c0_i32_0 = arith.constant 0 : i32
    %c0_i32_1 = arith.constant 0 : i32
    %c0_i32_2 = arith.constant 0 : i32
    return %c0_i32, %c0_i32_0, %c0_i32_1 : i32, i32, i32
  }
  func.func @transform_2(%arg0: i32) -> (i32, i32) {
    %c0_i32 = arith.constant 0 : i32
    %c0_i32_0 = arith.constant 0 : i32
    %c0_i32_1 = arith.constant 0 : i32
    return %c0_i32, %c0_i32_0 : i32, i32
  }
  func.func @transform_3(%arg0: i32) -> (i32, i32, i32) {
    %c0_i32 = arith.constant 0 : i32
    %c0_i32_0 = arith.constant 0 : i32
    %c0_i32_1 = arith.constant 0 : i32
    return %arg0, %c0_i32, %c0_i32_0 : i32, i32, i32
  }
}

module attributes {stable_mosaic.version = 11 : i64} {
  func.func @_conv_bn_kernel(%arg0: i32, %arg1: memref<1x342x8xf32, #tpu.memory_space<vmem>>, %arg2: memref<9x8x128xbf16, #tpu.memory_space<vmem>>, %arg3: memref<1x128xf32, #tpu.memory_space<vmem>>, %arg4: memref<1x288x128xbf16, #tpu.memory_space<vmem>>, %arg5: memref<1x288x128xbf16, #tpu.memory_space<vmem>>) attributes {dimension_semantics = [#tpu.dimension_semantics<parallel>], iteration_bounds = array<i64: 2>, scalar_prefetch = 0 : i64, scratch_operands = 0 : i64, tpu.core_type = #tpu.core_type<tc>, window_params = [{transform_indices = @transform_0, window_bounds = array<i64: 1, 342, 8>}, {pipeline_mode = #tpu.pipeline_mode<synchronous>, transform_indices = @transform_1, window_bounds = array<i64: 9, 8, 128>}, {pipeline_mode = #tpu.pipeline_mode<synchronous>, transform_indices = @transform_2, window_bounds = array<i64: 1, 128>}, {transform_indices = @transform_3, window_bounds = array<i64: 1, 288, 128>}, {transform_indices = @transform_4, window_bounds = array<i64: 1, 288, 128>}]} {
    %c0 = arith.constant 0 : index
    %c0_0 = arith.constant 0 : index
    %c0_1 = arith.constant 0 : index
    %0 = vector.load %arg1[%c0, %c0_0, %c0_1] : memref<1x342x8xf32, #tpu.memory_space<vmem>>, vector<1x288x8xf32>
    %1 = vector.shape_cast %0 : vector<1x288x8xf32> to vector<288x8xf32>
    %2 = arith.truncf %1 : vector<288x8xf32> to vector<288x8xbf16>
    %c0_2 = arith.constant 0 : index
    %c0_3 = arith.constant 0 : index
    %c0_4 = arith.constant 0 : index
    %3 = vector.load %arg2[%c0_2, %c0_3, %c0_4] : memref<9x8x128xbf16, #tpu.memory_space<vmem>>, vector<1x8x128xbf16>
    %4 = vector.shape_cast %3 : vector<1x8x128xbf16> to vector<8x128xbf16>
    %cst = arith.constant dense<0.000000e+00> : vector<288x128xf32>
    %5 = tpu.matmul %2, %4, %cst {dimension_numbers = #tpu.dot_dimension_numbers<[1], [0], [0], [1], [0, 0, 1, 1], [], []>} : vector<288x8xbf16>, vector<8x128xbf16>, vector<288x128xf32> -> vector<288x128xf32>
    %c0_5 = arith.constant 0 : index
    %c1 = arith.constant 1 : index
    %c0_6 = arith.constant 0 : index
    %6 = vector.load %arg1[%c0_5, %c1, %c0_6] : memref<1x342x8xf32, #tpu.memory_space<vmem>>, vector<1x288x8xf32>
    %7 = vector.shape_cast %6 : vector<1x288x8xf32> to vector<288x8xf32>
    %8 = arith.truncf %7 : vector<288x8xf32> to vector<288x8xbf16>
    %c1_7 = arith.constant 1 : index
    %c0_8 = arith.constant 0 : index
    %c0_9 = arith.constant 0 : index
    %9 = vector.load %arg2[%c1_7, %c0_8, %c0_9] : memref<9x8x128xbf16, #tpu.memory_space<vmem>>, vector<1x8x128xbf16>
    %10 = vector.shape_cast %9 : vector<1x8x128xbf16> to vector<8x128xbf16>
    %cst_10 = arith.constant dense<0.000000e+00> : vector<288x128xf32>
    %11 = tpu.matmul %8, %10, %cst_10 {dimension_numbers = #tpu.dot_dimension_numbers<[1], [0], [0], [1], [0, 0, 1, 1], [], []>} : vector<288x8xbf16>, vector<8x128xbf16>, vector<288x128xf32> -> vector<288x128xf32>
    %12 = arith.addf %5, %11 : vector<288x128xf32>
    %c0_11 = arith.constant 0 : index
    %c2 = arith.constant 2 : index
    %c0_12 = arith.constant 0 : index
    %13 = vector.load %arg1[%c0_11, %c2, %c0_12] : memref<1x342x8xf32, #tpu.memory_space<vmem>>, vector<1x288x8xf32>
    %14 = vector.shape_cast %13 : vector<1x288x8xf32> to vector<288x8xf32>
    %15 = arith.truncf %14 : vector<288x8xf32> to vector<288x8xbf16>
    %c2_13 = arith.constant 2 : index
    %c0_14 = arith.constant 0 : index
    %c0_15 = arith.constant 0 : index
    %16 = vector.load %arg2[%c2_13, %c0_14, %c0_15] : memref<9x8x128xbf16, #tpu.memory_space<vmem>>, vector<1x8x128xbf16>
    %17 = vector.shape_cast %16 : vector<1x8x128xbf16> to vector<8x128xbf16>
    %cst_16 = arith.constant dense<0.000000e+00> : vector<288x128xf32>
    %18 = tpu.matmul %15, %17, %cst_16 {dimension_numbers = #tpu.dot_dimension_numbers<[1], [0], [0], [1], [0, 0, 1, 1], [], []>} : vector<288x8xbf16>, vector<8x128xbf16>, vector<288x128xf32> -> vector<288x128xf32>
    %19 = arith.addf %12, %18 : vector<288x128xf32>
    %c0_17 = arith.constant 0 : index
    %c18 = arith.constant 18 : index
    %c0_18 = arith.constant 0 : index
    %20 = vector.load %arg1[%c0_17, %c18, %c0_18] : memref<1x342x8xf32, #tpu.memory_space<vmem>>, vector<1x288x8xf32>
    %21 = vector.shape_cast %20 : vector<1x288x8xf32> to vector<288x8xf32>
    %22 = arith.truncf %21 : vector<288x8xf32> to vector<288x8xbf16>
    %c3 = arith.constant 3 : index
    %c0_19 = arith.constant 0 : index
    %c0_20 = arith.constant 0 : index
    %23 = vector.load %arg2[%c3, %c0_19, %c0_20] : memref<9x8x128xbf16, #tpu.memory_space<vmem>>, vector<1x8x128xbf16>
    %24 = vector.shape_cast %23 : vector<1x8x128xbf16> to vector<8x128xbf16>
    %cst_21 = arith.constant dense<0.000000e+00> : vector<288x128xf32>
    %25 = tpu.matmul %22, %24, %cst_21 {dimension_numbers = #tpu.dot_dimension_numbers<[1], [0], [0], [1], [0, 0, 1, 1], [], []>} : vector<288x8xbf16>, vector<8x128xbf16>, vector<288x128xf32> -> vector<288x128xf32>
    %26 = arith.addf %19, %25 : vector<288x128xf32>
    %c0_22 = arith.constant 0 : index
    %c19 = arith.constant 19 : index
    %c0_23 = arith.constant 0 : index
    %27 = vector.load %arg1[%c0_22, %c19, %c0_23] : memref<1x342x8xf32, #tpu.memory_space<vmem>>, vector<1x288x8xf32>
    %28 = vector.shape_cast %27 : vector<1x288x8xf32> to vector<288x8xf32>
    %29 = arith.truncf %28 : vector<288x8xf32> to vector<288x8xbf16>
    %c4 = arith.constant 4 : index
    %c0_24 = arith.constant 0 : index
    %c0_25 = arith.constant 0 : index
    %30 = vector.load %arg2[%c4, %c0_24, %c0_25] : memref<9x8x128xbf16, #tpu.memory_space<vmem>>, vector<1x8x128xbf16>
    %31 = vector.shape_cast %30 : vector<1x8x128xbf16> to vector<8x128xbf16>
    %cst_26 = arith.constant dense<0.000000e+00> : vector<288x128xf32>
    %32 = tpu.matmul %29, %31, %cst_26 {dimension_numbers = #tpu.dot_dimension_numbers<[1], [0], [0], [1], [0, 0, 1, 1], [], []>} : vector<288x8xbf16>, vector<8x128xbf16>, vector<288x128xf32> -> vector<288x128xf32>
    %33 = arith.addf %26, %32 : vector<288x128xf32>
    %c0_27 = arith.constant 0 : index
    %c20 = arith.constant 20 : index
    %c0_28 = arith.constant 0 : index
    %34 = vector.load %arg1[%c0_27, %c20, %c0_28] : memref<1x342x8xf32, #tpu.memory_space<vmem>>, vector<1x288x8xf32>
    %35 = vector.shape_cast %34 : vector<1x288x8xf32> to vector<288x8xf32>
    %36 = arith.truncf %35 : vector<288x8xf32> to vector<288x8xbf16>
    %c5 = arith.constant 5 : index
    %c0_29 = arith.constant 0 : index
    %c0_30 = arith.constant 0 : index
    %37 = vector.load %arg2[%c5, %c0_29, %c0_30] : memref<9x8x128xbf16, #tpu.memory_space<vmem>>, vector<1x8x128xbf16>
    %38 = vector.shape_cast %37 : vector<1x8x128xbf16> to vector<8x128xbf16>
    %cst_31 = arith.constant dense<0.000000e+00> : vector<288x128xf32>
    %39 = tpu.matmul %36, %38, %cst_31 {dimension_numbers = #tpu.dot_dimension_numbers<[1], [0], [0], [1], [0, 0, 1, 1], [], []>} : vector<288x8xbf16>, vector<8x128xbf16>, vector<288x128xf32> -> vector<288x128xf32>
    %40 = arith.addf %33, %39 : vector<288x128xf32>
    %c0_32 = arith.constant 0 : index
    %c36 = arith.constant 36 : index
    %c0_33 = arith.constant 0 : index
    %41 = vector.load %arg1[%c0_32, %c36, %c0_33] : memref<1x342x8xf32, #tpu.memory_space<vmem>>, vector<1x288x8xf32>
    %42 = vector.shape_cast %41 : vector<1x288x8xf32> to vector<288x8xf32>
    %43 = arith.truncf %42 : vector<288x8xf32> to vector<288x8xbf16>
    %c6 = arith.constant 6 : index
    %c0_34 = arith.constant 0 : index
    %c0_35 = arith.constant 0 : index
    %44 = vector.load %arg2[%c6, %c0_34, %c0_35] : memref<9x8x128xbf16, #tpu.memory_space<vmem>>, vector<1x8x128xbf16>
    %45 = vector.shape_cast %44 : vector<1x8x128xbf16> to vector<8x128xbf16>
    %cst_36 = arith.constant dense<0.000000e+00> : vector<288x128xf32>
    %46 = tpu.matmul %43, %45, %cst_36 {dimension_numbers = #tpu.dot_dimension_numbers<[1], [0], [0], [1], [0, 0, 1, 1], [], []>} : vector<288x8xbf16>, vector<8x128xbf16>, vector<288x128xf32> -> vector<288x128xf32>
    %47 = arith.addf %40, %46 : vector<288x128xf32>
    %c0_37 = arith.constant 0 : index
    %c37 = arith.constant 37 : index
    %c0_38 = arith.constant 0 : index
    %48 = vector.load %arg1[%c0_37, %c37, %c0_38] : memref<1x342x8xf32, #tpu.memory_space<vmem>>, vector<1x288x8xf32>
    %49 = vector.shape_cast %48 : vector<1x288x8xf32> to vector<288x8xf32>
    %50 = arith.truncf %49 : vector<288x8xf32> to vector<288x8xbf16>
    %c7 = arith.constant 7 : index
    %c0_39 = arith.constant 0 : index
    %c0_40 = arith.constant 0 : index
    %51 = vector.load %arg2[%c7, %c0_39, %c0_40] : memref<9x8x128xbf16, #tpu.memory_space<vmem>>, vector<1x8x128xbf16>
    %52 = vector.shape_cast %51 : vector<1x8x128xbf16> to vector<8x128xbf16>
    %cst_41 = arith.constant dense<0.000000e+00> : vector<288x128xf32>
    %53 = tpu.matmul %50, %52, %cst_41 {dimension_numbers = #tpu.dot_dimension_numbers<[1], [0], [0], [1], [0, 0, 1, 1], [], []>} : vector<288x8xbf16>, vector<8x128xbf16>, vector<288x128xf32> -> vector<288x128xf32>
    %54 = arith.addf %47, %53 : vector<288x128xf32>
    %c0_42 = arith.constant 0 : index
    %c38 = arith.constant 38 : index
    %c0_43 = arith.constant 0 : index
    %55 = vector.load %arg1[%c0_42, %c38, %c0_43] : memref<1x342x8xf32, #tpu.memory_space<vmem>>, vector<1x288x8xf32>
    %56 = vector.shape_cast %55 : vector<1x288x8xf32> to vector<288x8xf32>
    %57 = arith.truncf %56 : vector<288x8xf32> to vector<288x8xbf16>
    %c8 = arith.constant 8 : index
    %c0_44 = arith.constant 0 : index
    %c0_45 = arith.constant 0 : index
    %58 = vector.load %arg2[%c8, %c0_44, %c0_45] : memref<9x8x128xbf16, #tpu.memory_space<vmem>>, vector<1x8x128xbf16>
    %59 = vector.shape_cast %58 : vector<1x8x128xbf16> to vector<8x128xbf16>
    %cst_46 = arith.constant dense<0.000000e+00> : vector<288x128xf32>
    %60 = tpu.matmul %57, %59, %cst_46 {dimension_numbers = #tpu.dot_dimension_numbers<[1], [0], [0], [1], [0, 0, 1, 1], [], []>} : vector<288x8xbf16>, vector<8x128xbf16>, vector<288x128xf32> -> vector<288x128xf32>
    %61 = arith.addf %54, %60 : vector<288x128xf32>
    %c0_47 = arith.constant 0 : index
    %c0_48 = arith.constant 0 : index
    %62 = vector.load %arg3[%c0_47, %c0_48] : memref<1x128xf32, #tpu.memory_space<vmem>>, vector<1x128xf32>
    %63 = vector.broadcast %62 : vector<1x128xf32> to vector<288x128xf32>
    %64 = arith.addf %61, %63 : vector<288x128xf32>
    %c0_49 = arith.constant 0 : index
    %c0_50 = arith.constant 0 : index
    %c0_51 = arith.constant 0 : index
    %65 = vector.load %arg4[%c0_49, %c0_50, %c0_51] : memref<1x288x128xbf16, #tpu.memory_space<vmem>>, vector<1x288x128xbf16>
    %66 = vector.shape_cast %65 : vector<1x288x128xbf16> to vector<288x128xbf16>
    %67 = arith.extf %66 : vector<288x128xbf16> to vector<288x128xf32>
    %68 = arith.addf %64, %67 : vector<288x128xf32>
    %cst_52 = arith.constant 0.000000e+00 : f32
    %69 = vector.broadcast %cst_52 : f32 to vector<288x128xf32>
    %70 = arith.maximumf %68, %69 : vector<288x128xf32>
    %71 = arith.truncf %70 : vector<288x128xf32> to vector<288x128xbf16>
    %c0_53 = arith.constant 0 : index
    %c0_54 = arith.constant 0 : index
    %c0_55 = arith.constant 0 : index
    %72 = vector.load %arg5[%c0_53, %c0_54, %c0_55] : memref<1x288x128xbf16, #tpu.memory_space<vmem>>, vector<1x288x128xbf16>
    %73 = vector.shape_cast %72 : vector<1x288x128xbf16> to vector<288x128xbf16>
    %74 = vector.shape_cast %71 : vector<288x128xbf16> to vector<1x288x128xbf16>
    tpu.vector_store %arg5[%c0_53, %c0_54, %c0_55], %74 {strides = array<i32>} : memref<1x288x128xbf16, #tpu.memory_space<vmem>>, vector<1x288x128xbf16>,
    return
  }
  func.func @transform_0(%arg0: i32) -> (i32, i32, i32) {
    %c0_i32 = arith.constant 0 : i32
    %c0_i32_0 = arith.constant 0 : i32
    %c0_i32_1 = arith.constant 0 : i32
    return %arg0, %c0_i32, %c0_i32_0 : i32, i32, i32
  }
  func.func @transform_1(%arg0: i32) -> (i32, i32, i32) {
    %c0_i32 = arith.constant 0 : i32
    %c0_i32_0 = arith.constant 0 : i32
    %c0_i32_1 = arith.constant 0 : i32
    %c0_i32_2 = arith.constant 0 : i32
    return %c0_i32, %c0_i32_0, %c0_i32_1 : i32, i32, i32
  }
  func.func @transform_2(%arg0: i32) -> (i32, i32) {
    %c0_i32 = arith.constant 0 : i32
    %c0_i32_0 = arith.constant 0 : i32
    %c0_i32_1 = arith.constant 0 : i32
    return %c0_i32, %c0_i32_0 : i32, i32
  }
  func.func @transform_3(%arg0: i32) -> (i32, i32, i32) {
    %c0_i32 = arith.constant 0 : i32
    %c0_i32_0 = arith.constant 0 : i32
    %c0_i32_1 = arith.constant 0 : i32
    return %arg0, %c0_i32, %c0_i32_0 : i32, i32, i32
  }
  func.func @transform_4(%arg0: i32) -> (i32, i32, i32) {
    %c0_i32 = arith.constant 0 : i32
    %c0_i32_0 = arith.constant 0 : i32
    %c0_i32_1 = arith.constant 0 : i32
    return %arg0, %c0_i32, %c0_i32_0 : i32, i32, i32
  }
}

</mosaic_0001>

<bundles_post_ra>
// kernel: resnet_block_forward.3
= control target key start
LH: loop header
LB: loop body
LE: loop exit
PB: predicated region body
PF: predicated region fallthrough
CT: control target
= control target key end

     0   :  { %s2864_s12 = smov 0   ;;  %s3717_s0 = inlined_call_operand.vmem [shape: f32[2,342,4], index: 0, kind: input, shape index: {}]   ;;  %s3718_s1 = inlined_call_operand.vmem [shape: bf16[9,4,128], index: 1, kind: input, shape index: {}]   ;;  %s3719_s2 = inlined_call_operand.vmem [shape: f32[1,128], index: 2, kind: input, shape index: {}]   ;;  %s3720_s3 = inlined_call_operand.vmem [shape: bf16[2,288,128], index: 3, kind: output, shape index: {}]  }
   0x1 LB: > { %s2536_s13 = sadd.s32 4294967295, %s2842_s12   ;;  %p2540_p0 = scmp.ge.s32.totalorder %s2842_s12, 1  ;;  %s2842_s12 = sphi %s2864_s12, %s13_s12  }
   0x2   : > { %p137_p1 = scmp.lt.s32.totalorder %s2842_s12, 3 }
   0x4   : > { %p138_p2 = pnand %p2540_p0, %p137_p1 }
   0x5   : > { %p161_p3 = scmp.lt.s32.totalorder (!%p138_p2), %s2536_s13, 1 }
   0x6   : > { %141 = sbr.rel (%p138_p2) target bundleno = 813 (0x32d), region = 32 }
   0xb   : > { %v2543_v0 = vld [vmem:[%s3718_s1 + $0x2] sm:$0x3]  ;;  %vm338_vm0 = vcmask 1041408   ;;  %v2580_v2 = vld [vmem:[%s3718_s1 + $0x4] sm:$0x3]  ;;  %s3722_s13 = smov (!%p161_p3, %s2536_s13), 1 }
   0xc   : > { %v340_v1 = vsel %vm338_vm0, %v2543_v0, 0  ;;  %v226_v3 = vld [vmem:[%s3718_s1] sm:$0x3]  ;;  %v708_v4 = vsel %vm338_vm0, %v2580_v2, 0  ;;  %v2618_v6 = vld [vmem:[%s3718_s1 + $0x8] sm:$0x3] }
   0xd   : > { %2822 = vmatpush.bf16.msra.mxu1 %v340_v1  ;;  %2823 = vmatpush.bf16.msra.mxu2 %v340_v1  ;;  %v496_v5 = vsel %vm338_vm0, %v226_v3, 0  ;;  %v1204_v7 = vsel %vm338_vm0, %v2618_v6, 0  ;;  %s2825_s22 = smul.u32 344, %s3722_s13  ;;  %vm283_vm1 = vcmask 31744   ;;  %v2599_v20 = vld [vmem:[%s3718_s1 + $0x6] sm:$0x3] }
   0xe   : > { %349 = vmatpush.bf16.msra.mxu0 %v340_v1  ;;  %2824 = vmatpush.bf16.msra.mxu3 %v340_v1  ;;  %v956_v21 = vsel %vm338_vm0, %v2599_v20, 0  ;;  %v2656_v58 = vld [vmem:[%s3718_s1 + $0xc] sm:$0x3]  ;;  %v2675_v59 = vld [vmem:[%s3718_s1 + $0xe] sm:$0x3]  ;;  %s2826_s11 = smul.u32 144, %s3722_s13 }
   0xf   : > { %s2894_s25 = scalar_lea.vmem %s3717_s0, %s2825_s22  ;;  %v2637_v60 = vld [vmem:[%s3718_s1 + $0xa] sm:$0x3]  ;;  %v1700_v61 = vsel %vm338_vm0, %v2656_v58, 0  ;;  %v1948_v62 = vsel %vm338_vm0, %v2675_v59, 0  ;;  %v2694_v0 = vld [vmem:[%s3718_s1 + $0x10] sm:$0x3] }
  0x10   : > { %v237_v8 = vld [vmem:[%s2894_s25 + $0x51] sm:$0xff]  ;;  %v238_v9 = vld [vmem:[%s2894_s25 + $0x59] sm:$0xff]  ;;  %v247_v10 = vld [vmem:[%s2894_s25 + $0xa1] sm:$0xff]  ;;  %v1452_v63 = vsel %vm338_vm0, %v2637_v60, 0  ;;  %v2196_v1 = vsel %vm338_vm0, %v2694_v0, 0  ;;  %s3510_s16 = scalar_lea.vmem %s3720_s3, %s2826_s11 }
  0x11   : > { %717 = vmatpush.bf16.msrb.mxu2 %v708_v4  ;;  %505 = vmatpush.bf16.msrb.mxu1 %v496_v5  ;;  %v268_v11 = vpack.c.bf16 %v238_v9, %v237_v8  ;;  %v248_v12 = vld [vmem:[%s2894_s25 + $0xa9] sm:$0xff]  ;;  %v227_v13 = vld [vmem:[%s2894_s25 + $0x1] sm:$0xff]  ;;  %v257_v17 = vld [vmem:[%s2894_s25 + $0xf1] sm:$0xff] }
  0x12   : > { %1213 = vmatpush.bf16.msrb.mxu0 %v1204_v7  ;;  %v228_v14 = vld [vmem:[%s2894_s25 + $0x9] sm:$0xff]  ;;  %v273_v15 = vpack.c.bf16 %v248_v12, %v247_v10  ;;  %v258_v18 = vld [vmem:[%s2894_s25 + $0xf9] sm:$0xff]  ;;  %965 = vmatpush.bf16.msrb.mxu3 %v956_v21  ;;  %v239_v22 = vld [vmem:[%s2894_s25 + $0x61] sm:$0xff] }
  0x13   : > { %v263_v16 = vpack.c.bf16 %v228_v14, %v227_v13  ;;  %2549 = vmatmul.msk.bf16.vlgmr.msra.gmra.mxu1 %vm283_vm1, %v268_v11  ;;  %v278_v19 = vpack.c.bf16 %v258_v18, %v257_v17  ;;  %v240_v23 = vld [vmem:[%s2894_s25 + $0x69] sm:$0xff]  ;;  %v249_v24 = vld [vmem:[%s2894_s25 + $0xb1] sm:$0xff]  ;;  %v250_v25 = vld [vmem:[%s2894_s25 + $0xb9] sm:$0xff] }
  0x14   : > { %2554 = vmatmul.msk.bf16.vlgmr.msra.gmra.mxu2 %vm283_vm1, %v273_v15  ;;  %v229_v26 = vld [vmem:[%s2894_s25 + $0x11] sm:$0xff]  ;;  %v230_v27 = vld [vmem:[%s2894_s25 + $0x19] sm:$0xff]  ;;  %v269_v28 = vpack.c.bf16 %v240_v23, %v239_v22  ;;  %v274_v29 = vpack.c.bf16 %v250_v25, %v249_v24  ;;  %v259_v31 = vld [vmem:[%s2894_s25 + $0x101] sm:$0xff] }
  0x15   : > { %2544 = vmatmul.msk.bf16.vlgmr.msra.gmra.mxu0 %vm283_vm1, %v263_v16  ;;  %2559 = vmatmul.msk.bf16.vlgmr.msra.gmra.mxu3 %vm283_vm1, %v278_v19  ;;  %v264_v30 = vpack.c.bf16 %v230_v27, %v229_v26  ;;  %v260_v32 = vld [vmem:[%s2894_s25 + $0x109] sm:$0xff]  ;;  %v241_v34 = vld [vmem:[%s2894_s25 + $0x71] sm:$0xff]  ;;  %v242_v35 = vld [vmem:[%s2894_s25 + $0x79] sm:$0xff] }
  0x16   : > { %v279_v33 = vpack.c.bf16 %v260_v32, %v259_v31  ;;  %v251_v36 = vld [vmem:[%s2894_s25 + $0xc1] sm:$0xff]  ;;  %v252_v37 = vld [vmem:[%s2894_s25 + $0xc9] sm:$0xff]  ;;  %v270_v40 = vpack.c.bf16 %v242_v35, %v241_v34  ;;  %v261_v43 = vld [vmem:[%s2894_s25 + $0x111] sm:$0xff]  ;;  %1709 = vmatpush.bf16.msra.mxu2 %v1700_v61  ;;  %1957 = vmatpush.bf16.msra.mxu3 %v1948_v62 }
  0x17   : > { %v231_v38 = vld [vmem:[%s2894_s25 + $0x21] sm:$0xff]  ;;  %v232_v39 = vld [vmem:[%s2894_s25 + $0x29] sm:$0xff]  ;;  %v275_v41 = vpack.c.bf16 %v252_v37, %v251_v36  ;;  %v262_v44 = vld [vmem:[%s2894_s25 + $0x119] sm:$0xff]  ;;  %1461 = vmatpush.bf16.msra.mxu1 %v1452_v63  ;;  %2205 = vmatpush.bf16.msra.mxu0 %v2196_v1 }
  0x18   : > { %v265_v42 = vpack.c.bf16 %v232_v39, %v231_v38  ;;  %v280_v45 = vpack.c.bf16 %v262_v44, %v261_v43  ;;  %v243_v46 = vld [vmem:[%s2894_s25 + $0x81] sm:$0xff]  ;;  %v244_v47 = vld [vmem:[%s2894_s25 + $0x89] sm:$0xff]  ;;  %v253_v48 = vld [vmem:[%s2894_s25 + $0xd1] sm:$0xff] }
  0x19   : > { %v254_v49 = vld [vmem:[%s2894_s25 + $0xd9] sm:$0xff]  ;;  %v233_v50 = vld [vmem:[%s2894_s25 + $0x31] sm:$0xff]  ;;  %v271_v52 = vpack.c.bf16 %v244_v47, %v243_v46  ;;  %v255_v4 = vld [vmem:[%s2894_s25 + $0xe1] sm:$0xff] }
  0x1a   : > { %v234_v51 = vld [vmem:[%s2894_s25 + $0x39] sm:$0xff]  ;;  %v276_v53 = vpack.c.bf16 %v254_v49, %v253_v48  ;;  %v245_v2 = vld [vmem:[%s2894_s25 + $0x91] sm:$0xff]  ;;  %v256_v5 = vld [vmem:[%s2894_s25 + $0xe9] sm:$0xff] }
  0x1b   : > { %v266_v54 = vpack.c.bf16 %v234_v51, %v233_v50  ;;  %v845_v55 = vld [vmem:[%s2894_s25 + $0x12] sm:$0xff]  ;;  %v846_v56 = vld [vmem:[%s2894_s25 + $0x1a] sm:$0xff]  ;;  %v236_v7 = vld [vmem:[%s2894_s25 + $0x49] sm:$0xff]  ;;  %v277_v9 = vpack.c.bf16 %v256_v5, %v255_v4 }
  0x1c   : > { %v881_v57 = vpack.c.bf16 %v846_v56, %v845_v55  ;;  %v246_v3 = vld [vmem:[%s2894_s25 + $0x99] sm:$0xff]  ;;  %v235_v6 = vld [vmem:[%s2894_s25 + $0x41] sm:$0xff]  ;;  %v848_v12 = vld [vmem:[%s2894_s25 + $0x2a] sm:$0xff] }
  0x1d   : > { %v272_v8 = vpack.c.bf16 %v246_v3, %v245_v2  ;;  %v267_v10 = vpack.c.bf16 %v236_v7, %v235_v6  ;;  %v847_v11 = vld [vmem:[%s2894_s25 + $0x22] sm:$0xff]  ;;  %v598_v17 = vld [vmem:[%s2894_s25 + $0xa] sm:$0xff]  ;;  %v1093_v18 = vld [vmem:[%s2894_s25 + $0x13] sm:$0xff] }
  0x1e   : > { %v882_v13 = vpack.c.bf16 %v848_v12, %v847_v11  ;;  %v172_v14 = vld [vmem:[%s2894_s25] sm:$0xff]  ;;  %v173_v15 = vld [vmem:[%s2894_s25 + $0x8] sm:$0xff]  ;;  %v849_v23 = vld [vmem:[%s2894_s25 + $0x32] sm:$0xff] }
  0x1f   : > { %v597_v16 = vld [vmem:[%s2894_s25 + $0x2] sm:$0xff]  ;;  %v208_v20 = vpack.c.bf16 %v173_v15, %v172_v14  ;;  %v850_v24 = vld [vmem:[%s2894_s25 + $0x3a] sm:$0xff]  ;;  %v174_v26 = vld [vmem:[%s2894_s25 + $0x10] sm:$0xff] }
  0x20   : > { %v1094_v19 = vld [vmem:[%s2894_s25 + $0x1b] sm:$0xff]  ;;  %v633_v21 = vpack.c.bf16 %v598_v17, %v597_v16  ;;  %v883_v25 = vpack.c.bf16 %v850_v24, %v849_v23  ;;  %v177_v36 = vld [vmem:[%s2894_s25 + $0x28] sm:$0xff]  ;;  %v1097_v37 = vld [vmem:[%s2894_s25 + $0x33] sm:$0xff] }
  0x21   : > { %v1129_v22 = vpack.c.bf16 %v1094_v19, %v1093_v18  ;;  %v175_v27 = vld [vmem:[%s2894_s25 + $0x18] sm:$0xff]  ;;  %v851_v32 = vld [vmem:[%s2894_s25 + $0x42] sm:$0xff]  ;;  %v178_v44 = vld [vmem:[%s2894_s25 + $0x30] sm:$0xff] }
  0x22   : > { %v176_v35 = vld [vmem:[%s2894_s25 + $0x20] sm:$0xff]  ;;  %v1100_v47 = vld [vmem:[%s2894_s25 + $0x4b] sm:$0xff]  ;;  %v1101_v61 = vld [vmem:[%s2894_s25 + $0x53] sm:$0xff] }
  0x23   : > { %2550 = vmatmul.msk.bf16.gmra.mxu1 %vm283_vm1, %v269_v28  ;;  %v1095_v28 = vld [vmem:[%s2894_s25 + $0x23] sm:$0xff]  ;;  %v1098_v38 = vld [vmem:[%s2894_s25 + $0x3b] sm:$0xff]  ;;  %v210_v39 = vpack.c.bf16 %v177_v36, %v176_v35  ;;  %v857_v3 = vld [vmem:[%s2894_s25 + $0x72] sm:$0xff] }
  0x24   : > { %2555 = vmatmul.msk.bf16.gmra.mxu2 %vm283_vm1, %v274_v29  ;;  %v1096_v29 = vld [vmem:[%s2894_s25 + $0x2b] sm:$0xff]  ;;  %v1099_v46 = vld [vmem:[%s2894_s25 + $0x43] sm:$0xff]  ;;  %v1102_v62 = vld [vmem:[%s2894_s25 + $0x5b] sm:$0xff] }
  0x25   : > { %2545 = vmatmul.msk.bf16.gmra.mxu0 %vm283_vm1, %v264_v30  ;;  %2560 = vmatmul.msk.bf16.gmra.mxu3 %vm283_vm1, %v279_v33  ;;  %v209_v30 = vpack.c.bf16 %v175_v27, %v174_v26  ;;  %v1130_v31 = vpack.c.bf16 %v1096_v29, %v1095_v28  ;;  %v852_v33 = vld [vmem:[%s2894_s25 + $0x4a] sm:$0xff]  ;;  %v1132_v50 = vpack.c.bf16 %v1100_v47, %v1099_v46  ;;  %v855_v51 = vld [vmem:[%s2894_s25 + $0x62] sm:$0xff]  ;;  %v858_v4 = vld [vmem:[%s2894_s25 + $0x7a] sm:$0xff] }
  0x26   : > { %v884_v34 = vpack.c.bf16 %v852_v33, %v851_v32  ;;  %v180_v59 = vld [vmem:[%s2894_s25 + $0x40] sm:$0xff]  ;;  %v181_v60 = vld [vmem:[%s2894_s25 + $0x48] sm:$0xff]  ;;  %v1133_v2 = vpack.c.bf16 %v1102_v62, %v1101_v61  ;;  %v3048_v7 = vpack.c.bf16 %v858_v4, %v857_v3  ;;  %v182_v12 = vld [vmem:[%s2894_s25 + $0x50] sm:$0xff] }
  0x27   : > { %v212_v0 = vpack.c.bf16 %v181_v60, %v180_v59  ;;  %v1103_v14 = vld [vmem:[%s2894_s25 + $0x63] sm:$0xff]  ;;  %v1104_v15 = vld [vmem:[%s2894_s25 + $0x6b] sm:$0xff]  ;;  %v1106_v32 = vld [vmem:[%s2894_s25 + $0x7b] sm:$0xff] }
  0x28   : > { %v1134_v19 = vpack.c.bf16 %v1104_v15, %v1103_v14  ;;  %v184_v29 = vld [vmem:[%s2894_s25 + $0x60] sm:$0xff]  ;;  %v186_v46 = vld [vmem:[%s2894_s25 + $0x70] sm:$0xff]  ;;  %v187_v47 = vld [vmem:[%s2894_s25 + $0x78] sm:$0xff] }
  0x29   : > { %v863_v60 = vld [vmem:[%s2894_s25 + $0xa2] sm:$0xff]  ;;  %v864_v61 = vld [vmem:[%s2894_s25 + $0xaa] sm:$0xff] }
  0x2a   : > { %v188_v14 = vld [vmem:[%s2894_s25 + $0x80] sm:$0xff]  ;;  %v189_v15 = vld [vmem:[%s2894_s25 + $0x88] sm:$0xff] }
  0x33   : > { %2551 = vmatmul.msk.bf16.gmra.mxu1 %vm283_vm1, %v270_v40  ;;  %v1131_v40 = vpack.c.bf16 %v1098_v38, %v1097_v37  ;;  %v861_v37 = vld [vmem:[%s2894_s25 + $0x92] sm:$0xff]  ;;  %v862_v38 = vld [vmem:[%s2894_s25 + $0x9a] sm:$0xff] }
  0x34   : > { %2556 = vmatmul.msk.bf16.gmra.mxu2 %vm283_vm1, %v275_v41  ;;  %v853_v41 = vld [vmem:[%s2894_s25 + $0x52] sm:$0xff] }
  0x35   : > { %2546 = vmatmul.msk.bf16.gmra.mxu0 %vm283_vm1, %v265_v42  ;;  %2561 = vmatmul.msk.bf16.gmra.mxu3 %vm283_vm1, %v280_v45  ;;  %v854_v42 = vld [vmem:[%s2894_s25 + $0x5a] sm:$0xff] }
  0x36   : > { %v885_v43 = vpack.c.bf16 %v854_v42, %v853_v41  ;;  %v179_v45 = vld [vmem:[%s2894_s25 + $0x38] sm:$0xff]  ;;  %v3106_v41 = vpack.c.bf16 %v862_v38, %v861_v37 }
  0x37   : > { %v211_v48 = vpack.c.bf16 %v179_v45, %v178_v44 }
  0x43   : > { %2552 = vmatmul.msk.bf16.gmra.mxu1 %vm283_vm1, %v271_v52  ;;  %v856_v52 = vld [vmem:[%s2894_s25 + $0x6a] sm:$0xff] }
  0x44   : > { %2557 = vmatmul.msk.bf16.gmra.mxu2 %vm283_vm1, %v276_v53 }
  0x45   : > { %2547 = vmatmul.msk.bf16.gmra.mxu0 %vm283_vm1, %v266_v54  ;;  %2600 = vmatmul.msk.bf16.vlgmr.msrb.gmra.mxu3 %vm283_vm1, %v881_v57  ;;  %v3019_v54 = vpack.c.bf16 %v856_v52, %v855_v51  ;;  %v215_v52 = vpack.c.bf16 %v187_v47, %v186_v46 }
  0x53   : > { %2553 = vmatmul.msk.bf16.gmra.mxu1 %vm283_vm1, %v272_v8 }
  0x54   : > { %2558 = vmatmul.msk.bf16.gmra.mxu2 %vm283_vm1, %v277_v9 }
  0x55   : > { %2548 = vmatmul.msk.bf16.gmra.mxu0 %vm283_vm1, %v267_v10  ;;  %2601 = vmatmul.msk.bf16.gmra.mxu3 %vm283_vm1, %v882_v13 }
  0x63   : > { %2562 = vmatmul.msk.bf16.vlgmr.msrb.gmra.mxu1 %vm283_vm1, %v208_v20  ;;  %v859_v20 = vld [vmem:[%s2894_s25 + $0x82] sm:$0xff] }
  0x64   : > { %2581 = vmatmul.msk.bf16.vlgmr.msrb.gmra.mxu2 %vm283_vm1, %v633_v21  ;;  %v860_v21 = vld [vmem:[%s2894_s25 + $0x8a] sm:$0xff] }
  0x65   : > { %2619 = vmatmul.msk.bf16.vlgmr.msrb.gmra.mxu0 %vm283_vm1, %v1129_v22  ;;  %2602 = vmatmul.msk.bf16.gmra.mxu3 %vm283_vm1, %v883_v25  ;;  %v3077_v24 = vpack.c.bf16 %v860_v21, %v859_v20 }
  0x73   : > { %2563 = vmatmul.msk.bf16.gmra.mxu1 %vm283_vm1, %v209_v30  ;;  %v185_v30 = vld [vmem:[%s2894_s25 + $0x68] sm:$0xff] }
  0x74   : > { %2582 = vmatmul.msk.bf16.gmra.mxu2 %vm283_vm1, %v881_v57 }
  0x75   : > { %2620 = vmatmul.msk.bf16.gmra.mxu0 %vm283_vm1, %v1130_v31  ;;  %2603 = vmatmul.msk.bf16.gmra.mxu3 %vm283_vm1, %v884_v34  ;;  %v1105_v31 = vld [vmem:[%s2894_s25 + $0x73] sm:$0xff] }
  0x76   : > { %v1135_v36 = vpack.c.bf16 %v1106_v32, %v1105_v31  ;;  %v866_v31 = vld [vmem:[%s2894_s25 + $0xba] sm:$0xff] }
  0x83   : > { %2564 = vmatmul.msk.bf16.gmra.mxu1 %vm283_vm1, %v210_v39 }
  0x84   : > { %2583 = vmatmul.msk.bf16.gmra.mxu2 %vm283_vm1, %v882_v13  ;;  %v183_v13 = vld [vmem:[%s2894_s25 + $0x58] sm:$0xff] }
  0x85   : > { %2621 = vmatmul.msk.bf16.gmra.mxu0 %vm283_vm1, %v1131_v40  ;;  %2604 = vmatmul.msk.bf16.gmra.mxu3 %vm283_vm1, %v885_v43  ;;  %v213_v17 = vpack.c.bf16 %v183_v13, %v182_v12 }
  0x90   : > { %v3012_v49 = vpop.f32.mrf.mxu1 }
  0x92   : > { %v3016_v53 = vpop.f32.mrf.mxu0 }
  0x93   : > { %2565 = vmatmul.msk.bf16.gmra.mxu1 %vm283_vm1, %v211_v48  ;;  %v1107_v48 = vld [vmem:[%s2894_s25 + $0x83] sm:$0xff] }
  0x94   : > { %2584 = vmatmul.msk.bf16.gmra.mxu2 %vm283_vm1, %v883_v25 }
  0x95   : > { %2622 = vmatmul.msk.bf16.gmra.mxu0 %vm283_vm1, %v1132_v50  ;;  %2605 = vmatmul.msk.bf16.gmra.mxu3 %vm283_vm1, %v3019_v54  ;;  %v1108_v50 = vld [vmem:[%s2894_s25 + $0x8b] sm:$0xff] }
  0x96   : > { %v1136_v59 = vpack.c.bf16 %v1108_v50, %v1107_v48 }
  0x97   : > { %v3023_v55 = vpop.f32.mrf.mxu2 }
  0x98   : > { %v3027_v56 = vpop.f32.mrf.mxu1  ;;  %v3031_v58 = vpop.f32.mrf.mxu3 }
  0x9a   : > { %v3029_v57 = vpop.f32.mrf.mxu0 }
  0x9f   : > { %v3037_v63 = vpop.f32.mrf.mxu2 }
  0xa0   : > { %v3039_v1 = vpop.f32.mrf.mxu1  ;;  %v3045_v6 = vpop.f32.mrf.mxu3 }
  0xa2   : > { %v3043_v5 = vpop.f32.mrf.mxu0 }
  0xa3   : > { %2566 = vmatmul.msk.bf16.gmra.mxu1 %vm283_vm1, %v212_v0 }
  0xa4   : > { %2585 = vmatmul.msk.bf16.gmra.mxu2 %vm283_vm1, %v884_v34  ;;  %v214_v34 = vpack.c.bf16 %v185_v30, %v184_v29  ;;  %v865_v30 = vld [vmem:[%s2894_s25 + $0xb2] sm:$0xff] }
  0xa5   : > { %2623 = vmatmul.msk.bf16.gmra.mxu0 %vm283_vm1, %v1133_v2  ;;  %2606 = vmatmul.msk.bf16.gmra.mxu3 %vm283_vm1, %v3048_v7  ;;  %v3132_v2 = vpack.c.bf16 %v864_v61, %v863_v60  ;;  %v191_v60 = vld [vmem:[%s2894_s25 + $0x98] sm:$0xff] }
  0xa7   : > { %v3052_v8 = vpop.f32.mrf.mxu2 }
  0xa8   : > { %v3056_v9 = vpop.f32.mrf.mxu1  ;;  %v3060_v11 = vpop.f32.mrf.mxu3 }
  0xaa   : > { %v3058_v10 = vpop.f32.mrf.mxu0 }
  0xaf   : > { %v3066_v16 = vpop.f32.mrf.mxu2 }
  0xb0   : > { %v3068_v18 = vpop.f32.mrf.mxu1  ;;  %v3074_v23 = vpop.f32.mrf.mxu3 }
  0xb2   : > { %v3072_v22 = vpop.f32.mrf.mxu0 }
  0xb3   : > { %2567 = vmatmul.msk.bf16.gmra.mxu1 %vm283_vm1, %v213_v17  ;;  %v1109_v17 = vld [vmem:[%s2894_s25 + $0x93] sm:$0xff] }
  0xb4   : > { %2586 = vmatmul.msk.bf16.gmra.mxu2 %vm283_vm1, %v885_v43 }
  0xb5   : > { %2624 = vmatmul.msk.bf16.gmra.mxu0 %vm283_vm1, %v1134_v19  ;;  %2607 = vmatmul.msk.bf16.gmra.mxu3 %vm283_vm1, %v3077_v24  ;;  %v1110_v19 = vld [vmem:[%s2894_s25 + $0x9b] sm:$0xff] }
  0xb6   : > { %v1137_v29 = vpack.c.bf16 %v1110_v19, %v1109_v17 }
  0xb7   : > { %v3081_v25 = vpop.f32.mrf.mxu2 }
  0xb8   : > { %v3085_v26 = vpop.f32.mrf.mxu1  ;;  %v3089_v28 = vpop.f32.mrf.mxu3 }
  0xba   : > { %v3087_v27 = vpop.f32.mrf.mxu0 }
  0xbf   : > { %v3095_v33 = vpop.f32.mrf.mxu2 }
  0xc0   : > { %v3097_v35 = vpop.f32.mrf.mxu1  ;;  %v3103_v40 = vpop.f32.mrf.mxu3 }
  0xc2   : > { %v3101_v39 = vpop.f32.mrf.mxu0 }
  0xc3   : > { %2568 = vmatmul.msk.bf16.gmra.mxu1 %vm283_vm1, %v214_v34 }
  0xc4   : > { %2587 = vmatmul.msk.bf16.gmra.mxu2 %vm283_vm1, %v3019_v54 }
  0xc5   : > { %2625 = vmatmul.msk.bf16.gmra.mxu0 %vm283_vm1, %v1135_v36  ;;  %2608 = vmatmul.msk.bf16.gmra.mxu3 %vm283_vm1, %v3106_v41  ;;  %v3154_v36 = vpack.c.bf16 %v866_v31, %v865_v30  ;;  %v868_v30 = vld [vmem:[%s2894_s25 + $0xca] sm:$0xff] }
  0xc7   : > { %v3111_v42 = vpop.f32.mrf.mxu2 }
  0xc8   : > { %v3115_v43 = vpop.f32.mrf.mxu1  ;;  %v967_v45 = vpop.f32.mrf.mxu3 }
  0xca   : > { %v3117_v44 = vpop.f32.mrf.mxu0 }
  0xcf   : > { %v3123_v51 = vpop.f32.mrf.mxu2 }
  0xd0   : > { %v3125_v54 = vpop.f32.mrf.mxu1  ;;  %v969_v0 = vpop.f32.mrf.mxu3 }
  0xd2   : > { %v3129_v62 = vpop.f32.mrf.mxu0 }
  0xd3   : > { %2569 = vmatmul.msk.bf16.gmra.mxu1 %vm283_vm1, %v215_v52 }
  0xd4   : > { %2588 = vmatmul.msk.bf16.gmra.mxu2 %vm283_vm1, %v3048_v7  ;;  %v216_v7 = vpack.c.bf16 %v189_v15, %v188_v14  ;;  %v1112_v14 = vld [vmem:[%s2894_s25 + $0xab] sm:$0xff] }
  0xd5   : > { %2626 = vmatmul.msk.bf16.gmra.mxu0 %vm283_vm1, %v1136_v59  ;;  %2609 = vmatmul.msk.bf16.gmra.mxu3 %vm283_vm1, %v3132_v2  ;;  %v190_v59 = vld [vmem:[%s2894_s25 + $0x90] sm:$0xff] }
  0xd6   : > { %v217_v17 = vpack.c.bf16 %v191_v60, %v190_v59 }
  0xd7   : > { %v3137_v3 = vpop.f32.mrf.mxu2 }
  0xd8   : > { %v3141_v4 = vpop.f32.mrf.mxu1  ;;  %v972_v13 = vpop.f32.mrf.mxu3 }
  0xda   : > { %v3143_v12 = vpop.f32.mrf.mxu0 }
  0xdf   : > { %v3149_v20 = vpop.f32.mrf.mxu2 }
  0xe0   : > { %v507_v21 = vpop.f32.mrf.mxu1  ;;  %v974_v34 = vpop.f32.mrf.mxu3 }
  0xe1   : > { %v508_v37 = vadd.f32 %v507_v21, %v3016_v53 }
  0xe2   : > { %v1215_v32 = vpop.f32.mrf.mxu0 }
  0xe3   : > { %2570 = vmatmul.msk.bf16.gmra.mxu1 %vm283_vm1, %v216_v7 }
  0xe4   : > { %2589 = vmatmul.msk.bf16.gmra.mxu2 %vm283_vm1, %v3077_v24  ;;  %v1111_v24 = vld [vmem:[%s2894_s25 + $0xa3] sm:$0xff] }
  0xe5   : > { %2627 = vmatmul.msk.bf16.gmra.mxu0 %vm283_vm1, %v1137_v29  ;;  %2610 = vmatmul.msk.bf16.gmra.mxu3 %vm283_vm1, %v3154_v36  ;;  %v1138_v21 = vpack.c.bf16 %v1112_v14, %v1111_v24  ;;  %v867_v29 = vld [vmem:[%s2894_s25 + $0xc2] sm:$0xff] }
  0xe6   : > { %v192_v24 = vld [vmem:[%s2894_s25 + $0xa0] sm:$0xff]  ;;  %v193_v14 = vld [vmem:[%s2894_s25 + $0xa8] sm:$0xff] }
  0xe7   : > { %v719_v38 = vpop.f32.mrf.mxu2 }
  0xe8   : > { %v809_v46 = vadd.f32 %v719_v38, %v508_v37  ;;  %v509_v47 = vpop.f32.mrf.mxu1  ;;  %v977_v52 = vpop.f32.mrf.mxu3 }
  0xe9   : > { %v510_v15 = vadd.f32 %v509_v47, %v3029_v57 }
  0xea   : > { %v1217_v48 = vpop.f32.mrf.mxu0  ;;  %v1057_v50 = vadd.f32 %v967_v45, %v809_v46 }
  0xec   : > { %v3164_v61 = vadd.f32 %v1215_v32, %v1057_v50  ;;  %v3172_v32 = vpack.c.bf16 %v868_v30, %v867_v29  ;;  %v869_v29 = vld [vmem:[%s2894_s25 + $0xd2] sm:$0xff]  ;;  %v870_v30 = vld [vmem:[%s2894_s25 + $0xda] sm:$0xff] }
  0xef   : > { %v721_v53 = vpop.f32.mrf.mxu2 }
  0xf0   : > { %v810_v19 = vadd.f32 %v721_v53, %v510_v15  ;;  %v512_v7 = vpop.f32.mrf.mxu1  ;;  %v979_v45 = vpop.f32.mrf.mxu3  ;;  %v1113_v15 = vld [vmem:[%s2894_s25 + $0xb3] sm:$0xff] }
  0xf1   : > { %v513_v38 = vadd.f32 %v512_v7, %v3043_v5 }
  0xf2   : > { %v1220_v31 = vpop.f32.mrf.mxu0  ;;  %v1058_v37 = vadd.f32 %v969_v0, %v810_v19 }
  0xf3   : > { %2571 = vmatmul.msk.bf16.gmra.mxu1 %vm283_vm1, %v217_v17  ;;  %v218_v17 = vpack.c.bf16 %v193_v14, %v192_v24 }
  0xf4   : > { %2590 = vmatmul.msk.bf16.gmra.mxu2 %vm283_vm1, %v3106_v41  ;;  %v3177_v57 = vadd.f32 %v1217_v48, %v1058_v37  ;;  %v1114_v48 = vld [vmem:[%s2894_s25 + $0xbb] sm:$0xff] }
  0xf5   : > { %2628 = vmatmul.msk.bf16.gmra.mxu0 %vm283_vm1, %v1138_v21  ;;  %2611 = vmatmul.msk.bf16.gmra.mxu3 %vm283_vm1, %v3172_v32  ;;  %v1139_v21 = vpack.c.bf16 %v1114_v48, %v1113_v15  ;;  %v194_v15 = vld [vmem:[%s2894_s25 + $0xb0] sm:$0xff]  ;;  %v195_v48 = vld [vmem:[%s2894_s25 + $0xb8] sm:$0xff] }
  0xf7   : > { %v724_v46 = vpop.f32.mrf.mxu2 }
  0xf8   : > { %v811_v0 = vadd.f32 %v724_v46, %v513_v38  ;;  %v514_v47 = vpop.f32.mrf.mxu1  ;;  %v982_v60 = vpop.f32.mrf.mxu3 }
  0xf9   : > { %v515_v53 = vadd.f32 %v514_v47, %v3058_v10 }
  0xfa   : > { %v1222_v50 = vpop.f32.mrf.mxu0  ;;  %v1059_v59 = vadd.f32 %v972_v13, %v811_v0 }
  0xfc   : > { %v3184_v41 = vadd.f32 %v1220_v31, %v1059_v59  ;;  %v3192_v31 = vpack.c.bf16 %v870_v30, %v869_v29  ;;  %v871_v29 = vld [vmem:[%s2894_s25 + $0xe2] sm:$0xff]  ;;  %v872_v30 = vld [vmem:[%s2894_s25 + $0xea] sm:$0xff] }
  0xff   : > { %v726_v5 = vpop.f32.mrf.mxu2 }
 0x100   : > { %v812_v19 = vadd.f32 %v726_v5, %v515_v53  ;;  %v517_v7 = vpop.f32.mrf.mxu1  ;;  %v984_v13 = vpop.f32.mrf.mxu3  ;;  %v1115_v53 = vld [vmem:[%s2894_s25 + $0xc3] sm:$0xff] }
 0x101   : > { %v518_v46 = vadd.f32 %v517_v7, %v3072_v22 }
 0x102   : > { %v1225_v37 = vpop.f32.mrf.mxu0  ;;  %v1060_v38 = vadd.f32 %v974_v34, %v812_v19 }
 0x103   : > { %2572 = vmatmul.msk.bf16.gmra.mxu1 %vm283_vm1, %v218_v17  ;;  %v219_v17 = vpack.c.bf16 %v195_v48, %v194_v15 }
 0x104   : > { %2591 = vmatmul.msk.bf16.gmra.mxu2 %vm283_vm1, %v3132_v2  ;;  %v3197_v10 = vadd.f32 %v1222_v50, %v1060_v38  ;;  %v1116_v50 = vld [vmem:[%s2894_s25 + $0xcb] sm:$0xff] }
 0x105   : > { %2629 = vmatmul.msk.bf16.gmra.mxu0 %vm283_vm1, %v1139_v21  ;;  %2612 = vmatmul.msk.bf16.gmra.mxu3 %vm283_vm1, %v3192_v31  ;;  %v1140_v21 = vpack.c.bf16 %v1116_v50, %v1115_v53  ;;  %v196_v53 = vld [vmem:[%s2894_s25 + $0xc0] sm:$0xff]  ;;  %v197_v50 = vld [vmem:[%s2894_s25 + $0xc8] sm:$0xff] }
 0x107   : > { %v729_v0 = vpop.f32.mrf.mxu2 }
 0x108   : > { %v813_v34 = vadd.f32 %v729_v0, %v518_v46  ;;  %v519_v47 = vpop.f32.mrf.mxu1  ;;  %v987_v14 = vpop.f32.mrf.mxu3 }
 0x109   : > { %v520_v5 = vadd.f32 %v519_v47, %v3087_v27 }
 0x10a   : > { %v1227_v59 = vpop.f32.mrf.mxu0  ;;  %v1061_v24 = vadd.f32 %v977_v52, %v813_v34 }
 0x10c   : > { %v3204_v2 = vadd.f32 %v1225_v37, %v1061_v24  ;;  %v3212_v37 = vpack.c.bf16 %v872_v30, %v871_v29  ;;  %v873_v29 = vld [vmem:[%s2894_s25 + $0xf2] sm:$0xff]  ;;  %v874_v30 = vld [vmem:[%s2894_s25 + $0xfa] sm:$0xff] }
 0x10f   : > { %v731_v22 = vpop.f32.mrf.mxu2 }
 0x110   : > { %v814_v19 = vadd.f32 %v731_v22, %v520_v5  ;;  %v522_v7 = vpop.f32.mrf.mxu1  ;;  %v989_v52 = vpop.f32.mrf.mxu3  ;;  %v1117_v5 = vld [vmem:[%s2894_s25 + $0xd3] sm:$0xff] }
 0x111   : > { %v523_v0 = vadd.f32 %v522_v7, %v3101_v39 }
 0x112   : > { %v1230_v38 = vpop.f32.mrf.mxu0  ;;  %v1062_v46 = vadd.f32 %v979_v45, %v814_v19 }
 0x113   : > { %2573 = vmatmul.msk.bf16.gmra.mxu1 %vm283_vm1, %v219_v17  ;;  %v220_v17 = vpack.c.bf16 %v197_v50, %v196_v53 }
 0x114   : > { %2592 = vmatmul.msk.bf16.gmra.mxu2 %vm283_vm1, %v3154_v36  ;;  %v3217_v27 = vadd.f32 %v1227_v59, %v1062_v46  ;;  %v1118_v59 = vld [vmem:[%s2894_s25 + $0xdb] sm:$0xff] }
 0x115   : > { %2630 = vmatmul.msk.bf16.gmra.mxu0 %vm283_vm1, %v1140_v21  ;;  %2613 = vmatmul.msk.bf16.gmra.mxu3 %vm283_vm1, %v3212_v37  ;;  %v1141_v21 = vpack.c.bf16 %v1118_v59, %v1117_v5  ;;  %v198_v5 = vld [vmem:[%s2894_s25 + $0xd0] sm:$0xff]  ;;  %v199_v59 = vld [vmem:[%s2894_s25 + $0xd8] sm:$0xff] }
 0x117   : > { %v734_v34 = vpop.f32.mrf.mxu2 }
 0x118   : > { %v815_v45 = vadd.f32 %v734_v34, %v523_v0  ;;  %v524_v47 = vpop.f32.mrf.mxu1  ;;  %v992_v48 = vpop.f32.mrf.mxu3 }
 0x119   : > { %v525_v22 = vadd.f32 %v524_v47, %v3117_v44 }
 0x11a   : > { %v1232_v24 = vpop.f32.mrf.mxu0  ;;  %v1063_v15 = vadd.f32 %v982_v60, %v815_v45 }
 0x11c   : > { %v3224_v36 = vadd.f32 %v1230_v38, %v1063_v15  ;;  %v3232_v38 = vpack.c.bf16 %v874_v30, %v873_v29  ;;  %v875_v29 = vld [vmem:[%s2894_s25 + $0x102] sm:$0xff]  ;;  %v876_v30 = vld [vmem:[%s2894_s25 + $0x10a] sm:$0xff] }
 0x11f   : > { %v736_v39 = vpop.f32.mrf.mxu2 }
 0x120   : > { %v816_v19 = vadd.f32 %v736_v39, %v525_v22  ;;  %v527_v7 = vpop.f32.mrf.mxu1  ;;  %v994_v60 = vpop.f32.mrf.mxu3  ;;  %v1119_v22 = vld [vmem:[%s2894_s25 + $0xe3] sm:$0xff] }
 0x121   : > { %v528_v34 = vadd.f32 %v527_v7, %v3129_v62 }
 0x122   : > { %v1235_v46 = vpop.f32.mrf.mxu0  ;;  %v1064_v0 = vadd.f32 %v984_v13, %v816_v19 }
 0x123   : > { %2574 = vmatmul.msk.bf16.gmra.mxu1 %vm283_vm1, %v220_v17  ;;  %v221_v17 = vpack.c.bf16 %v199_v59, %v198_v5 }
 0x124   : > { %2593 = vmatmul.msk.bf16.gmra.mxu2 %vm283_vm1, %v3172_v32  ;;  %v3237_v44 = vadd.f32 %v1232_v24, %v1064_v0  ;;  %v1120_v24 = vld [vmem:[%s2894_s25 + $0xeb] sm:$0xff] }
 0x125   : > { %2631 = vmatmul.msk.bf16.gmra.mxu0 %vm283_vm1, %v1141_v21  ;;  %2614 = vmatmul.msk.bf16.gmra.mxu3 %vm283_vm1, %v3232_v38  ;;  %v1142_v21 = vpack.c.bf16 %v1120_v24, %v1119_v22  ;;  %v200_v22 = vld [vmem:[%s2894_s25 + $0xe0] sm:$0xff]  ;;  %v201_v24 = vld [vmem:[%s2894_s25 + $0xe8] sm:$0xff] }
 0x127   : > { %v739_v45 = vpop.f32.mrf.mxu2 }
 0x128   : > { %v817_v13 = vadd.f32 %v739_v45, %v528_v34  ;;  %v529_v47 = vpop.f32.mrf.mxu1  ;;  %v997_v50 = vpop.f32.mrf.mxu3 }
 0x129   : > { %v530_v39 = vadd.f32 %v529_v47, %v3143_v12 }
 0x12a   : > { %v1237_v15 = vpop.f32.mrf.mxu0  ;;  %v1065_v53 = vadd.f32 %v987_v14, %v817_v13 }
 0x12c   : > { %v3244_v32 = vadd.f32 %v1235_v46, %v1065_v53  ;;  %v3252_v46 = vpack.c.bf16 %v876_v30, %v875_v29  ;;  %v877_v29 = vld [vmem:[%s2894_s25 + $0x112] sm:$0xff]  ;;  %v878_v30 = vld [vmem:[%s2894_s25 + $0x11a] sm:$0xff] }
 0x12f   : > { %v741_v62 = vpop.f32.mrf.mxu2 }
 0x130   : > { %v818_v19 = vadd.f32 %v741_v62, %v530_v39  ;;  %v532_v7 = vpop.f32.mrf.mxu1  ;;  %v999_v14 = vpop.f32.mrf.mxu3  ;;  %v1121_v39 = vld [vmem:[%s2894_s25 + $0xf3] sm:$0xff] }
 0x131   : > { %v533_v45 = vadd.f32 %v532_v7, %v3012_v49 }
 0x132   : > { %v1240_v0 = vpop.f32.mrf.mxu0  ;;  %v1066_v34 = vadd.f32 %v989_v52, %v818_v19 }
 0x133   : > { %2575 = vmatmul.msk.bf16.gmra.mxu1 %vm283_vm1, %v221_v17  ;;  %v222_v17 = vpack.c.bf16 %v201_v24, %v200_v22 }
 0x134   : > { %2594 = vmatmul.msk.bf16.gmra.mxu2 %vm283_vm1, %v3192_v31  ;;  %v3257_v12 = vadd.f32 %v1237_v15, %v1066_v34  ;;  %v1122_v15 = vld [vmem:[%s2894_s25 + $0xfb] sm:$0xff] }
 0x135   : > { %2632 = vmatmul.msk.bf16.gmra.mxu0 %vm283_vm1, %v1142_v21  ;;  %2615 = vmatmul.msk.bf16.gmra.mxu3 %vm283_vm1, %v3252_v46  ;;  %v1143_v21 = vpack.c.bf16 %v1122_v15, %v1121_v39  ;;  %v202_v39 = vld [vmem:[%s2894_s25 + $0xf0] sm:$0xff]  ;;  %v203_v15 = vld [vmem:[%s2894_s25 + $0xf8] sm:$0xff] }
 0x137   : > { %v744_v13 = vpop.f32.mrf.mxu2 }
 0x138   : > { %v819_v52 = vadd.f32 %v744_v13, %v533_v45  ;;  %v534_v47 = vpop.f32.mrf.mxu1  ;;  %v1002_v59 = vpop.f32.mrf.mxu3 }
 0x139   : > { %v535_v62 = vadd.f32 %v534_v47, %v3027_v56 }
 0x13a   : > { %v1242_v53 = vpop.f32.mrf.mxu0  ;;  %v1067_v5 = vadd.f32 %v992_v48, %v819_v52 }
 0x13c   : > { %v3264_v31 = vadd.f32 %v1240_v0, %v1067_v5  ;;  %v3272_v0 = vpack.c.bf16 %v878_v30, %v877_v29  ;;  %v879_v29 = vld [vmem:[%s2894_s25 + $0x122] sm:$0xff]  ;;  %v880_v30 = vld [vmem:[%s2894_s25 + $0x12a] sm:$0xff] }
 0x13f   : > { %v746_v49 = vpop.f32.mrf.mxu2 }
 0x140   : > { %v820_v19 = vadd.f32 %v746_v49, %v535_v62  ;;  %v537_v7 = vpop.f32.mrf.mxu1  ;;  %v1004_v48 = vpop.f32.mrf.mxu3  ;;  %v1123_v62 = vld [vmem:[%s2894_s25 + $0x103] sm:$0xff] }
 0x141   : > { %v538_v13 = vadd.f32 %v537_v7, %v3039_v1 }
 0x142   : > { %v1245_v34 = vpop.f32.mrf.mxu0  ;;  %v1068_v45 = vadd.f32 %v994_v60, %v820_v19 }
 0x143   : > { %2576 = vmatmul.msk.bf16.gmra.mxu1 %vm283_vm1, %v222_v17  ;;  %v223_v17 = vpack.c.bf16 %v203_v15, %v202_v39 }
 0x144   : > { %2595 = vmatmul.msk.bf16.gmra.mxu2 %vm283_vm1, %v3212_v37  ;;  %v3277_v56 = vadd.f32 %v1242_v53, %v1068_v45  ;;  %v1124_v53 = vld [vmem:[%s2894_s25 + $0x10b] sm:$0xff] }
 0x145   : > { %2633 = vmatmul.msk.bf16.gmra.mxu0 %vm283_vm1, %v1143_v21  ;;  %2616 = vmatmul.msk.bf16.gmra.mxu3 %vm283_vm1, %v3272_v0  ;;  %v1144_v21 = vpack.c.bf16 %v1124_v53, %v1123_v62  ;;  %v204_v62 = vld [vmem:[%s2894_s25 + $0x100] sm:$0xff]  ;;  %v205_v53 = vld [vmem:[%s2894_s25 + $0x108] sm:$0xff] }
 0x147   : > { %v749_v52 = vpop.f32.mrf.mxu2 }
 0x148   : > { %v821_v60 = vadd.f32 %v749_v52, %v538_v13  ;;  %v539_v47 = vpop.f32.mrf.mxu1  ;;  %v1007_v24 = vpop.f32.mrf.mxu3 }
 0x149   : > { %v540_v49 = vadd.f32 %v539_v47, %v3056_v9 }
 0x14a   : > { %v1247_v5 = vpop.f32.mrf.mxu0  ;;  %v1069_v22 = vadd.f32 %v997_v50, %v821_v60 }
 0x14c   : > { %v3284_v37 = vadd.f32 %v1245_v34, %v1069_v22  ;;  %v898_v34 = vpack.c.bf16 %v880_v30, %v879_v29  ;;  %v1837_v29 = vld [vmem:[%s2894_s25 + $0x25] sm:$0xff]  ;;  %v1838_v30 = vld [vmem:[%s2894_s25 + $0x2d] sm:$0xff] }
 0x14f   : > { %v751_v1 = vpop.f32.mrf.mxu2 }
 0x150   : > { %v822_v19 = vadd.f32 %v751_v1, %v540_v49  ;;  %v542_v7 = vpop.f32.mrf.mxu1  ;;  %v1009_v50 = vpop.f32.mrf.mxu3  ;;  %v1126_v1 = vld [vmem:[%s2894_s25 + $0x11b] sm:$0xff] }
 0x151   : > { %v543_v52 = vadd.f32 %v542_v7, %v3068_v18  ;;  %v224_v18 = vpack.c.bf16 %v205_v53, %v204_v62  ;;  %v206_v53 = vld [vmem:[%s2894_s25 + $0x110] sm:$0xff] }
 0x152   : > { %v1250_v45 = vpop.f32.mrf.mxu0  ;;  %v1070_v13 = vadd.f32 %v999_v14, %v822_v19 }
 0x153   : > { %2577 = vmatmul.msk.bf16.gmra.mxu1 %vm283_vm1, %v223_v17 }
 0x154   : > { %2596 = vmatmul.msk.bf16.gmra.mxu2 %vm283_vm1, %v3232_v38  ;;  %v3295_v9 = vadd.f32 %v1247_v5, %v1070_v13  ;;  %v1125_v38 = vld [vmem:[%s2894_s25 + $0x113] sm:$0xff] }
 0x155   : > { %2634 = vmatmul.msk.bf16.gmra.mxu0 %vm283_vm1, %v1144_v21  ;;  %2617 = vmatmul.msk.bf16.gmra.mxu3 %vm283_vm1, %v898_v34  ;;  %v1145_v21 = vpack.c.bf16 %v1126_v1, %v1125_v38  ;;  %v207_v38 = vld [vmem:[%s2894_s25 + $0x118] sm:$0xff] }
 0x157   : > { %v754_v60 = vpop.f32.mrf.mxu2 }
 0x158   : > { %v823_v14 = vadd.f32 %v754_v60, %v543_v52  ;;  %v544_v47 = vpop.f32.mrf.mxu1  ;;  %v1012_v15 = vpop.f32.mrf.mxu3 }
 0x159   : > { %v545_v5 = vadd.f32 %v544_v47, %v3085_v26 }
 0x15a   : > { %v1252_v22 = vpop.f32.mrf.mxu0  ;;  %v1071_v39 = vadd.f32 %v1002_v59, %v823_v14 }
 0x15c   : > { %v3301_v49 = vadd.f32 %v1250_v45, %v1071_v39  ;;  %v1873_v45 = vpack.c.bf16 %v1838_v30, %v1837_v29  ;;  %v1840_v29 = vld [vmem:[%s2894_s25 + $0x3d] sm:$0xff] }
 0x15f   : > { %v756_v17 = vpop.f32.mrf.mxu2 }
 0x160   : > { %v824_v19 = vadd.f32 %v756_v17, %v545_v5  ;;  %v547_v7 = vpop.f32.mrf.mxu1  ;;  %v1014_v59 = vpop.f32.mrf.mxu3  ;;  %v1128_v5 = vld [vmem:[%s2894_s25 + $0x12b] sm:$0xff] }
 0x161   : > { %v548_v52 = vadd.f32 %v547_v7, %v3097_v35  ;;  %v225_v35 = vpack.c.bf16 %v207_v38, %v206_v53  ;;  %v1341_v53 = vld [vmem:[%s2894_s25 + $0x14] sm:$0xff]  ;;  %v1589_v38 = vld [vmem:[%s2894_s25 + $0x24] sm:$0xff] }
 0x162   : > { %v1255_v13 = vpop.f32.mrf.mxu0  ;;  %v1072_v34 = vadd.f32 %v1004_v48, %v824_v19 }
 0x163   : > { %2578 = vmatmul.msk.bf16.gmra.mxu1 %vm283_vm1, %v224_v18 }
 0x164   : > { %2597 = vmatmul.msk.bf16.gmra.mxu2 %vm283_vm1, %v3252_v46  ;;  %v3312_v26 = vadd.f32 %v1252_v22, %v1072_v34  ;;  %v1127_v46 = vld [vmem:[%s2894_s25 + $0x123] sm:$0xff] }
 0x165   : > { %2635 = vmatmul.msk.bf16.gmra.mxu0 %vm283_vm1, %v1145_v21  ;;  %2676 = vmatmul.msk.bf16.vlgmr.msra.gmra.mxu3 %vm283_vm1, %v1873_v45  ;;  %v1146_v7 = vpack.c.bf16 %v1128_v5, %v1127_v46  ;;  %v1839_v21 = vld [vmem:[%s2894_s25 + $0x35] sm:$0xff]  ;;  %v1590_v5 = vld [vmem:[%s2894_s25 + $0x2c] sm:$0xff] }
 0x167   : > { %v759_v60 = vpop.f32.mrf.mxu2 }
 0x168   : > { %v825_v48 = vadd.f32 %v759_v60, %v548_v52  ;;  %v549_v14 = vpop.f32.mrf.mxu1  ;;  %v1017_v62 = vpop.f32.mrf.mxu3 }
 0x169   : > { %v550_v22 = vadd.f32 %v549_v14, %v3115_v43 }
 0x16a   : > { %v1257_v47 = vpop.f32.mrf.mxu0  ;;  %v1073_v39 = vadd.f32 %v1007_v24, %v825_v48 }
 0x16c   : > { %v3318_v1 = vadd.f32 %v1255_v13, %v1073_v39  ;;  %v1874_v13 = vpack.c.bf16 %v1840_v29, %v1839_v21  ;;  %v1842_v29 = vld [vmem:[%s2894_s25 + $0x4d] sm:$0xff] }
 0x16f   : > { %v761_v17 = vpop.f32.mrf.mxu2 }
 0x170   : > { %v826_v18 = vadd.f32 %v761_v17, %v550_v22  ;;  %v552_v19 = vpop.f32.mrf.mxu1  ;;  %v1019_v24 = vpop.f32.mrf.mxu3  ;;  %v2086_v22 = vld [vmem:[%s2894_s25 + $0x2e] sm:$0xff] }
 0x171   : > { %v553_v45 = vadd.f32 %v552_v19, %v3125_v54 }
 0x172   : > { %v1260_v30 = vpop.f32.mrf.mxu0  ;;  %v1074_v34 = vadd.f32 %v1009_v50, %v826_v18 }
 0x173   : > { %2579 = vmatmul.msk.bf16.gmra.mxu1 %vm283_vm1, %v225_v35 }
 0x174   : > { %2598 = vmatmul.msk.bf16.gmra.mxu2 %vm283_vm1, %v3272_v0  ;;  %v3329_v43 = vadd.f32 %v1257_v47, %v1074_v34  ;;  %v1342_v0 = vld [vmem:[%s2894_s25 + $0x1c] sm:$0xff]  ;;  %v2085_v47 = vld [vmem:[%s2894_s25 + $0x26] sm:$0xff] }
 0x175   : > { %2636 = vmatmul.msk.bf16.gmra.mxu0 %vm283_vm1, %v1146_v7  ;;  %2677 = vmatmul.msk.bf16.gmra.mxu3 %vm283_vm1, %v1874_v13  ;;  %v1377_v35 = vpack.c.bf16 %v1342_v0, %v1341_v53  ;;  %v1625_v7 = vpack.c.bf16 %v1590_v5, %v1589_v38  ;;  %v2121_v21 = vpack.c.bf16 %v2086_v22, %v2085_v47  ;;  %v1591_v38 = vld [vmem:[%s2894_s25 + $0x34] sm:$0xff]  ;;  %v1592_v47 = vld [vmem:[%s2894_s25 + $0x3c] sm:$0xff] }
 0x176   : > { %v2087_v22 = vld [vmem:[%s2894_s25 + $0x36] sm:$0xff] }
 0x177   : > { %v764_v52 = vpop.f32.mrf.mxu2 }
 0x178   : > { %v827_v50 = vadd.f32 %v764_v52, %v553_v45  ;;  %v554_v60 = vpop.f32.mrf.mxu1  ;;  %v1022_v39 = vpop.f32.mrf.mxu3 }
 0x179   : > { %v555_v54 = vadd.f32 %v554_v60, %v3141_v4 }
 0x17a   : > { %v1262_v48 = vpop.f32.mrf.mxu0  ;;  %v1075_v14 = vadd.f32 %v1012_v15, %v827_v50  ;;  %v1841_v15 = vld [vmem:[%s2894_s25 + $0x45] sm:$0xff] }
 0x17c   : > { %v3336_v46 = vadd.f32 %v1260_v30, %v1075_v14  ;;  %v1875_v30 = vpack.c.bf16 %v1842_v29, %v1841_v15  ;;  %v1844_v15 = vld [vmem:[%s2894_s25 + $0x5d] sm:$0xff] }
 0x17f   : > { %v766_v17 = vpop.f32.mrf.mxu2 }
 0x180   : > { %v828_v18 = vadd.f32 %v766_v17, %v555_v54  ;;  %v557_v19 = vpop.f32.mrf.mxu1  ;;  %v1024_v45 = vpop.f32.mrf.mxu3  ;;  %v2088_v54 = vld [vmem:[%s2894_s25 + $0x3e] sm:$0xff] }
 0x181   : > { %v558_v52 = vadd.f32 %v557_v19, %v3023_v55  ;;  %v2122_v19 = vpack.c.bf16 %v2088_v54, %v2087_v22  ;;  %v2089_v22 = vld [vmem:[%s2894_s25 + $0x46] sm:$0xff]  ;;  %v2090_v54 = vld [vmem:[%s2894_s25 + $0x4e] sm:$0xff] }
 0x182   : > { %v1265_v34 = vpop.f32.mrf.mxu0  ;;  %v1076_v13 = vadd.f32 %v1014_v59, %v828_v18  ;;  %v1626_v18 = vpack.c.bf16 %v1592_v47, %v1591_v38  ;;  %v1594_v47 = vld [vmem:[%s2894_s25 + $0x4c] sm:$0xff] }
 0x183   : > { %2638 = vmatmul.msk.bf16.vlgmr.msra.gmra.mxu1 %vm283_vm1, %v1377_v35 }
 0x184   : > { %2657 = vmatmul.msk.bf16.vlgmr.msra.gmra.mxu2 %vm283_vm1, %v1625_v7  ;;  %v3347_v4 = vadd.f32 %v1262_v48, %v1076_v13 }
 0x185   : > { %2695 = vmatmul.msk.bf16.vlgmr.msra.gmra.mxu0 %vm283_vm1, %v2121_v21  ;;  %2678 = vmatmul.msk.bf16.gmra.mxu3 %vm283_vm1, %v1875_v30  ;;  %v1843_v21 = vld [vmem:[%s2894_s25 + $0x55] sm:$0xff] }
 0x187   : > { %v769_v50 = vpop.f32.mrf.mxu2 }
 0x188   : > { %v829_v60 = vadd.f32 %v769_v50, %v558_v52  ;;  %v559_v59 = vpop.f32.mrf.mxu1  ;;  %v1027_v0 = vpop.f32.mrf.mxu3 }
 0x189   : > { %v560_v48 = vadd.f32 %v559_v59, %v3037_v63 }
 0x18a   : > { %v1267_v14 = vpop.f32.mrf.mxu0  ;;  %v1077_v53 = vadd.f32 %v1017_v62, %v829_v60 }
 0x18c   : > { %v3352_v5 = vadd.f32 %v1265_v34, %v1077_v53  ;;  %v1876_v34 = vpack.c.bf16 %v1844_v15, %v1843_v21  ;;  %v1593_v53 = vld [vmem:[%s2894_s25 + $0x44] sm:$0xff]  ;;  %v1846_v21 = vld [vmem:[%s2894_s25 + $0x6d] sm:$0xff] }
 0x18f   : > { %v771_v17 = vpop.f32.mrf.mxu2 }
 0x190   : > { %v830_v55 = vadd.f32 %v771_v17, %v560_v48  ;;  %v562_v35 = vpop.f32.mrf.mxu1  ;;  %v1029_v62 = vpop.f32.mrf.mxu3 }
 0x191   : > { %v563_v30 = vadd.f32 %v562_v35, %v3052_v8  ;;  %v2123_v35 = vpack.c.bf16 %v2090_v54, %v2089_v22  ;;  %v2091_v22 = vld [vmem:[%s2894_s25 + $0x56] sm:$0xff]  ;;  %v2092_v54 = vld [vmem:[%s2894_s25 + $0x5e] sm:$0xff] }
 0x192   : > { %v1270_v29 = vpop.f32.mrf.mxu0  ;;  %v1078_v13 = vadd.f32 %v1019_v24, %v830_v55  ;;  %v1627_v55 = vpack.c.bf16 %v1594_v47, %v1593_v53  ;;  %v1596_v47 = vld [vmem:[%s2894_s25 + $0x5c] sm:$0xff] }
 0x193   : > { %2639 = vmatmul.msk.bf16.gmra.mxu1 %vm283_vm1, %v1625_v7 }
 0x194   : > { %2658 = vmatmul.msk.bf16.gmra.mxu2 %vm283_vm1, %v1626_v18  ;;  %v3363_v63 = vadd.f32 %v1267_v14, %v1078_v13 }
 0x195   : > { %2696 = vmatmul.msk.bf16.gmra.mxu0 %vm283_vm1, %v2122_v19  ;;  %2679 = vmatmul.msk.bf16.gmra.mxu3 %vm283_vm1, %v1876_v34  ;;  %v1845_v19 = vld [vmem:[%s2894_s25 + $0x65] sm:$0xff] }
 0x197   : > { %v774_v52 = vpop.f32.mrf.mxu2 }
 0x198   : > { %v831_v50 = vadd.f32 %v774_v52, %v563_v30  ;;  %v564_v24 = vpop.f32.mrf.mxu1  ;;  %v1032_v59 = vpop.f32.mrf.mxu3 }
 0x199   : > { %v565_v14 = vadd.f32 %v564_v24, %v3066_v16 }
 0x19a   : > { %v1272_v60 = vpop.f32.mrf.mxu0  ;;  %v1079_v7 = vadd.f32 %v1022_v39, %v831_v50 }
 0x19c   : > { %v3368_v38 = vadd.f32 %v1270_v29, %v1079_v7  ;;  %v1877_v29 = vpack.c.bf16 %v1846_v21, %v1845_v19  ;;  %v1595_v7 = vld [vmem:[%s2894_s25 + $0x54] sm:$0xff]  ;;  %v1848_v19 = vld [vmem:[%s2894_s25 + $0x7d] sm:$0xff] }
 0x19f   : > { %v776_v48 = vpop.f32.mrf.mxu2 }
 0x1a0   : > { %v832_v8 = vadd.f32 %v776_v48, %v565_v14  ;;  %v567_v17 = vpop.f32.mrf.mxu1  ;;  %v1034_v39 = vpop.f32.mrf.mxu3 }
 0x1a1   : > { %v568_v34 = vadd.f32 %v567_v17, %v3081_v25  ;;  %v2124_v17 = vpack.c.bf16 %v2092_v54, %v2091_v22  ;;  %v2093_v22 = vld [vmem:[%s2894_s25 + $0x66] sm:$0xff]  ;;  %v2094_v54 = vld [vmem:[%s2894_s25 + $0x6e] sm:$0xff] }
 0x1a2   : > { %v1275_v15 = vpop.f32.mrf.mxu0  ;;  %v1080_v13 = vadd.f32 %v1024_v45, %v832_v8  ;;  %v1628_v8 = vpack.c.bf16 %v1596_v47, %v1595_v7  ;;  %v1598_v47 = vld [vmem:[%s2894_s25 + $0x6c] sm:$0xff] }
 0x1a3   : > { %2640 = vmatmul.msk.bf16.gmra.mxu1 %vm283_vm1, %v1626_v18 }
 0x1a4   : > { %2659 = vmatmul.msk.bf16.gmra.mxu2 %vm283_vm1, %v1627_v55  ;;  %v3379_v16 = vadd.f32 %v1272_v60, %v1080_v13 }
 0x1a5   : > { %2697 = vmatmul.msk.bf16.gmra.mxu0 %vm283_vm1, %v2123_v35  ;;  %2680 = vmatmul.msk.bf16.gmra.mxu3 %vm283_vm1, %v1877_v29  ;;  %v1847_v35 = vld [vmem:[%s2894_s25 + $0x75] sm:$0xff] }
 0x1a7   : > { %v779_v30 = vpop.f32.mrf.mxu2 }
 0x1a8   : > { %v833_v52 = vadd.f32 %v779_v30, %v568_v34  ;;  %v569_v45 = vpop.f32.mrf.mxu1  ;;  %v1037_v24 = vpop.f32.mrf.mxu3 }
 0x1a9   : > { %v570_v60 = vadd.f32 %v569_v45, %v3095_v33 }
 0x1aa   : > { %v1277_v50 = vpop.f32.mrf.mxu0  ;;  %v1081_v18 = vadd.f32 %v1027_v0, %v833_v52 }
 0x1ac   : > { %v3384_v53 = vadd.f32 %v1275_v15, %v1081_v18  ;;  %v1878_v15 = vpack.c.bf16 %v1848_v19, %v1847_v35  ;;  %v1597_v18 = vld [vmem:[%s2894_s25 + $0x64] sm:$0xff]  ;;  %v1850_v35 = vld [vmem:[%s2894_s25 + $0x8d] sm:$0xff] }
 0x1af   : > { %v781_v14 = vpop.f32.mrf.mxu2 }
 0x1b0   : > { %v834_v25 = vadd.f32 %v781_v14, %v570_v60  ;;  %v572_v48 = vpop.f32.mrf.mxu1  ;;  %v1039_v0 = vpop.f32.mrf.mxu3 }
 0x1b1   : > { %v573_v29 = vadd.f32 %v572_v48, %v3111_v42  ;;  %v2125_v48 = vpack.c.bf16 %v2094_v54, %v2093_v22  ;;  %v2095_v22 = vld [vmem:[%s2894_s25 + $0x76] sm:$0xff]  ;;  %v2096_v54 = vld [vmem:[%s2894_s25 + $0x7e] sm:$0xff] }
 0x1b2   : > { %v1280_v21 = vpop.f32.mrf.mxu0  ;;  %v1082_v13 = vadd.f32 %v1029_v62, %v834_v25  ;;  %v1629_v25 = vpack.c.bf16 %v1598_v47, %v1597_v18  ;;  %v1600_v47 = vld [vmem:[%s2894_s25 + $0x7c] sm:$0xff] }
 0x1b3   : > { %2641 = vmatmul.msk.bf16.gmra.mxu1 %vm283_vm1, %v1627_v55 }
 0x1b4   : > { %2660 = vmatmul.msk.bf16.gmra.mxu2 %vm283_vm1, %v1628_v8  ;;  %v3395_v33 = vadd.f32 %v1277_v50, %v1082_v13 }
 0x1b5   : > { %2698 = vmatmul.msk.bf16.gmra.mxu0 %vm283_vm1, %v2124_v17  ;;  %2681 = vmatmul.msk.bf16.gmra.mxu3 %vm283_vm1, %v1878_v15  ;;  %v1849_v17 = vld [vmem:[%s2894_s25 + $0x85] sm:$0xff] }
 0x1b7   : > { %v784_v34 = vpop.f32.mrf.mxu2 }
 0x1b8   : > { %v835_v30 = vadd.f32 %v784_v34, %v573_v29  ;;  %v574_v62 = vpop.f32.mrf.mxu1  ;;  %v1042_v45 = vpop.f32.mrf.mxu3 }
 0x1b9   : > { %v575_v50 = vadd.f32 %v574_v62, %v3123_v51 }
 0x1ba   : > { %v1282_v52 = vpop.f32.mrf.mxu0  ;;  %v1083_v55 = vadd.f32 %v1032_v59, %v835_v30 }
 0x1bc   : > { %v3400_v7 = vadd.f32 %v1280_v21, %v1083_v55  ;;  %v1879_v21 = vpack.c.bf16 %v1850_v35, %v1849_v17  ;;  %v1599_v55 = vld [vmem:[%s2894_s25 + $0x74] sm:$0xff]  ;;  %v1852_v17 = vld [vmem:[%s2894_s25 + $0x9d] sm:$0xff] }
 0x1bf   : > { %v786_v60 = vpop.f32.mrf.mxu2 }
 0x1c0   : > { %v836_v42 = vadd.f32 %v786_v60, %v575_v50  ;;  %v577_v14 = vpop.f32.mrf.mxu1  ;;  %v1044_v59 = vpop.f32.mrf.mxu3 }
 0x1c1   : > { %v578_v15 = vadd.f32 %v577_v14, %v3137_v3  ;;  %v2126_v14 = vpack.c.bf16 %v2096_v54, %v2095_v22  ;;  %v2097_v22 = vld [vmem:[%s2894_s25 + $0x86] sm:$0xff]  ;;  %v2098_v54 = vld [vmem:[%s2894_s25 + $0x8e] sm:$0xff] }
 0x1c2   : > { %v1285_v19 = vpop.f32.mrf.mxu0  ;;  %v1084_v13 = vadd.f32 %v1034_v39, %v836_v42  ;;  %v1630_v42 = vpack.c.bf16 %v1600_v47, %v1599_v55  ;;  %v1602_v47 = vld [vmem:[%s2894_s25 + $0x8c] sm:$0xff] }
 0x1c3   : > { %2642 = vmatmul.msk.bf16.gmra.mxu1 %vm283_vm1, %v1628_v8 }
 0x1c4   : > { %2661 = vmatmul.msk.bf16.gmra.mxu2 %vm283_vm1, %v1629_v25  ;;  %v3411_v51 = vadd.f32 %v1282_v52, %v1084_v13 }
 0x1c5   : > { %2699 = vmatmul.msk.bf16.gmra.mxu0 %vm283_vm1, %v2125_v48  ;;  %2682 = vmatmul.msk.bf16.gmra.mxu3 %vm283_vm1, %v1879_v21  ;;  %v1851_v48 = vld [vmem:[%s2894_s25 + $0x95] sm:$0xff] }
 0x1c7   : > { %v789_v29 = vpop.f32.mrf.mxu2 }
 0x1c8   : > { %v837_v34 = vadd.f32 %v789_v29, %v578_v15  ;;  %v579_v39 = vpop.f32.mrf.mxu1  ;;  %v1047_v62 = vpop.f32.mrf.mxu3 }
 0x1c9   : > { %v580_v52 = vadd.f32 %v579_v39, %v3149_v20 }
 0x1ca   : > { %v1287_v30 = vpop.f32.mrf.mxu0  ;;  %v1085_v8 = vadd.f32 %v1037_v24, %v837_v34 }
 0x1cc   : > { %v3416_v18 = vadd.f32 %v1285_v19, %v1085_v8  ;;  %v1880_v19 = vpack.c.bf16 %v1852_v17, %v1851_v48  ;;  %v1601_v8 = vld [vmem:[%s2894_s25 + $0x84] sm:$0xff]  ;;  %v1854_v48 = vld [vmem:[%s2894_s25 + $0xad] sm:$0xff] }
 0x1cf   : > { %v791_v50 = vpop.f32.mrf.mxu2 }
 0x1d0   : > { %v838_v3 = vadd.f32 %v791_v50, %v580_v52  ;;  %v582_v60 = vpop.f32.mrf.mxu1  ;;  %v1049_v24 = vpop.f32.mrf.mxu3 }
 0x1d1   : > { %v583_v21 = vadd.f32 %v582_v60, %v3031_v58  ;;  %v2127_v60 = vpack.c.bf16 %v2098_v54, %v2097_v22  ;;  %v2099_v22 = vld [vmem:[%s2894_s25 + $0x96] sm:$0xff]  ;;  %v2100_v54 = vld [vmem:[%s2894_s25 + $0x9e] sm:$0xff] }
 0x1d2   : > { %v1290_v35 = vpop.f32.mrf.mxu0  ;;  %v1086_v13 = vadd.f32 %v1039_v0, %v838_v3  ;;  %v1631_v3 = vpack.c.bf16 %v1602_v47, %v1601_v8  ;;  %v1604_v47 = vld [vmem:[%s2894_s25 + $0x9c] sm:$0xff] }
 0x1d3   : > { %2643 = vmatmul.msk.bf16.gmra.mxu1 %vm283_vm1, %v1629_v25 }
 0x1d4   : > { %2662 = vmatmul.msk.bf16.gmra.mxu2 %vm283_vm1, %v1630_v42  ;;  %v3427_v20 = vadd.f32 %v1287_v30, %v1086_v13 }
 0x1d5   : > { %2700 = vmatmul.msk.bf16.gmra.mxu0 %vm283_vm1, %v2126_v14  ;;  %2683 = vmatmul.msk.bf16.gmra.mxu3 %vm283_vm1, %v1880_v19  ;;  %v1853_v14 = vld [vmem:[%s2894_s25 + $0xa5] sm:$0xff] }
 0x1d7   : > { %v794_v15 = vpop.f32.mrf.mxu2 }
 0x1d8   : > { %v839_v29 = vadd.f32 %v794_v15, %v583_v21  ;;  %v584_v0 = vpop.f32.mrf.mxu1  ;;  %v1052_v39 = vpop.f32.mrf.mxu3 }
 0x1d9   : > { %v585_v30 = vadd.f32 %v584_v0, %v3045_v6 }
 0x1da   : > { %v1292_v34 = vpop.f32.mrf.mxu0  ;;  %v1087_v25 = vadd.f32 %v1042_v45, %v839_v29 }
 0x1dc   : > { %v3432_v55 = vadd.f32 %v1290_v35, %v1087_v25  ;;  %v1881_v35 = vpack.c.bf16 %v1854_v48, %v1853_v14  ;;  %v1603_v25 = vld [vmem:[%s2894_s25 + $0x94] sm:$0xff]  ;;  %v1856_v14 = vld [vmem:[%s2894_s25 + $0xbd] sm:$0xff] }
 0x1df   : > { %v796_v52 = vpop.f32.mrf.mxu2 }
 0x1e0   : > { %v840_v58 = vadd.f32 %v796_v52, %v585_v30  ;;  %v587_v50 = vpop.f32.mrf.mxu1  ;;  %v1054_v45 = vpop.f32.mrf.mxu3 }
 0x1e1   : > { %v588_v19 = vadd.f32 %v587_v50, %v3060_v11  ;;  %v2128_v50 = vpack.c.bf16 %v2100_v54, %v2099_v22  ;;  %v2101_v22 = vld [vmem:[%s2894_s25 + $0xa6] sm:$0xff] }
 0x1e2   : > { %v1295_v17 = vpop.f32.mrf.mxu0  ;;  %v1088_v13 = vadd.f32 %v1044_v59, %v840_v58  ;;  %v1632_v58 = vpack.c.bf16 %v1604_v47, %v1603_v25  ;;  %v1606_v47 = vld [vmem:[%s2894_s25 + $0xac] sm:$0xff] }
 0x1e3   : > { %2644 = vmatmul.msk.bf16.gmra.mxu1 %vm283_vm1, %v1630_v42 }
 0x1e4   : > { %2663 = vmatmul.msk.bf16.gmra.mxu2 %vm283_vm1, %v1631_v3  ;;  %v3443_v6 = vadd.f32 %v1292_v34, %v1088_v13 }
 0x1e5   : > { %2701 = vmatmul.msk.bf16.gmra.mxu0 %vm283_vm1, %v2127_v60  ;;  %2684 = vmatmul.msk.bf16.gmra.mxu3 %vm283_vm1, %v1881_v35  ;;  %v1855_v60 = vld [vmem:[%s2894_s25 + $0xb5] sm:$0xff] }
 0x1e7   : > { %v799_v21 = vpop.f32.mrf.mxu2 }
 0x1e8   : > { %v841_v15 = vadd.f32 %v799_v21, %v588_v19  ;;  %v589_v59 = vpop.f32.mrf.mxu1  ;;  %v1959_v0 = vpop.f32.mrf.mxu3 }
 0x1e9   : > { %v590_v34 = vadd.f32 %v589_v59, %v3074_v23 }
 0x1ea   : > { %v1297_v29 = vpop.f32.mrf.mxu0  ;;  %v1089_v42 = vadd.f32 %v1047_v62, %v841_v15 }
 0x1ec   : > { %v3448_v8 = vadd.f32 %v1295_v17, %v1089_v42  ;;  %v1882_v17 = vpack.c.bf16 %v1856_v14, %v1855_v60  ;;  %v1605_v42 = vld [vmem:[%s2894_s25 + $0xa4] sm:$0xff]  ;;  %v1858_v60 = vld [vmem:[%s2894_s25 + $0xcd] sm:$0xff] }
 0x1ef   : > { %v801_v30 = vpop.f32.mrf.mxu2 }
 0x1f0   : > { %v842_v11 = vadd.f32 %v801_v30, %v590_v34  ;;  %v592_v52 = vpop.f32.mrf.mxu1  ;;  %v1961_v62 = vpop.f32.mrf.mxu3 }
 0x1f1   : > { %v593_v35 = vadd.f32 %v592_v52, %v3089_v28 }
 0x1f2   : > { %v1300_v48 = vpop.f32.mrf.mxu0  ;;  %v1090_v13 = vadd.f32 %v1049_v24, %v842_v11  ;;  %v1633_v11 = vpack.c.bf16 %v1606_v47, %v1605_v42  ;;  %v1608_v42 = vld [vmem:[%s2894_s25 + $0xbc] sm:$0xff] }
 0x1f3   : > { %2645 = vmatmul.msk.bf16.gmra.mxu1 %vm283_vm1, %v1631_v3  ;;  %v2103_v47 = vld [vmem:[%s2894_s25 + $0xb6] sm:$0xff] }
 0x1f4   : > { %2664 = vmatmul.msk.bf16.gmra.mxu2 %vm283_vm1, %v1632_v58  ;;  %v3459_v23 = vadd.f32 %v1297_v29, %v1090_v13  ;;  %v2102_v29 = vld [vmem:[%s2894_s25 + $0xae] sm:$0xff] }
 0x1f5   : > { %2702 = vmatmul.msk.bf16.gmra.mxu0 %vm283_vm1, %v2128_v50  ;;  %2685 = vmatmul.msk.bf16.gmra.mxu3 %vm283_vm1, %v1882_v17  ;;  %v2129_v52 = vpack.c.bf16 %v2102_v29, %v2101_v22  ;;  %v1857_v50 = vld [vmem:[%s2894_s25 + $0xc5] sm:$0xff] }
 0x1f6   : > { %v2104_v22 = vld [vmem:[%s2894_s25 + $0xbe] sm:$0xff] }
 0x1f7   : > { %v804_v19 = vpop.f32.mrf.mxu2 }
 0x1f8   : > { %v843_v21 = vadd.f32 %v804_v19, %v593_v35  ;;  %v594_v24 = vpop.f32.mrf.mxu1  ;;  %v3463_v59 = vpop.f32.mrf.mxu3 }
 0x1f9   : > { %v595_v54 = vadd.f32 %v594_v24, %v3103_v40 }
 0x1fa   : > { %v1302_v15 = vpop.f32.mrf.mxu0  ;;  %v1091_v3 = vadd.f32 %v1052_v39, %v843_v21 }
 0x1fc   : > { %v3466_v25 = vadd.f32 %v1300_v48, %v1091_v3  ;;  %v1883_v48 = vpack.c.bf16 %v1858_v60, %v1857_v50  ;;  %v1607_v3 = vld [vmem:[%s2894_s25 + $0xb4] sm:$0xff] }
 0x1fd   : > { %v1859_v50 = vld [vmem:[%s2894_s25 + $0xd5] sm:$0xff] }
 0x1ff   : > { %v806_v28 = vpop.f32.mrf.mxu2 }
 0x200   : > { %v844_v34 = vadd.f32 %v806_v28, %v595_v54  ;;  %v1463_v30 = vpop.f32.mrf.mxu1  ;;  %v3474_v13 = vpop.f32.mrf.mxu3 }
 0x201   : > { %v1553_v17 = vadd.f32 %v1463_v30, %v3164_v61  ;;  %v3493_v61 = vld [vmem:[%s3719_s2] ss:$0 sm:$0xff]  ;;  %v1634_v30 = vpack.c.bf16 %v1608_v42, %v1607_v3 }
 0x202   : > { %v2207_v14 = vpop.f32.mrf.mxu0  ;;  %v1092_v39 = vadd.f32 %v1054_v45, %v844_v34 }
 0x203   : > { %2646 = vmatmul.msk.bf16.gmra.mxu1 %vm283_vm1, %v1632_v58 }
 0x204   : > { %2665 = vmatmul.msk.bf16.gmra.mxu2 %vm283_vm1, %v1633_v11  ;;  %v3479_v40 = vadd.f32 %v1302_v15, %v1092_v39 }
 0x205   : > { %2703 = vmatmul.msk.bf16.gmra.mxu0 %vm283_vm1, %v2129_v52  ;;  %2686 = vmatmul.msk.bf16.gmra.mxu3 %vm283_vm1, %v1883_v48  ;;  %v2130_v52 = vpack.c.bf16 %v2104_v22, %v2103_v47  ;;  %v1609_v22 = vld [vmem:[%s2894_s25 + $0xc4] sm:$0xff] }
 0x207   : > { %v1711_v35 = vpop.f32.mrf.mxu2 }
 0x208   : > { %v1801_v45 = vadd.f32 %v1711_v35, %v1553_v17  ;;  %v1465_v19 = vpop.f32.mrf.mxu1  ;;  %v3483_v24 = vpop.f32.mrf.mxu3 }
 0x209   : > { %v1554_v15 = vadd.f32 %v1465_v19, %v3177_v57 }
 0x20a   : > { %v2209_v21 = vpop.f32.mrf.mxu0  ;;  %v2049_v58 = vadd.f32 %v1959_v0, %v1801_v45  ;;  %v1860_v0 = vld [vmem:[%s2894_s25 + $0xdd] sm:$0xff] }
 0x20b   : > { %v1884_v57 = vpack.c.bf16 %v1860_v0, %v1859_v50 }
 0x20c   : > { %v2297_v54 = vadd.f32 %v2207_v14, %v2049_v58 }
 0x20e   : > { %v2337_v14 = vadd.f32 %v3493_v61, %v2297_v54  ;;  %v2106_v54 = vld [vmem:[%s2894_s25 + $0xce] sm:$0xff] }
 0x20f   : > { %v1713_v29 = vpop.f32.mrf.mxu2 }
 0x210   : > { %v1802_v28 = vadd.f32 %v1713_v29, %v1554_v15  ;;  %v1468_v34 = vpop.f32.mrf.mxu1  ;;  %v3497_v48 = vpop.f32.mrf.mxu3  ;;  %v1610_v15 = vld [vmem:[%s2894_s25 + $0xcc] sm:$0xff] }
 0x211   : > { %v2105_v29 = vld [vmem:[%s2894_s25 + $0xc6] sm:$0xff] }
 0x212   : > { %v2212_v60 = vpop.f32.mrf.mxu0  ;;  %v2050_v39 = vadd.f32 %v1961_v62, %v1802_v28  ;;  %v1555_v62 = vadd.f32 %v1468_v34, %v3184_v41 }
 0x213   : > { %2647 = vmatmul.msk.bf16.gmra.mxu1 %vm283_vm1, %v1633_v11  ;;  %v2373_v11 = vmax.f32 %v2337_v14, 0.0  ;;  %v1861_v14 = vld [vmem:[%s2894_s25 + $0xe5] sm:$0xff] }
 0x214   : > { %v2298_v17 = vadd.f32 %v2209_v21, %v2050_v39  ;;  %2666 = vmatmul.msk.bf16.gmra.mxu2 %vm283_vm1, %v1634_v30  ;;  %v1635_v39 = vpack.c.bf16 %v1610_v15, %v1609_v22 }
 0x215   : > { %2704 = vmatmul.msk.bf16.gmra.mxu0 %vm283_vm1, %v2130_v52  ;;  %2687 = vmatmul.msk.bf16.gmra.mxu3 %vm283_vm1, %v1884_v57  ;;  %v2131_v57 = vpack.c.bf16 %v2106_v54, %v2105_v29  ;;  %v1611_v29 = vld [vmem:[%s2894_s25 + $0xd4] sm:$0xff]  ;;  %v1612_v54 = vld [vmem:[%s2894_s25 + $0xdc] sm:$0xff] }
 0x216   : > { %v2338_v35 = vadd.f32 %v3493_v61, %v2298_v17  ;;  %v1862_v17 = vld [vmem:[%s2894_s25 + $0xed] sm:$0xff] }
 0x217   : > { %v1716_v45 = vpop.f32.mrf.mxu2 }
 0x218   : > { %v2374_v19 = vmax.f32 %v2338_v35, 0.0  ;;  %v1803_v58 = vadd.f32 %v1716_v45, %v1555_v62  ;;  %v1470_v21 = vpop.f32.mrf.mxu1  ;;  %v3512_v47 = vpop.f32.mrf.mxu3 }
 0x219   : > { %v1556_v28 = vadd.f32 %v1470_v21, %v3197_v10 }
 0x21a   : > { %v2214_v3 = vpop.f32.mrf.mxu0  ;;  %v2718_v42 = vpack.c.bf16 %v2374_v19, %v2373_v11  ;;  %v2051_v41 = vadd.f32 %v3463_v59, %v1803_v58  ;;  %v1885_v59 = vpack.c.bf16 %v1862_v17, %v1861_v14  ;;  %v1636_v14 = vpack.c.bf16 %v1612_v54, %v1611_v29  ;;  %v1613_v29 = vld [vmem:[%s2894_s25 + $0xe4] sm:$0xff]  ;;  %v1614_v54 = vld [vmem:[%s2894_s25 + $0xec] sm:$0xff] }
 0x21c   : > { %2719 = vst [vmem:[%s3510_s16] sm:$0xff] %v2718_v42   ;;  %v2299_v52 = vadd.f32 %v2212_v60, %v2051_v41 }
 0x21e   : > { %v2339_v11 = vadd.f32 %v3493_v61, %v2299_v52 }
 0x21f   : > { %v1718_v34 = vpop.f32.mrf.mxu2 }
 0x220   : > { %v1804_v50 = vadd.f32 %v1718_v34, %v1556_v28  ;;  %v1473_v0 = vpop.f32.mrf.mxu1  ;;  %v3524_v45 = vpop.f32.mrf.mxu3  ;;  %v2107_v28 = vld [vmem:[%s2894_s25 + $0xd6] sm:$0xff] }
 0x222   : > { %v2217_v35 = vpop.f32.mrf.mxu0  ;;  %v2052_v62 = vadd.f32 %v3474_v13, %v1804_v50  ;;  %v1557_v13 = vadd.f32 %v1473_v0, %v3204_v2  ;;  %v2108_v2 = vld [vmem:[%s2894_s25 + $0xde] sm:$0xff] }
 0x223   : > { %2648 = vmatmul.msk.bf16.gmra.mxu1 %vm283_vm1, %v1634_v30  ;;  %v2375_v30 = vmax.f32 %v2339_v11, 0.0  ;;  %v2132_v17 = vpack.c.bf16 %v2108_v2, %v2107_v28  ;;  %v2109_v28 = vld [vmem:[%s2894_s25 + $0xe6] sm:$0xff] }
 0x224   : > { %v2300_v10 = vadd.f32 %v2214_v3, %v2052_v62  ;;  %2667 = vmatmul.msk.bf16.gmra.mxu2 %vm283_vm1, %v1635_v39  ;;  %v1863_v62 = vld [vmem:[%s2894_s25 + $0xf5] sm:$0xff] }
 0x225   : > { %2705 = vmatmul.msk.bf16.gmra.mxu0 %vm283_vm1, %v2131_v57  ;;  %2688 = vmatmul.msk.bf16.gmra.mxu3 %vm283_vm1, %v1885_v59  ;;  %v1864_v59 = vld [vmem:[%s2894_s25 + $0xfd] sm:$0xff] }
 0x226   : > { %v2340_v60 = vadd.f32 %v3493_v61, %v2300_v10 }
 0x227   : > { %v1721_v19 = vpop.f32.mrf.mxu2 }
 0x228   : > { %v2376_v58 = vmax.f32 %v2340_v60, 0.0  ;;  %v1805_v21 = vadd.f32 %v1721_v19, %v1557_v13  ;;  %v1475_v42 = vpop.f32.mrf.mxu1  ;;  %v3533_v22 = vpop.f32.mrf.mxu3 }
 0x229   : > { %v1558_v34 = vadd.f32 %v1475_v42, %v3217_v27 }
 0x22a   : > { %v2219_v3 = vpop.f32.mrf.mxu0  ;;  %v2723_v41 = vpack.c.bf16 %v2376_v58, %v2375_v30  ;;  %v2053_v15 = vadd.f32 %v3483_v24, %v1805_v21  ;;  %v1886_v24 = vpack.c.bf16 %v1864_v59, %v1863_v62  ;;  %v1865_v62 = vld [vmem:[%s2894_s25 + $0x105] sm:$0xff]  ;;  %v1866_v59 = vld [vmem:[%s2894_s25 + $0x10d] sm:$0xff] }
 0x22c   : > { %2805 = vst [vmem:[%s3510_s16 + $0x8] sm:$0xff] %v2723_v41   ;;  %v2301_v50 = vadd.f32 %v2217_v35, %v2053_v15 }
 0x22e   : > { %v2341_v13 = vadd.f32 %v3493_v61, %v2301_v50 }
 0x22f   : > { %v1723_v52 = vpop.f32.mrf.mxu2 }
 0x230   : > { %v1806_v0 = vadd.f32 %v1723_v52, %v1558_v34  ;;  %v1478_v57 = vpop.f32.mrf.mxu1  ;;  %v3545_v60 = vpop.f32.mrf.mxu3 }
 0x232   : > { %v2222_v11 = vpop.f32.mrf.mxu0  ;;  %v2054_v10 = vadd.f32 %v3497_v48, %v1806_v0  ;;  %v1559_v48 = vadd.f32 %v1478_v57, %v3224_v36  ;;  %v2110_v36 = vld [vmem:[%s2894_s25 + $0xee] sm:$0xff]  ;;  %v1637_v57 = vpack.c.bf16 %v1614_v54, %v1613_v29  ;;  %v2111_v29 = vld [vmem:[%s2894_s25 + $0xf6] sm:$0xff] }
 0x233   : > { %2649 = vmatmul.msk.bf16.gmra.mxu1 %vm283_vm1, %v1635_v39  ;;  %v2377_v39 = vmax.f32 %v2341_v13, 0.0 }
 0x234   : > { %v2302_v27 = vadd.f32 %v2219_v3, %v2054_v10  ;;  %2668 = vmatmul.msk.bf16.gmra.mxu2 %vm283_vm1, %v1636_v14 }
 0x235   : > { %2706 = vmatmul.msk.bf16.gmra.mxu0 %vm283_vm1, %v2132_v17  ;;  %2689 = vmatmul.msk.bf16.gmra.mxu3 %vm283_vm1, %v1886_v24  ;;  %v2133_v17 = vpack.c.bf16 %v2110_v36, %v2109_v28 }
 0x236   : > { %v2342_v35 = vadd.f32 %v3493_v61, %v2302_v27 }
 0x237   : > { %v1726_v19 = vpop.f32.mrf.mxu2 }
 0x238   : > { %v2378_v30 = vmax.f32 %v2342_v35, 0.0  ;;  %v1807_v58 = vadd.f32 %v1726_v19, %v1559_v48  ;;  %v1480_v21 = vpop.f32.mrf.mxu1  ;;  %v3554_v41 = vpop.f32.mrf.mxu3 }
 0x239   : > { %v1560_v2 = vadd.f32 %v1480_v21, %v3237_v44 }
 0x23a   : > { %v2224_v42 = vpop.f32.mrf.mxu0  ;;  %v2728_v3 = vpack.c.bf16 %v2378_v30, %v2377_v39  ;;  %v2055_v15 = vadd.f32 %v3512_v47, %v1807_v58  ;;  %v1887_v47 = vpack.c.bf16 %v1866_v59, %v1865_v62 }
 0x23c   : > { %2806 = vst [vmem:[%s3510_s16 + $0x10] sm:$0xff] %v2728_v3   ;;  %v2303_v52 = vadd.f32 %v2222_v11, %v2055_v15  ;;  %v1615_v3 = vld [vmem:[%s2894_s25 + $0xf4] sm:$0xff]  ;;  %v1616_v15 = vld [vmem:[%s2894_s25 + $0xfc] sm:$0xff] }
 0x23e   : > { %v2343_v27 = vadd.f32 %v3493_v61, %v2303_v52  ;;  %v1638_v52 = vpack.c.bf16 %v1616_v15, %v1615_v3 }
 0x23f   : > { %v1728_v34 = vpop.f32.mrf.mxu2 }
 0x240   : > { %v1808_v50 = vadd.f32 %v1728_v34, %v1560_v2  ;;  %v1483_v0 = vpop.f32.mrf.mxu1  ;;  %v3566_v13 = vpop.f32.mrf.mxu3 }
 0x242   : > { %v2227_v10 = vpop.f32.mrf.mxu0  ;;  %v2056_v24 = vadd.f32 %v3524_v45, %v1808_v50  ;;  %v1561_v45 = vadd.f32 %v1483_v0, %v3244_v32  ;;  %v2112_v32 = vld [vmem:[%s2894_s25 + $0xfe] sm:$0xff]  ;;  %v1867_v0 = vld [vmem:[%s2894_s25 + $0x115] sm:$0xff] }
 0x243   : > { %2650 = vmatmul.msk.bf16.gmra.mxu1 %vm283_vm1, %v1636_v14  ;;  %v2379_v14 = vmax.f32 %v2343_v27, 0.0  ;;  %v2134_v50 = vpack.c.bf16 %v2112_v32, %v2111_v29 }
 0x244   : > { %v2304_v44 = vadd.f32 %v2224_v42, %v2056_v24  ;;  %2669 = vmatmul.msk.bf16.gmra.mxu2 %vm283_vm1, %v1637_v57 }
 0x245   : > { %2707 = vmatmul.msk.bf16.gmra.mxu0 %vm283_vm1, %v2133_v17  ;;  %2690 = vmatmul.msk.bf16.gmra.mxu3 %vm283_vm1, %v1887_v47  ;;  %v1868_v17 = vld [vmem:[%s2894_s25 + $0x11d] sm:$0xff] }
 0x246   : > { %v2344_v11 = vadd.f32 %v3493_v61, %v2304_v44 }
 0x247   : > { %v1731_v35 = vpop.f32.mrf.mxu2 }
 0x248   : > { %v2380_v48 = vmax.f32 %v2344_v11, 0.0  ;;  %v1809_v19 = vadd.f32 %v1731_v35, %v1561_v45  ;;  %v1485_v39 = vpop.f32.mrf.mxu1  ;;  %v3575_v21 = vpop.f32.mrf.mxu3 }
 0x249   : > { %v1562_v54 = vadd.f32 %v1485_v39, %v3257_v12  ;;  %v1617_v39 = vld [vmem:[%s2894_s25 + $0x104] sm:$0xff] }
 0x24a   : > { %v2229_v30 = vpop.f32.mrf.mxu0  ;;  %v2733_v58 = vpack.c.bf16 %v2380_v48, %v2379_v14  ;;  %v2057_v42 = vadd.f32 %v3533_v22, %v1809_v19  ;;  %v1888_v22 = vpack.c.bf16 %v1868_v17, %v1867_v0 }
 0x24c   : > { %2807 = vst [vmem:[%s3510_s16 + $0x18] sm:$0xff] %v2733_v58   ;;  %v2305_v36 = vadd.f32 %v2227_v10, %v2057_v42  ;;  %v2113_v58 = vld [vmem:[%s2894_s25 + $0x106] sm:$0xff] }
 0x24e   : > { %v2345_v47 = vadd.f32 %v3493_v61, %v2305_v36  ;;  %v1869_v36 = vld [vmem:[%s2894_s25 + $0x125] sm:$0xff] }
 0x24f   : > { %v1733_v28 = vpop.f32.mrf.mxu2 }
 0x250   : > { %v1810_v2 = vadd.f32 %v1733_v28, %v1562_v54  ;;  %v1488_v34 = vpop.f32.mrf.mxu1  ;;  %v3587_v24 = vpop.f32.mrf.mxu3 }
 0x252   : > { %v2232_v62 = vpop.f32.mrf.mxu0  ;;  %v2058_v59 = vadd.f32 %v3545_v60, %v1810_v2  ;;  %v1563_v60 = vadd.f32 %v1488_v34, %v3264_v31  ;;  %v2114_v31 = vld [vmem:[%s2894_s25 + $0x10e] sm:$0xff] }
 0x253   : > { %2651 = vmatmul.msk.bf16.gmra.mxu1 %vm283_vm1, %v1637_v57  ;;  %v2381_v57 = vmax.f32 %v2345_v47, 0.0  ;;  %v2135_v28 = vpack.c.bf16 %v2114_v31, %v2113_v58  ;;  %v1870_v2 = vld [vmem:[%s2894_s25 + $0x12d] sm:$0xff] }
 0x254   : > { %v2306_v12 = vadd.f32 %v2229_v30, %v2058_v59  ;;  %2670 = vmatmul.msk.bf16.gmra.mxu2 %vm283_vm1, %v1638_v52  ;;  %v1618_v30 = vld [vmem:[%s2894_s25 + $0x10c] sm:$0xff] }
 0x255   : > { %2708 = vmatmul.msk.bf16.gmra.mxu0 %vm283_vm1, %v2134_v50  ;;  %2691 = vmatmul.msk.bf16.gmra.mxu3 %vm283_vm1, %v1888_v22  ;;  %v1639_v54 = vpack.c.bf16 %v1618_v30, %v1617_v39 }
 0x256   : > { %v2346_v10 = vadd.f32 %v3493_v61, %v2306_v12 }
 0x257   : > { %v1736_v27 = vpop.f32.mrf.mxu2 }
 0x258   : > { %v2382_v44 = vmax.f32 %v2346_v10, 0.0  ;;  %v1811_v11 = vadd.f32 %v1736_v27, %v1563_v60  ;;  %v1490_v45 = vpop.f32.mrf.mxu1  ;;  %v3596_v48 = vpop.f32.mrf.mxu3 }
 0x259   : > { %v1564_v42 = vadd.f32 %v1490_v45, %v3277_v56  ;;  %v2115_v45 = vld [vmem:[%s2894_s25 + $0x116] sm:$0xff] }
 0x25a   : > { %v2234_v35 = vpop.f32.mrf.mxu0  ;;  %v2738_v14 = vpack.c.bf16 %v2382_v44, %v2381_v57  ;;  %v2059_v19 = vadd.f32 %v3554_v41, %v1811_v11  ;;  %v1889_v41 = vpack.c.bf16 %v1870_v2, %v1869_v36  ;;  %v1619_v44 = vld [vmem:[%s2894_s25 + $0x114] sm:$0xff]  ;;  %v1620_v11 = vld [vmem:[%s2894_s25 + $0x11c] sm:$0xff] }
 0x25b   : > { %v1640_v58 = vpack.c.bf16 %v1620_v11, %v1619_v44 }
 0x25c   : > { %2808 = vst [vmem:[%s3510_s16 + $0x20] sm:$0xff] %v2738_v14   ;;  %v2307_v15 = vadd.f32 %v2232_v62, %v2059_v19 }
 0x25e   : > { %v2347_v17 = vadd.f32 %v3493_v61, %v2307_v15 }
 0x25f   : > { %v1738_v3 = vpop.f32.mrf.mxu2 }
 0x260   : > { %v1812_v29 = vadd.f32 %v1738_v3, %v1564_v42  ;;  %v1493_v32 = vpop.f32.mrf.mxu1  ;;  %v3608_v0 = vpop.f32.mrf.mxu3  ;;  %v1871_v42 = vld [vmem:[%s2894_s25 + $0x135] sm:$0xff]  ;;  %v1872_v3 = vld [vmem:[%s2894_s25 + $0x13d] sm:$0xff] }
 0x262   : > { %v2237_v34 = vpop.f32.mrf.mxu0  ;;  %v2060_v50 = vadd.f32 %v3566_v13, %v1812_v29  ;;  %v1565_v13 = vadd.f32 %v1493_v32, %v3284_v37  ;;  %v2116_v37 = vld [vmem:[%s2894_s25 + $0x11e] sm:$0xff] }
 0x263   : > { %2652 = vmatmul.msk.bf16.gmra.mxu1 %vm283_vm1, %v1638_v52  ;;  %v2383_v52 = vmax.f32 %v2347_v17, 0.0  ;;  %v2136_v31 = vpack.c.bf16 %v2116_v37, %v2115_v45 }
 0x264   : > { %v2308_v56 = vadd.f32 %v2234_v35, %v2060_v50  ;;  %2671 = vmatmul.msk.bf16.gmra.mxu2 %vm283_vm1, %v1639_v54 }
 0x265   : > { %2709 = vmatmul.msk.bf16.gmra.mxu0 %vm283_vm1, %v2135_v28  ;;  %2692 = vmatmul.msk.bf16.gmra.mxu3 %vm283_vm1, %v1889_v41 }
 0x266   : > { %v2348_v62 = vadd.f32 %v3493_v61, %v2308_v56 }
 0x267   : > { %v1741_v59 = vpop.f32.mrf.mxu2 }
 0x268   : > { %v2384_v22 = vmax.f32 %v2348_v62, 0.0  ;;  %v1813_v47 = vadd.f32 %v1741_v59, %v1565_v13  ;;  %v1495_v12 = vpop.f32.mrf.mxu1  ;;  %v3617_v27 = vpop.f32.mrf.mxu3  ;;  %v1621_v59 = vld [vmem:[%s2894_s25 + $0x124] sm:$0xff] }
 0x269   : > { %v1566_v35 = vadd.f32 %v1495_v12, %v3295_v9 }
 0x26a   : > { %v2239_v10 = vpop.f32.mrf.mxu0  ;;  %v2743_v60 = vpack.c.bf16 %v2384_v22, %v2383_v52  ;;  %v2061_v57 = vadd.f32 %v3575_v21, %v1813_v47  ;;  %v1890_v21 = vpack.c.bf16 %v1872_v3, %v1871_v42  ;;  %v1622_v52 = vld [vmem:[%s2894_s25 + $0x12c] sm:$0xff] }
 0x26b   : > { %v2117_v22 = vld [vmem:[%s2894_s25 + $0x126] sm:$0xff]  ;;  %v2118_v47 = vld [vmem:[%s2894_s25 + $0x12e] sm:$0xff]  ;;  %v1641_v44 = vpack.c.bf16 %v1622_v52, %v1621_v59 }
 0x26c   : > { %2809 = vst [vmem:[%s3510_s16 + $0x28] sm:$0xff] %v2743_v60   ;;  %v2309_v19 = vadd.f32 %v2237_v34, %v2061_v57  ;;  %v2137_v11 = vpack.c.bf16 %v2118_v47, %v2117_v22 }
 0x26e   : > { %v2349_v28 = vadd.f32 %v3493_v61, %v2309_v19 }
 0x26f   : > { %v1743_v14 = vpop.f32.mrf.mxu2 }
 0x270   : > { %v1814_v39 = vadd.f32 %v1743_v14, %v1566_v35  ;;  %v1498_v30 = vpop.f32.mrf.mxu1  ;;  %v3629_v32 = vpop.f32.mrf.mxu3 }
 0x272   : > { %v2242_v15 = vpop.f32.mrf.mxu0  ;;  %v2062_v29 = vadd.f32 %v3587_v24, %v1814_v39  ;;  %v1567_v24 = vadd.f32 %v1498_v30, %v3301_v49 }
 0x273   : > { %2653 = vmatmul.msk.bf16.gmra.mxu1 %vm283_vm1, %v1639_v54  ;;  %v2385_v54 = vmax.f32 %v2349_v28, 0.0  ;;  %v1624_v28 = vld [vmem:[%s2894_s25 + $0x13c] sm:$0xff] }
 0x274   : > { %v2310_v9 = vadd.f32 %v2239_v10, %v2062_v29  ;;  %2672 = vmatmul.msk.bf16.gmra.mxu2 %vm283_vm1, %v1640_v58 }
 0x275   : > { %2710 = vmatmul.msk.bf16.gmra.mxu0 %vm283_vm1, %v2136_v31  ;;  %2693 = vmatmul.msk.bf16.gmra.mxu3 %vm283_vm1, %v1890_v21  ;;  %v1623_v21 = vld [vmem:[%s2894_s25 + $0x134] sm:$0xff] }
 0x276   : > { %v2350_v36 = vadd.f32 %v3493_v61, %v2310_v9  ;;  %v2119_v9 = vld [vmem:[%s2894_s25 + $0x136] sm:$0xff] }
 0x277   : > { %v1746_v2 = vpop.f32.mrf.mxu2 }
 0x278   : > { %v2386_v34 = vmax.f32 %v2350_v36, 0.0  ;;  %v1815_v50 = vadd.f32 %v1746_v2, %v1567_v24  ;;  %v1500_v41 = vpop.f32.mrf.mxu1  ;;  %v3638_v62 = vpop.f32.mrf.mxu3  ;;  %v2120_v36 = vld [vmem:[%s2894_s25 + $0x13e] sm:$0xff] }
 0x279   : > { %v1568_v49 = vadd.f32 %v1500_v41, %v3312_v26  ;;  %v2138_v41 = vpack.c.bf16 %v2120_v36, %v2119_v9 }
 0x27a   : > { %v2244_v17 = vpop.f32.mrf.mxu0  ;;  %v2748_v56 = vpack.c.bf16 %v2386_v34, %v2385_v54  ;;  %v2063_v13 = vadd.f32 %v3596_v48, %v1815_v50  ;;  %v1642_v50 = vpack.c.bf16 %v1624_v28, %v1623_v21 }
 0x27c   : > { %2810 = vst [vmem:[%s3510_s16 + $0x30] sm:$0xff] %v2748_v56   ;;  %v2311_v10 = vadd.f32 %v2242_v15, %v2063_v13 }
 0x27e   : > { %v2351_v48 = vadd.f32 %v3493_v61, %v2311_v10 }
 0x27f   : > { %v1748_v12 = vpop.f32.mrf.mxu2 }
 0x280   : > { %v1816_v60 = vadd.f32 %v1748_v12, %v1568_v49  ;;  %v1503_v57 = vpop.f32.mrf.mxu1  ;;  %v2006_v35 = vpop.f32.mrf.mxu3  ;;  %v2387_v39 = vmax.f32 %v2351_v48, 0.0 }
 0x281   : > { %v1569_v19 = vadd.f32 %v1503_v57, %v3318_v1 }
 0x282   : > { %v2247_v45 = vpop.f32.mrf.mxu0  ;;  %v2064_v37 = vadd.f32 %v3608_v0, %v1816_v60 }
 0x283   : > { %2654 = vmatmul.msk.bf16.gmra.mxu1 %vm283_vm1, %v1640_v58 }
 0x284   : > { %v2312_v14 = vadd.f32 %v2244_v17, %v2064_v37  ;;  %2673 = vmatmul.msk.bf16.gmra.mxu2 %vm283_vm1, %v1641_v44 }
 0x285   : > { %2711 = vmatmul.msk.bf16.gmra.mxu0 %vm283_vm1, %v2137_v11 }
 0x286   : > { %v2352_v26 = vadd.f32 %v3493_v61, %v2312_v14 }
 0x287   : > { %v1751_v0 = vpop.f32.mrf.mxu2 }
 0x288   : > { %v2388_v30 = vmax.f32 %v2352_v26, 0.0  ;;  %v1817_v31 = vadd.f32 %v1751_v0, %v1569_v19  ;;  %v1505_v58 = vpop.f32.mrf.mxu1  ;;  %v2009_v15 = vpop.f32.mrf.mxu3 }
 0x289   : > { %v1570_v24 = vadd.f32 %v1505_v58, %v3329_v43 }
 0x28a   : > { %v2249_v42 = vpop.f32.mrf.mxu0  ;;  %v2753_v3 = vpack.c.bf16 %v2388_v30, %v2387_v39  ;;  %v2065_v29 = vadd.f32 %v3617_v27, %v1817_v31 }
 0x28c   : > { %2811 = vst [vmem:[%s3510_s16 + $0x38] sm:$0xff] %v2753_v3   ;;  %v2313_v54 = vadd.f32 %v2247_v45, %v2065_v29 }
 0x28e   : > { %v2353_v27 = vadd.f32 %v3493_v61, %v2313_v54 }
 0x28f   : > { %v1753_v2 = vpop.f32.mrf.mxu2 }
 0x290   : > { %v1818_v1 = vadd.f32 %v1753_v2, %v1570_v24  ;;  %v1508_v34 = vpop.f32.mrf.mxu1  ;;  %v2011_v43 = vpop.f32.mrf.mxu3  ;;  %v2389_v47 = vmax.f32 %v2353_v27, 0.0 }
 0x291   : > { %v1571_v52 = vadd.f32 %v1508_v34, %v3336_v46 }
 0x292   : > { %v2252_v17 = vpop.f32.mrf.mxu0  ;;  %v2066_v56 = vadd.f32 %v3629_v32, %v1818_v1 }
 0x293   : > { %2655 = vmatmul.msk.bf16.gmra.mxu1 %vm283_vm1, %v1641_v44 }
 0x294   : > { %v2314_v13 = vadd.f32 %v2249_v42, %v2066_v56  ;;  %2674 = vmatmul.msk.bf16.gmra.mxu2 %vm283_vm1, %v1642_v50 }
 0x295   : > { %2712 = vmatmul.msk.bf16.gmra.mxu0 %vm283_vm1, %v2138_v41 }
 0x296   : > { %v2354_v59 = vadd.f32 %v3493_v61, %v2314_v13 }
 0x297   : > { %v1756_v22 = vpop.f32.mrf.mxu2 }
 0x298   : > { %v2390_v49 = vmax.f32 %v2354_v59, 0.0  ;;  %v1819_v12 = vadd.f32 %v1756_v22, %v1571_v52  ;;  %v1510_v32 = vpop.f32.mrf.mxu1  ;;  %v2014_v45 = vpop.f32.mrf.mxu3 }
 0x299   : > { %v1572_v44 = vadd.f32 %v1510_v32, %v3347_v4 }
 0x29a   : > { %v2254_v10 = vpop.f32.mrf.mxu0  ;;  %v2758_v60 = vpack.c.bf16 %v2390_v49, %v2389_v47  ;;  %v2067_v57 = vadd.f32 %v3638_v62, %v1819_v12 }
 0x29c   : > { %2812 = vst [vmem:[%s3510_s16 + $0x40] sm:$0xff] %v2758_v60   ;;  %v2315_v37 = vadd.f32 %v2252_v17, %v2067_v57 }
 0x29e   : > { %v2355_v19 = vadd.f32 %v3493_v61, %v2315_v37 }
 0x29f   : > { %v1758_v11 = vpop.f32.mrf.mxu2 }
 0x2a0   : > { %v1820_v48 = vadd.f32 %v1758_v11, %v1572_v44  ;;  %v1513_v14 = vpop.f32.mrf.mxu1  ;;  %v2391_v58 = vmax.f32 %v2355_v19, 0.0  ;;  %v2016_v29 = vpop.f32.mrf.mxu3 }
 0x2a1   : > { %v1573_v30 = vadd.f32 %v1513_v14, %v3352_v5 }
 0x2a2   : > { %v2257_v26 = vpop.f32.mrf.mxu0  ;;  %v2068_v46 = vadd.f32 %v2006_v35, %v1820_v48 }
 0x2a4   : > { %v2316_v0 = vadd.f32 %v2254_v10, %v2068_v46 }
 0x2a6   : > { %v2356_v39 = vadd.f32 %v3493_v61, %v2316_v0 }
 0x2a7   : > { %v1761_v31 = vpop.f32.mrf.mxu2 }
 0x2a8   : > { %v2392_v62 = vmax.f32 %v2356_v39, 0.0  ;;  %v1821_v42 = vadd.f32 %v1761_v31, %v1573_v30  ;;  %v1515_v4 = vpop.f32.mrf.mxu1  ;;  %v2019_v5 = vpop.f32.mrf.mxu3 }
 0x2a9   : > { %v1574_v9 = vadd.f32 %v1515_v4, %v3363_v63 }
 0x2aa   : > { %v2259_v3 = vpop.f32.mrf.mxu0  ;;  %v2763_v21 = vpack.c.bf16 %v2392_v62, %v2391_v58  ;;  %v2069_v28 = vadd.f32 %v2009_v15, %v1821_v42 }
 0x2ac   : > { %2813 = vst [vmem:[%s3510_s16 + $0x48] sm:$0xff] %v2763_v21   ;;  %v2317_v36 = vadd.f32 %v2257_v26, %v2069_v28 }
 0x2ae   : > { %v2357_v34 = vadd.f32 %v3493_v61, %v2317_v36 }
 0x2af   : > { %v1763_v35 = vpop.f32.mrf.mxu2 }
 0x2b0   : > { %v1822_v24 = vadd.f32 %v1763_v35, %v1574_v9  ;;  %v1518_v2 = vpop.f32.mrf.mxu1  ;;  %v2393_v27 = vmax.f32 %v2357_v34, 0.0  ;;  %v2021_v47 = vpop.f32.mrf.mxu3 }
 0x2b1   : > { %v1575_v17 = vadd.f32 %v1518_v2, %v3368_v38 }
 0x2b2   : > { %v2262_v54 = vpop.f32.mrf.mxu0  ;;  %v2070_v1 = vadd.f32 %v2011_v43, %v1822_v24 }
 0x2b4   : > { %v2318_v50 = vadd.f32 %v2259_v3, %v2070_v1 }
 0x2b6   : > { %v2358_v41 = vadd.f32 %v3493_v61, %v2318_v50 }
 0x2b7   : > { %v1766_v56 = vpop.f32.mrf.mxu2 }
 0x2b8   : > { %v2394_v15 = vmax.f32 %v2358_v41, 0.0  ;;  %v1823_v13 = vadd.f32 %v1766_v56, %v1575_v17  ;;  %v1520_v63 = vpop.f32.mrf.mxu1  ;;  %v2024_v14 = vpop.f32.mrf.mxu3 }
 0x2b9   : > { %v1576_v43 = vadd.f32 %v1520_v63, %v3379_v16 }
 0x2ba   : > { %v2264_v59 = vpop.f32.mrf.mxu0  ;;  %v2768_v52 = vpack.c.bf16 %v2394_v15, %v2393_v27  ;;  %v2071_v22 = vadd.f32 %v2014_v45, %v1823_v13 }
 0x2bc   : > { %2814 = vst [vmem:[%s3510_s16 + $0x50] sm:$0xff] %v2768_v52   ;;  %v2319_v12 = vadd.f32 %v2262_v54, %v2071_v22 }
 0x2be   : > { %v2359_v38 = vadd.f32 %v3493_v61, %v2319_v12 }
 0x2bf   : > { %v1768_v49 = vpop.f32.mrf.mxu2 }
 0x2c0   : > { %v1824_v32 = vadd.f32 %v1768_v49, %v1576_v43  ;;  %v1523_v10 = vpop.f32.mrf.mxu1  ;;  %v2395_v45 = vmax.f32 %v2359_v38, 0.0  ;;  %v2026_v3 = vpop.f32.mrf.mxu3 }
 0x2c1   : > { %v1577_v37 = vadd.f32 %v1523_v10, %v3384_v53 }
 0x2c2   : > { %v2267_v60 = vpop.f32.mrf.mxu0  ;;  %v2072_v57 = vadd.f32 %v2016_v29, %v1824_v32 }
 0x2c4   : > { %v2320_v44 = vadd.f32 %v2264_v59, %v2072_v57 }
 0x2c6   : > { %v2360_v11 = vadd.f32 %v3493_v61, %v2320_v44 }
 0x2c7   : > { %v1771_v48 = vpop.f32.mrf.mxu2 }
 0x2c8   : > { %v2396_v26 = vmax.f32 %v2360_v11, 0.0  ;;  %v1825_v46 = vadd.f32 %v1771_v48, %v1577_v37  ;;  %v1525_v16 = vpop.f32.mrf.mxu1 }
 0x2c9   : > { %v1578_v30 = vadd.f32 %v1525_v16, %v3395_v33 }
 0x2ca   : > { %v2269_v19 = vpop.f32.mrf.mxu0  ;;  %v2773_v0 = vpack.c.bf16 %v2396_v26, %v2395_v45  ;;  %v2073_v39 = vadd.f32 %v2019_v5, %v1825_v46  ;;  %v2029_v5 = vpop.f32.mrf.mxu3 }
 0x2cc   : > { %2815 = vst [vmem:[%s3510_s16 + $0x58] sm:$0xff] %v2773_v0   ;;  %v2321_v58 = vadd.f32 %v2267_v60, %v2073_v39 }
 0x2ce   : > { %v2361_v29 = vadd.f32 %v3493_v61, %v2321_v58 }
 0x2cf   : > { %v1773_v31 = vpop.f32.mrf.mxu2 }
 0x2d0   : > { %v1826_v62 = vadd.f32 %v1773_v31, %v1578_v30  ;;  %v1528_v42 = vpop.f32.mrf.mxu1  ;;  %v2397_v36 = vmax.f32 %v2361_v29, 0.0 }
 0x2d1   : > { %v1579_v9 = vadd.f32 %v1528_v42, %v3400_v7 }
 0x2d2   : > { %v2272_v4 = vpop.f32.mrf.mxu0  ;;  %v2074_v53 = vadd.f32 %v2021_v47, %v1826_v62  ;;  %v2031_v59 = vpop.f32.mrf.mxu3 }
 0x2d4   : > { %v2322_v21 = vadd.f32 %v2269_v19, %v2074_v53 }
 0x2d6   : > { %v2362_v28 = vadd.f32 %v3493_v61, %v2322_v21 }
 0x2d7   : > { %v1776_v35 = vpop.f32.mrf.mxu2 }
 0x2d8   : > { %v2398_v24 = vmax.f32 %v2362_v28, 0.0  ;;  %v1827_v2 = vadd.f32 %v1776_v35, %v1579_v9  ;;  %v1530_v33 = vpop.f32.mrf.mxu1 }
 0x2d9   : > { %v1580_v50 = vadd.f32 %v1530_v33, %v3411_v51 }
 0x2da   : > { %v2274_v54 = vpop.f32.mrf.mxu0  ;;  %v2778_v1 = vpack.c.bf16 %v2398_v24, %v2397_v36  ;;  %v2075_v34 = vadd.f32 %v2024_v14, %v1827_v2  ;;  %v2034_v44 = vpop.f32.mrf.mxu3 }
 0x2dc   : > { %2816 = vst [vmem:[%s3510_s16 + $0x60] sm:$0xff] %v2778_v1   ;;  %v2323_v17 = vadd.f32 %v2272_v4, %v2075_v34 }
 0x2de   : > { %v2363_v7 = vadd.f32 %v3493_v61, %v2323_v17 }
 0x2df   : > { %v1778_v41 = vpop.f32.mrf.mxu2 }
 0x2e0   : > { %v1828_v56 = vadd.f32 %v1778_v41, %v1580_v50  ;;  %v1533_v27 = vpop.f32.mrf.mxu1  ;;  %v2399_v43 = vmax.f32 %v2363_v7, 0.0 }
 0x2e1   : > { %v1581_v22 = vadd.f32 %v1533_v27, %v3416_v18 }
 0x2e2   : > { %v2277_v15 = vpop.f32.mrf.mxu0  ;;  %v2076_v13 = vadd.f32 %v2026_v3, %v1828_v56  ;;  %v2036_v31 = vpop.f32.mrf.mxu3 }
 0x2e4   : > { %v2324_v63 = vadd.f32 %v2274_v54, %v2076_v13 }
 0x2e6   : > { %v2364_v52 = vadd.f32 %v3493_v61, %v2324_v63 }
 0x2e7   : > { %v1781_v47 = vpop.f32.mrf.mxu2 }
 0x2e8   : > { %v2400_v49 = vmax.f32 %v2364_v52, 0.0  ;;  %v1829_v12 = vadd.f32 %v1781_v47, %v1581_v22  ;;  %v1535_v51 = vpop.f32.mrf.mxu1 }
 0x2e9   : > { %v1582_v57 = vadd.f32 %v1535_v51, %v3427_v20 }
 0x2ea   : > { %v2279_v32 = vpop.f32.mrf.mxu0  ;;  %v2783_v10 = vpack.c.bf16 %v2400_v49, %v2399_v43  ;;  %v2077_v60 = vadd.f32 %v2029_v5, %v1829_v12  ;;  %v2039_v9 = vpop.f32.mrf.mxu3 }
 0x2ec   : > { %2817 = vst [vmem:[%s3510_s16 + $0x68] sm:$0xff] %v2783_v10   ;;  %v2325_v11 = vadd.f32 %v2277_v15, %v2077_v60 }
 0x2ee   : > { %v2365_v18 = vadd.f32 %v3493_v61, %v2325_v11 }
 0x2ef   : > { %v1783_v38 = vpop.f32.mrf.mxu2 }
 0x2f0   : > { %v1830_v37 = vadd.f32 %v1783_v38, %v1582_v57  ;;  %v1538_v48 = vpop.f32.mrf.mxu1  ;;  %v2401_v0 = vmax.f32 %v2365_v18, 0.0 }
 0x2f1   : > { %v1583_v16 = vadd.f32 %v1538_v48, %v3432_v55 }
 0x2f2   : > { %v2282_v14 = vpop.f32.mrf.mxu0  ;;  %v2078_v45 = vadd.f32 %v2031_v59, %v1830_v37  ;;  %v2041_v41 = vpop.f32.mrf.mxu3 }
 0x2f4   : > { %v2326_v26 = vadd.f32 %v2279_v32, %v2078_v45 }
 0x2f6   : > { %v2366_v46 = vadd.f32 %v3493_v61, %v2326_v26 }
 0x2f7   : > { %v1786_v19 = vpop.f32.mrf.mxu2 }
 0x2f8   : > { %v2402_v39 = vmax.f32 %v2366_v46, 0.0  ;;  %v1831_v30 = vadd.f32 %v1786_v19, %v1583_v16  ;;  %v1540_v20 = vpop.f32.mrf.mxu1 }
 0x2f9   : > { %v1584_v4 = vadd.f32 %v1540_v20, %v3443_v6 }
 0x2fa   : > { %v2788_v58 = vpack.c.bf16 %v2402_v39, %v2401_v0  ;;  %v2284_v62 = vpop.f32.mrf.mxu0  ;;  %v2079_v42 = vadd.f32 %v2034_v44, %v1831_v30  ;;  %v2044_v47 = vpop.f32.mrf.mxu3 }
 0x2fc   : > { %2818 = vst [vmem:[%s3510_s16 + $0x70] sm:$0xff] %v2788_v58   ;;  %v2327_v53 = vadd.f32 %v2282_v14, %v2079_v42 }
 0x2fe   : > { %v2367_v55 = vadd.f32 %v3493_v61, %v2327_v53 }
 0x2ff   : > { %v1788_v3 = vpop.f32.mrf.mxu2 }
 0x300   : > { %v1832_v29 = vadd.f32 %v1788_v3, %v1584_v4  ;;  %v1543_v21 = vpop.f32.mrf.mxu1  ;;  %v2403_v54 = vmax.f32 %v2367_v55, 0.0 }
 0x301   : > { %v1585_v2 = vadd.f32 %v1543_v21, %v3448_v8 }
 0x302   : > { %v2080_v28 = vadd.f32 %v2036_v31, %v1832_v29  ;;  %v2287_v36 = vpop.f32.mrf.mxu0  ;;  %v2046_v37 = vpop.f32.mrf.mxu3 }
 0x304   : > { %v2328_v35 = vadd.f32 %v2284_v62, %v2080_v28 }
 0x306   : > { %v2368_v24 = vadd.f32 %v3493_v61, %v2328_v35 }
 0x307   : > { %v1791_v33 = vpop.f32.mrf.mxu2 }
 0x308   : > { %v2404_v1 = vmax.f32 %v2368_v24, 0.0  ;;  %v1833_v5 = vadd.f32 %v1791_v33, %v1585_v2  ;;  %v1545_v6 = vpop.f32.mrf.mxu1 }
 0x309   : > { %v1586_v17 = vadd.f32 %v1545_v6, %v3459_v23 }
 0x30a   : > { %v2793_v34 = vpack.c.bf16 %v2404_v1, %v2403_v54  ;;  %v2081_v50 = vadd.f32 %v2039_v9, %v1833_v5  ;;  %v2289_v56 = vpop.f32.mrf.mxu0 }
 0x30c   : > { %2819 = vst [vmem:[%s3510_s16 + $0x78] sm:$0xff] %v2793_v34   ;;  %v2329_v15 = vadd.f32 %v2287_v36, %v2081_v50 }
 0x30e   : > { %v2369_v8 = vadd.f32 %v3493_v61, %v2329_v15 }
 0x30f   : > { %v1793_v27 = vpop.f32.mrf.mxu2 }
 0x310   : > { %v1834_v13 = vadd.f32 %v1793_v27, %v1586_v17  ;;  %v1548_v7 = vpop.f32.mrf.mxu1  ;;  %v2405_v49 = vmax.f32 %v2369_v8, 0.0 }
 0x311   : > { %v1587_v22 = vadd.f32 %v1548_v7, %v3466_v25 }
 0x312   : > { %v2082_v63 = vadd.f32 %v2041_v41, %v1834_v13  ;;  %v2292_v23 = vpop.f32.mrf.mxu0 }
 0x314   : > { %v2330_v59 = vadd.f32 %v2289_v56, %v2082_v63 }
 0x316   : > { %v2370_v52 = vadd.f32 %v3493_v61, %v2330_v59 }
 0x317   : > { %v1796_v43 = vpop.f32.mrf.mxu2 }
 0x318   : > { %v2406_v12 = vmax.f32 %v2370_v52, 0.0  ;;  %v1835_v51 = vadd.f32 %v1796_v43, %v1587_v22  ;;  %v1550_v10 = vpop.f32.mrf.mxu1 }
 0x319   : > { %v1588_v57 = vadd.f32 %v1550_v10, %v3479_v40 }
 0x31a   : > { %v2798_v32 = vpack.c.bf16 %v2406_v12, %v2405_v49  ;;  %v2083_v60 = vadd.f32 %v2044_v47, %v1835_v51  ;;  %v2294_v14 = vpop.f32.mrf.mxu0 }
 0x31c   : > { %2820 = vst [vmem:[%s3510_s16 + $0x80] sm:$0xff] %v2798_v32   ;;  %v2331_v44 = vadd.f32 %v2292_v23, %v2083_v60 }
 0x31e   : > { %v2371_v25 = vadd.f32 %v3493_v61, %v2331_v44 }
 0x31f   : > { %v1798_v38 = vpop.f32.mrf.mxu2 }
 0x320   : > { %v1836_v11 = vadd.f32 %v1798_v38, %v1588_v57  ;;  %v2407_v26 = vmax.f32 %v2371_v25, 0.0 }
 0x322   : > { %v2084_v48 = vadd.f32 %v2046_v37, %v1836_v11 }
 0x324   : > { %v2332_v45 = vadd.f32 %v2294_v14, %v2084_v48 }
 0x326   : > { %v2372_v18 = vadd.f32 %v3493_v61, %v2332_v45 }
 0x328   : > { %v2408_v46 = vmax.f32 %v2372_v18, 0.0 }
 0x32a   : > { %v2803_v16 = vpack.c.bf16 %v2408_v46, %v2407_v26 }
 0x32c   : > { %2821 = vst [vmem:[%s3510_s16 + $0x88] sm:$0xff] %v2803_v16  }
 0x32d PF: > { %s13_s12 = sadd.s32 1, %s2842_s12  }
 0x32e   : > { %p10_p4 = scmp.ge.s32.totalorder %s13_s12, 4  }
 0x330   :  { %12 = sbr.rel (!%p10_p4) target bundleno = 1 (0x1), region = 70 }

// kernel: resnet_block_forward.4
= control target key start
LH: loop header
LB: loop body
LE: loop exit
PB: predicated region body
PF: predicated region fallthrough
CT: control target
= control target key end

     0   :  { %s853_s12 = smov 0   ;;  %s979_s0 = inlined_call_operand.vmem [shape: bf16[2,288,4], index: 0, kind: input, shape index: {}]   ;;  %s980_s1 = inlined_call_operand.vmem [shape: bf16[1,4,128], index: 1, kind: input, shape index: {}]   ;;  %s981_s2 = inlined_call_operand.vmem [shape: f32[1,128], index: 2, kind: input, shape index: {}]   ;;  %s982_s3 = inlined_call_operand.vmem [shape: bf16[2,288,128], index: 3, kind: output, shape index: {}]  }
   0x1 LB: > { %s588_s13 = sadd.s32 4294967295, %s831_s12   ;;  %p592_p0 = scmp.ge.s32.totalorder %s831_s12, 1  ;;  %s831_s12 = sphi %s853_s12, %s13_s12  }
   0x2   : > { %p137_p1 = scmp.lt.s32.totalorder %s831_s12, 3 }
   0x4   : > { %p138_p2 = pnand %p592_p0, %p137_p1 }
   0x5   : > { %p161_p3 = scmp.lt.s32.totalorder (!%p138_p2), %s588_s13, 1 }
   0x6   : > { %141 = sbr.rel (%p138_p2) target bundleno = 226 (0xe2), region = 32 }
   0xb   : > { %v208_v0 = vld [vmem:[%s980_s1] sm:$0x3]  ;;  %vm358_vm0 = vcmask 1041408   ;;  %s984_s13 = smov (!%p161_p3, %s588_s13), 1  ;;  %vm303_vm1 = vcmask 31744  }
   0xc   : > { %v360_v1 = vsel %vm358_vm0, %v208_v0, 0  ;;  %s815_s16 = smul.u32 144, %s984_s13  ;;  %v913_v22 = vld [vmem:[%s981_s2] ss:$0 sm:$0xff] }
   0xd   : > { %369 = vmatpush.bf16.msra.mxu0 %v360_v1  ;;  %812 = vmatpush.bf16.msra.mxu1 %v360_v1 }
   0xe   : > { %813 = vmatpush.bf16.msra.mxu2 %v360_v1  ;;  %814 = vmatpush.bf16.msra.mxu3 %v360_v1  ;;  %s872_s19 = scalar_lea.vmem %s979_s0, %s815_s16  ;;  %s924_s24 = scalar_lea.vmem %s982_s3, %s815_s16 }
   0xf   : > { %v687_v2 = vld [vmem:[%s872_s19] sm:$0xff]  ;;  %v692_v3 = vld [vmem:[%s872_s19 + $0x28] sm:$0xff]  ;;  %v697_v4 = vld [vmem:[%s872_s19 + $0x50] sm:$0xff] }
  0x10   : > { %667 = vmatmul.msk.bf16.vlgmr.msra.gmra.mxu0 %vm303_vm1, %v687_v2  ;;  %672 = vmatmul.msk.bf16.vlgmr.msra.gmra.mxu1 %vm303_vm1, %v692_v3  ;;  %v702_v5 = vld [vmem:[%s872_s19 + $0x78] sm:$0xff]  ;;  %v688_v6 = vld [vmem:[%s872_s19 + $0x8] sm:$0xff]  ;;  %v693_v7 = vld [vmem:[%s872_s19 + $0x30] sm:$0xff] }
  0x11   : > { %677 = vmatmul.msk.bf16.vlgmr.msra.gmra.mxu2 %vm303_vm1, %v697_v4  ;;  %682 = vmatmul.msk.bf16.vlgmr.msra.gmra.mxu3 %vm303_vm1, %v702_v5  ;;  %v698_v8 = vld [vmem:[%s872_s19 + $0x58] sm:$0xff]  ;;  %v703_v9 = vld [vmem:[%s872_s19 + $0x80] sm:$0xff]  ;;  %v689_v10 = vld [vmem:[%s872_s19 + $0x10] sm:$0xff] }
  0x12   : > { %v694_v11 = vld [vmem:[%s872_s19 + $0x38] sm:$0xff]  ;;  %v699_v12 = vld [vmem:[%s872_s19 + $0x60] sm:$0xff]  ;;  %v704_v13 = vld [vmem:[%s872_s19 + $0x88] sm:$0xff] }
  0x13   : > { %v690_v14 = vld [vmem:[%s872_s19 + $0x18] sm:$0xff]  ;;  %v695_v15 = vld [vmem:[%s872_s19 + $0x40] sm:$0xff]  ;;  %v700_v16 = vld [vmem:[%s872_s19 + $0x68] sm:$0xff] }
  0x14   : > { %v691_v17 = vld [vmem:[%s872_s19 + $0x20] sm:$0xff]  ;;  %v696_v18 = vld [vmem:[%s872_s19 + $0x48] sm:$0xff]  ;;  %v701_v19 = vld [vmem:[%s872_s19 + $0x70] sm:$0xff] }
  0x20   : > { %668 = vmatmul.msk.bf16.gmra.mxu0 %vm303_vm1, %v688_v6  ;;  %673 = vmatmul.msk.bf16.gmra.mxu1 %vm303_vm1, %v693_v7 }
  0x21   : > { %678 = vmatmul.msk.bf16.gmra.mxu2 %vm303_vm1, %v698_v8  ;;  %683 = vmatmul.msk.bf16.gmra.mxu3 %vm303_vm1, %v703_v9 }
  0x30   : > { %669 = vmatmul.msk.bf16.gmra.mxu0 %vm303_vm1, %v689_v10  ;;  %674 = vmatmul.msk.bf16.gmra.mxu1 %vm303_vm1, %v694_v11 }
  0x31   : > { %679 = vmatmul.msk.bf16.gmra.mxu2 %vm303_vm1, %v699_v12  ;;  %684 = vmatmul.msk.bf16.gmra.mxu3 %vm303_vm1, %v704_v13 }
  0x40   : > { %670 = vmatmul.msk.bf16.gmra.mxu0 %vm303_vm1, %v690_v14  ;;  %675 = vmatmul.msk.bf16.gmra.mxu1 %vm303_vm1, %v695_v15 }
  0x41   : > { %680 = vmatmul.msk.bf16.gmra.mxu2 %vm303_vm1, %v700_v16 }
  0x50   : > { %671 = vmatmul.msk.bf16.gmra.mxu0 %vm303_vm1, %v691_v17  ;;  %676 = vmatmul.msk.bf16.gmra.mxu1 %vm303_vm1, %v696_v18 }
  0x51   : > { %681 = vmatmul.msk.bf16.gmra.mxu2 %vm303_vm1, %v701_v19 }
  0x8d   : > { %v371_v20 = vpop.f32.mrf.mxu0  ;;  %v396_v21 = vpop.f32.mrf.mxu1 }
  0x8e   : > { %v372_v26 = vadd.f32 %v913_v22, %v371_v20  ;;  %v397_v27 = vadd.f32 %v913_v22, %v396_v21 }
  0x94   : > { %v421_v23 = vpop.f32.mrf.mxu2  ;;  %v446_v30 = vpop.f32.mrf.mxu3 }
  0x95   : > { %v373_v24 = vpop.f32.mrf.mxu0  ;;  %v398_v25 = vpop.f32.mrf.mxu1  ;;  %v422_v34 = vadd.f32 %v913_v22, %v421_v23  ;;  %v447_v38 = vadd.f32 %v913_v22, %v446_v30 }
  0x96   : > { %v374_v28 = vadd.f32 %v913_v22, %v373_v24  ;;  %v399_v29 = vadd.f32 %v913_v22, %v398_v25 }
  0x98   : > { %v708_v31 = vpack.c.bf16 %v374_v28, %v372_v26  ;;  %v733_v32 = vpack.c.bf16 %v399_v29, %v397_v27 }
  0x9a   : > { %709 = vst [vmem:[%s924_s24] sm:$0xff] %v708_v31  }
  0x9b   : > { %799 = vst [vmem:[%s924_s24 + $0x28] sm:$0xff] %v733_v32  }
  0x9c   : > { %v423_v33 = vpop.f32.mrf.mxu2  ;;  %v448_v39 = vpop.f32.mrf.mxu3 }
  0x9d   : > { %v424_v35 = vadd.f32 %v913_v22, %v423_v33  ;;  %v376_v36 = vpop.f32.mrf.mxu0  ;;  %v401_v37 = vpop.f32.mrf.mxu1  ;;  %v449_v41 = vadd.f32 %v913_v22, %v448_v39 }
  0x9e   : > { %v377_v46 = vadd.f32 %v913_v22, %v376_v36  ;;  %v402_v47 = vadd.f32 %v913_v22, %v401_v37 }
  0x9f   : > { %v758_v40 = vpack.c.bf16 %v424_v35, %v422_v34  ;;  %v783_v42 = vpack.c.bf16 %v449_v41, %v447_v38 }
  0xa1   : > { %804 = vst [vmem:[%s924_s24 + $0x50] sm:$0xff] %v758_v40  }
  0xa2   : > { %809 = vst [vmem:[%s924_s24 + $0x78] sm:$0xff] %v783_v42  }
  0xa4   : > { %v426_v43 = vpop.f32.mrf.mxu2  ;;  %v451_v50 = vpop.f32.mrf.mxu3 }
  0xa5   : > { %v378_v44 = vpop.f32.mrf.mxu0  ;;  %v403_v45 = vpop.f32.mrf.mxu1  ;;  %v427_v54 = vadd.f32 %v913_v22, %v426_v43  ;;  %v452_v58 = vadd.f32 %v913_v22, %v451_v50 }
  0xa6   : > { %v379_v48 = vadd.f32 %v913_v22, %v378_v44  ;;  %v404_v49 = vadd.f32 %v913_v22, %v403_v45 }
  0xa8   : > { %v713_v51 = vpack.c.bf16 %v379_v48, %v377_v46  ;;  %v738_v52 = vpack.c.bf16 %v404_v49, %v402_v47 }
  0xaa   : > { %795 = vst [vmem:[%s924_s24 + $0x8] sm:$0xff] %v713_v51  }
  0xab   : > { %800 = vst [vmem:[%s924_s24 + $0x30] sm:$0xff] %v738_v52  }
  0xac   : > { %v428_v53 = vpop.f32.mrf.mxu2  ;;  %v453_v59 = vpop.f32.mrf.mxu3 }
  0xad   : > { %v429_v55 = vadd.f32 %v913_v22, %v428_v53  ;;  %v381_v56 = vpop.f32.mrf.mxu0  ;;  %v406_v57 = vpop.f32.mrf.mxu1  ;;  %v454_v61 = vadd.f32 %v913_v22, %v453_v59 }
  0xae   : > { %v382_v2 = vadd.f32 %v913_v22, %v381_v56  ;;  %v407_v3 = vadd.f32 %v913_v22, %v406_v57 }
  0xaf   : > { %v763_v60 = vpack.c.bf16 %v429_v55, %v427_v54  ;;  %v788_v62 = vpack.c.bf16 %v454_v61, %v452_v58 }
  0xb1   : > { %805 = vst [vmem:[%s924_s24 + $0x58] sm:$0xff] %v763_v60  }
  0xb2   : > { %810 = vst [vmem:[%s924_s24 + $0x80] sm:$0xff] %v788_v62  }
  0xb4   : > { %v431_v63 = vpop.f32.mrf.mxu2  ;;  %v456_v6 = vpop.f32.mrf.mxu3 }
  0xb5   : > { %v383_v0 = vpop.f32.mrf.mxu0  ;;  %v408_v1 = vpop.f32.mrf.mxu1  ;;  %v432_v10 = vadd.f32 %v913_v22, %v431_v63  ;;  %v457_v14 = vadd.f32 %v913_v22, %v456_v6 }
  0xb6   : > { %v384_v4 = vadd.f32 %v913_v22, %v383_v0  ;;  %v409_v5 = vadd.f32 %v913_v22, %v408_v1 }
  0xb8   : > { %v718_v7 = vpack.c.bf16 %v384_v4, %v382_v2  ;;  %v743_v8 = vpack.c.bf16 %v409_v5, %v407_v3 }
  0xba   : > { %796 = vst [vmem:[%s924_s24 + $0x10] sm:$0xff] %v718_v7  }
  0xbb   : > { %801 = vst [vmem:[%s924_s24 + $0x38] sm:$0xff] %v743_v8  }
  0xbc   : > { %v433_v9 = vpop.f32.mrf.mxu2  ;;  %v458_v15 = vpop.f32.mrf.mxu3 }
  0xbd   : > { %v434_v11 = vadd.f32 %v913_v22, %v433_v9  ;;  %v386_v12 = vpop.f32.mrf.mxu0  ;;  %v411_v13 = vpop.f32.mrf.mxu1  ;;  %v459_v17 = vadd.f32 %v913_v22, %v458_v15 }
  0xbe   : > { %v387_v23 = vadd.f32 %v913_v22, %v386_v12  ;;  %v412_v24 = vadd.f32 %v913_v22, %v411_v13 }
  0xbf   : > { %v768_v16 = vpack.c.bf16 %v434_v11, %v432_v10  ;;  %v793_v18 = vpack.c.bf16 %v459_v17, %v457_v14 }
  0xc1   : > { %806 = vst [vmem:[%s924_s24 + $0x60] sm:$0xff] %v768_v16  }
  0xc2   : > { %811 = vst [vmem:[%s924_s24 + $0x88] sm:$0xff] %v793_v18  }
  0xc4   : > { %v436_v19 = vpop.f32.mrf.mxu2 }
  0xc5   : > { %v388_v20 = vpop.f32.mrf.mxu0  ;;  %v413_v21 = vpop.f32.mrf.mxu1  ;;  %v437_v30 = vadd.f32 %v913_v22, %v436_v19 }
  0xc6   : > { %v389_v25 = vadd.f32 %v913_v22, %v388_v20  ;;  %v414_v26 = vadd.f32 %v913_v22, %v413_v21 }
  0xc8   : > { %v723_v27 = vpack.c.bf16 %v389_v25, %v387_v23  ;;  %v748_v28 = vpack.c.bf16 %v414_v26, %v412_v24 }
  0xca   : > { %797 = vst [vmem:[%s924_s24 + $0x18] sm:$0xff] %v723_v27  }
  0xcb   : > { %802 = vst [vmem:[%s924_s24 + $0x40] sm:$0xff] %v748_v28  }
  0xcc   : > { %v438_v29 = vpop.f32.mrf.mxu2 }
  0xcd   : > { %v439_v31 = vadd.f32 %v913_v22, %v438_v29  ;;  %v391_v32 = vpop.f32.mrf.mxu0  ;;  %v416_v33 = vpop.f32.mrf.mxu1 }
  0xce   : > { %v392_v38 = vadd.f32 %v913_v22, %v391_v32  ;;  %v417_v39 = vadd.f32 %v913_v22, %v416_v33 }
  0xcf   : > { %v773_v34 = vpack.c.bf16 %v439_v31, %v437_v30 }
  0xd1   : > { %807 = vst [vmem:[%s924_s24 + $0x68] sm:$0xff] %v773_v34  }
  0xd4   : > { %v441_v35 = vpop.f32.mrf.mxu2 }
  0xd5   : > { %v393_v36 = vpop.f32.mrf.mxu0  ;;  %v418_v37 = vpop.f32.mrf.mxu1  ;;  %v442_v45 = vadd.f32 %v913_v22, %v441_v35 }
  0xd6   : > { %v394_v40 = vadd.f32 %v913_v22, %v393_v36  ;;  %v419_v41 = vadd.f32 %v913_v22, %v418_v37 }
  0xd8   : > { %v728_v42 = vpack.c.bf16 %v394_v40, %v392_v38  ;;  %v753_v43 = vpack.c.bf16 %v419_v41, %v417_v39 }
  0xda   : > { %798 = vst [vmem:[%s924_s24 + $0x20] sm:$0xff] %v728_v42  }
  0xdb   : > { %803 = vst [vmem:[%s924_s24 + $0x48] sm:$0xff] %v753_v43  }
  0xdc   : > { %v443_v44 = vpop.f32.mrf.mxu2 }
  0xdd   : > { %v444_v46 = vadd.f32 %v913_v22, %v443_v44 }
  0xdf   : > { %v778_v47 = vpack.c.bf16 %v444_v46, %v442_v45 }
  0xe1   : > { %808 = vst [vmem:[%s924_s24 + $0x70] sm:$0xff] %v778_v47  }
  0xe2 PF: > { %s13_s12 = sadd.s32 1, %s831_s12  }
  0xe3   : > { %p10_p4 = scmp.ge.s32.totalorder %s13_s12, 4  }
  0xe5   :  { %12 = sbr.rel (!%p10_p4) target bundleno = 1 (0x1), region = 62 }

// kernel: resnet_block_forward.5
= control target key start
LH: loop header
LB: loop body
LE: loop exit
PB: predicated region body
PF: predicated region fallthrough
CT: control target
= control target key end

     0   :  { %s3127_s15 = smov 0   ;;  %s4010_s0 = inlined_call_operand.vmem [shape: f32[2,342,8], index: 0, kind: input, shape index: {}]   ;;  %s4011_s1 = inlined_call_operand.vmem [shape: bf16[9,8,128], index: 1, kind: input, shape index: {}]   ;;  %s4012_s2 = inlined_call_operand.vmem [shape: f32[1,128], index: 2, kind: input, shape index: {}]   ;;  %s4013_s3 = inlined_call_operand.vmem [shape: bf16[2,288,128], index: 3, kind: input, shape index: {}]   ;;  %s4014_s4 = inlined_call_operand.vmem [shape: bf16[2,288,128], index: 4, kind: output, shape index: {}]  }
   0x1 LB: > { %s2703_s16 = sadd.s32 4294967295, %s3100_s15   ;;  %p2707_p0 = scmp.ge.s32.totalorder %s3100_s15, 1  ;;  %s3100_s15 = sphi %s3127_s15, %s14_s15  }
   0x2   : > { %p172_p1 = scmp.lt.s32.totalorder %s3100_s15, 3 }
   0x4   : > { %p173_p2 = pnand %p2707_p0, %p172_p1 }
   0x5   : > { %p203_p3 = scmp.lt.s32.totalorder (!%p173_p2), %s2703_s16, 1 }
   0x6   : > { %176 = sbr.rel (%p173_p2) target bundleno = 815 (0x32f), region = 36 }
   0xb   : > { %v2711_v0 = vld [vmem:[%s4011_s1 + $0x4] sm:$0xf]  ;;  %vm385_vm0 = vcmask 1043456   ;;  %v2748_v2 = vld [vmem:[%s4011_s1 + $0x8] sm:$0xf]  ;;  %s4016_s16 = smov (!%p203_p3, %s2703_s16), 1 }
   0xc   : > { %v387_v1 = vsel %vm385_vm0, %v2711_v0, 0  ;;  %v273_v3 = vld [vmem:[%s4011_s1] sm:$0xf]  ;;  %v755_v4 = vsel %vm385_vm0, %v2748_v2, 0  ;;  %v2786_v6 = vld [vmem:[%s4011_s1 + $0x10] sm:$0xf] }
   0xd   : > { %3079 = vmatpush.bf16.msra.mxu1 %v387_v1  ;;  %3080 = vmatpush.bf16.msra.mxu2 %v387_v1  ;;  %v543_v5 = vsel %vm385_vm0, %v273_v3, 0  ;;  %v1251_v7 = vsel %vm385_vm0, %v2786_v6, 0  ;;  %s3082_s25 = smul.u32 344, %s4016_s16  ;;  %vm330_vm1 = vcmask 64512   ;;  %v2767_v20 = vld [vmem:[%s4011_s1 + $0xc] sm:$0xf] }
   0xe   : > { %396 = vmatpush.bf16.msra.mxu0 %v387_v1  ;;  %3081 = vmatpush.bf16.msra.mxu3 %v387_v1  ;;  %v1003_v21 = vsel %vm385_vm0, %v2767_v20, 0  ;;  %v2824_v58 = vld [vmem:[%s4011_s1 + $0x18] sm:$0xf]  ;;  %v2843_v59 = vld [vmem:[%s4011_s1 + $0x1c] sm:$0xf]  ;;  %s3083_s13 = smul.u32 144, %s4016_s16 }
   0xf   : > { %s3157_s28 = scalar_lea.vmem %s4010_s0, %s3082_s25  ;;  %v2805_v60 = vld [vmem:[%s4011_s1 + $0x14] sm:$0xf]  ;;  %v1747_v61 = vsel %vm385_vm0, %v2824_v58, 0  ;;  %v1995_v62 = vsel %vm385_vm0, %v2843_v59, 0  ;;  %v2862_v0 = vld [vmem:[%s4011_s1 + $0x20] sm:$0xf] }
  0x10   : > { %v284_v8 = vld [vmem:[%s3157_s28 + $0x51] sm:$0xff]  ;;  %v285_v9 = vld [vmem:[%s3157_s28 + $0x59] sm:$0xff]  ;;  %v294_v10 = vld [vmem:[%s3157_s28 + $0xa1] sm:$0xff]  ;;  %v1499_v63 = vsel %vm385_vm0, %v2805_v60, 0  ;;  %v2243_v1 = vsel %vm385_vm0, %v2862_v0, 0  ;;  %s3756_s18 = scalar_lea.vmem %s4013_s3, %s3083_s13  ;;  %s3789_s23 = scalar_lea.vmem %s4014_s4, %s3083_s13 }
  0x11   : > { %764 = vmatpush.bf16.msrb.mxu2 %v755_v4  ;;  %552 = vmatpush.bf16.msrb.mxu1 %v543_v5  ;;  %v315_v11 = vpack.c.bf16 %v285_v9, %v284_v8  ;;  %v295_v12 = vld [vmem:[%s3157_s28 + $0xa9] sm:$0xff]  ;;  %v274_v13 = vld [vmem:[%s3157_s28 + $0x1] sm:$0xff]  ;;  %v304_v17 = vld [vmem:[%s3157_s28 + $0xf1] sm:$0xff] }
  0x12   : > { %1260 = vmatpush.bf16.msrb.mxu0 %v1251_v7  ;;  %v275_v14 = vld [vmem:[%s3157_s28 + $0x9] sm:$0xff]  ;;  %v320_v15 = vpack.c.bf16 %v295_v12, %v294_v10  ;;  %v305_v18 = vld [vmem:[%s3157_s28 + $0xf9] sm:$0xff]  ;;  %1012 = vmatpush.bf16.msrb.mxu3 %v1003_v21  ;;  %v286_v22 = vld [vmem:[%s3157_s28 + $0x61] sm:$0xff] }
  0x13   : > { %v310_v16 = vpack.c.bf16 %v275_v14, %v274_v13  ;;  %2717 = vmatmul.msk.bf16.vlgmr.msra.gmra.mxu1 %vm330_vm1, %v315_v11  ;;  %v325_v19 = vpack.c.bf16 %v305_v18, %v304_v17  ;;  %v287_v23 = vld [vmem:[%s3157_s28 + $0x69] sm:$0xff]  ;;  %v296_v24 = vld [vmem:[%s3157_s28 + $0xb1] sm:$0xff]  ;;  %v297_v25 = vld [vmem:[%s3157_s28 + $0xb9] sm:$0xff] }
  0x14   : > { %2722 = vmatmul.msk.bf16.vlgmr.msra.gmra.mxu2 %vm330_vm1, %v320_v15  ;;  %v276_v26 = vld [vmem:[%s3157_s28 + $0x11] sm:$0xff]  ;;  %v277_v27 = vld [vmem:[%s3157_s28 + $0x19] sm:$0xff]  ;;  %v316_v28 = vpack.c.bf16 %v287_v23, %v286_v22  ;;  %v321_v29 = vpack.c.bf16 %v297_v25, %v296_v24  ;;  %v306_v31 = vld [vmem:[%s3157_s28 + $0x101] sm:$0xff] }
  0x15   : > { %2712 = vmatmul.msk.bf16.vlgmr.msra.gmra.mxu0 %vm330_vm1, %v310_v16  ;;  %2727 = vmatmul.msk.bf16.vlgmr.msra.gmra.mxu3 %vm330_vm1, %v325_v19  ;;  %v311_v30 = vpack.c.bf16 %v277_v27, %v276_v26  ;;  %v307_v32 = vld [vmem:[%s3157_s28 + $0x109] sm:$0xff]  ;;  %v288_v34 = vld [vmem:[%s3157_s28 + $0x71] sm:$0xff]  ;;  %v289_v35 = vld [vmem:[%s3157_s28 + $0x79] sm:$0xff] }
  0x16   : > { %v326_v33 = vpack.c.bf16 %v307_v32, %v306_v31  ;;  %v298_v36 = vld [vmem:[%s3157_s28 + $0xc1] sm:$0xff]  ;;  %v299_v37 = vld [vmem:[%s3157_s28 + $0xc9] sm:$0xff]  ;;  %v317_v40 = vpack.c.bf16 %v289_v35, %v288_v34  ;;  %v308_v43 = vld [vmem:[%s3157_s28 + $0x111] sm:$0xff]  ;;  %1756 = vmatpush.bf16.msra.mxu2 %v1747_v61  ;;  %2004 = vmatpush.bf16.msra.mxu3 %v1995_v62 }
  0x17   : > { %v278_v38 = vld [vmem:[%s3157_s28 + $0x21] sm:$0xff]  ;;  %v279_v39 = vld [vmem:[%s3157_s28 + $0x29] sm:$0xff]  ;;  %v322_v41 = vpack.c.bf16 %v299_v37, %v298_v36  ;;  %v309_v44 = vld [vmem:[%s3157_s28 + $0x119] sm:$0xff]  ;;  %1508 = vmatpush.bf16.msra.mxu1 %v1499_v63  ;;  %2252 = vmatpush.bf16.msra.mxu0 %v2243_v1 }
  0x18   : > { %v312_v42 = vpack.c.bf16 %v279_v39, %v278_v38  ;;  %v327_v45 = vpack.c.bf16 %v309_v44, %v308_v43  ;;  %v290_v46 = vld [vmem:[%s3157_s28 + $0x81] sm:$0xff]  ;;  %v291_v47 = vld [vmem:[%s3157_s28 + $0x89] sm:$0xff]  ;;  %v300_v48 = vld [vmem:[%s3157_s28 + $0xd1] sm:$0xff] }
  0x19   : > { %v301_v49 = vld [vmem:[%s3157_s28 + $0xd9] sm:$0xff]  ;;  %v280_v50 = vld [vmem:[%s3157_s28 + $0x31] sm:$0xff]  ;;  %v318_v52 = vpack.c.bf16 %v291_v47, %v290_v46  ;;  %v302_v4 = vld [vmem:[%s3157_s28 + $0xe1] sm:$0xff] }
  0x1a   : > { %v281_v51 = vld [vmem:[%s3157_s28 + $0x39] sm:$0xff]  ;;  %v323_v53 = vpack.c.bf16 %v301_v49, %v300_v48  ;;  %v292_v2 = vld [vmem:[%s3157_s28 + $0x91] sm:$0xff]  ;;  %v303_v5 = vld [vmem:[%s3157_s28 + $0xe9] sm:$0xff] }
  0x1b   : > { %v313_v54 = vpack.c.bf16 %v281_v51, %v280_v50  ;;  %v892_v55 = vld [vmem:[%s3157_s28 + $0x12] sm:$0xff]  ;;  %v893_v56 = vld [vmem:[%s3157_s28 + $0x1a] sm:$0xff]  ;;  %v283_v7 = vld [vmem:[%s3157_s28 + $0x49] sm:$0xff]  ;;  %v324_v9 = vpack.c.bf16 %v303_v5, %v302_v4 }
  0x1c   : > { %v928_v57 = vpack.c.bf16 %v893_v56, %v892_v55  ;;  %v293_v3 = vld [vmem:[%s3157_s28 + $0x99] sm:$0xff]  ;;  %v282_v6 = vld [vmem:[%s3157_s28 + $0x41] sm:$0xff]  ;;  %v895_v12 = vld [vmem:[%s3157_s28 + $0x2a] sm:$0xff] }
  0x1d   : > { %v319_v8 = vpack.c.bf16 %v293_v3, %v292_v2  ;;  %v314_v10 = vpack.c.bf16 %v283_v7, %v282_v6  ;;  %v894_v11 = vld [vmem:[%s3157_s28 + $0x22] sm:$0xff]  ;;  %v645_v17 = vld [vmem:[%s3157_s28 + $0xa] sm:$0xff]  ;;  %v1140_v18 = vld [vmem:[%s3157_s28 + $0x13] sm:$0xff] }
  0x1e   : > { %v929_v13 = vpack.c.bf16 %v895_v12, %v894_v11  ;;  %v219_v14 = vld [vmem:[%s3157_s28] sm:$0xff]  ;;  %v220_v15 = vld [vmem:[%s3157_s28 + $0x8] sm:$0xff]  ;;  %v896_v23 = vld [vmem:[%s3157_s28 + $0x32] sm:$0xff] }
  0x1f   : > { %v644_v16 = vld [vmem:[%s3157_s28 + $0x2] sm:$0xff]  ;;  %v255_v20 = vpack.c.bf16 %v220_v15, %v219_v14  ;;  %v897_v24 = vld [vmem:[%s3157_s28 + $0x3a] sm:$0xff]  ;;  %v221_v26 = vld [vmem:[%s3157_s28 + $0x10] sm:$0xff] }
  0x20   : > { %v1141_v19 = vld [vmem:[%s3157_s28 + $0x1b] sm:$0xff]  ;;  %v680_v21 = vpack.c.bf16 %v645_v17, %v644_v16  ;;  %v930_v25 = vpack.c.bf16 %v897_v24, %v896_v23  ;;  %v224_v36 = vld [vmem:[%s3157_s28 + $0x28] sm:$0xff]  ;;  %v1144_v37 = vld [vmem:[%s3157_s28 + $0x33] sm:$0xff] }
  0x21   : > { %v1176_v22 = vpack.c.bf16 %v1141_v19, %v1140_v18  ;;  %v222_v27 = vld [vmem:[%s3157_s28 + $0x18] sm:$0xff]  ;;  %v898_v32 = vld [vmem:[%s3157_s28 + $0x42] sm:$0xff]  ;;  %v225_v44 = vld [vmem:[%s3157_s28 + $0x30] sm:$0xff] }
  0x22   : > { %v223_v35 = vld [vmem:[%s3157_s28 + $0x20] sm:$0xff]  ;;  %v1147_v47 = vld [vmem:[%s3157_s28 + $0x4b] sm:$0xff]  ;;  %v1148_v61 = vld [vmem:[%s3157_s28 + $0x53] sm:$0xff] }
  0x23   : > { %2718 = vmatmul.msk.bf16.gmra.mxu1 %vm330_vm1, %v316_v28  ;;  %v1142_v28 = vld [vmem:[%s3157_s28 + $0x23] sm:$0xff]  ;;  %v1145_v38 = vld [vmem:[%s3157_s28 + $0x3b] sm:$0xff]  ;;  %v257_v39 = vpack.c.bf16 %v224_v36, %v223_v35  ;;  %v904_v3 = vld [vmem:[%s3157_s28 + $0x72] sm:$0xff] }
  0x24   : > { %2723 = vmatmul.msk.bf16.gmra.mxu2 %vm330_vm1, %v321_v29  ;;  %v1143_v29 = vld [vmem:[%s3157_s28 + $0x2b] sm:$0xff]  ;;  %v1146_v46 = vld [vmem:[%s3157_s28 + $0x43] sm:$0xff]  ;;  %v1149_v62 = vld [vmem:[%s3157_s28 + $0x5b] sm:$0xff] }
  0x25   : > { %2713 = vmatmul.msk.bf16.gmra.mxu0 %vm330_vm1, %v311_v30  ;;  %2728 = vmatmul.msk.bf16.gmra.mxu3 %vm330_vm1, %v326_v33  ;;  %v256_v30 = vpack.c.bf16 %v222_v27, %v221_v26  ;;  %v1177_v31 = vpack.c.bf16 %v1143_v29, %v1142_v28  ;;  %v899_v33 = vld [vmem:[%s3157_s28 + $0x4a] sm:$0xff]  ;;  %v1179_v50 = vpack.c.bf16 %v1147_v47, %v1146_v46  ;;  %v902_v51 = vld [vmem:[%s3157_s28 + $0x62] sm:$0xff]  ;;  %v905_v4 = vld [vmem:[%s3157_s28 + $0x7a] sm:$0xff] }
  0x26   : > { %v931_v34 = vpack.c.bf16 %v899_v33, %v898_v32  ;;  %v227_v59 = vld [vmem:[%s3157_s28 + $0x40] sm:$0xff]  ;;  %v228_v60 = vld [vmem:[%s3157_s28 + $0x48] sm:$0xff]  ;;  %v1180_v2 = vpack.c.bf16 %v1149_v62, %v1148_v61  ;;  %v3311_v7 = vpack.c.bf16 %v905_v4, %v904_v3  ;;  %v229_v12 = vld [vmem:[%s3157_s28 + $0x50] sm:$0xff] }
  0x27   : > { %v259_v0 = vpack.c.bf16 %v228_v60, %v227_v59  ;;  %v1150_v14 = vld [vmem:[%s3157_s28 + $0x63] sm:$0xff]  ;;  %v1151_v15 = vld [vmem:[%s3157_s28 + $0x6b] sm:$0xff]  ;;  %v1153_v32 = vld [vmem:[%s3157_s28 + $0x7b] sm:$0xff] }
  0x28   : > { %v1181_v19 = vpack.c.bf16 %v1151_v15, %v1150_v14  ;;  %v231_v29 = vld [vmem:[%s3157_s28 + $0x60] sm:$0xff]  ;;  %v233_v46 = vld [vmem:[%s3157_s28 + $0x70] sm:$0xff]  ;;  %v234_v47 = vld [vmem:[%s3157_s28 + $0x78] sm:$0xff] }
  0x29   : > { %v910_v60 = vld [vmem:[%s3157_s28 + $0xa2] sm:$0xff]  ;;  %v911_v61 = vld [vmem:[%s3157_s28 + $0xaa] sm:$0xff] }
  0x2a   : > { %v235_v14 = vld [vmem:[%s3157_s28 + $0x80] sm:$0xff]  ;;  %v236_v15 = vld [vmem:[%s3157_s28 + $0x88] sm:$0xff] }
  0x33   : > { %2719 = vmatmul.msk.bf16.gmra.mxu1 %vm330_vm1, %v317_v40  ;;  %v1178_v40 = vpack.c.bf16 %v1145_v38, %v1144_v37  ;;  %v908_v37 = vld [vmem:[%s3157_s28 + $0x92] sm:$0xff]  ;;  %v909_v38 = vld [vmem:[%s3157_s28 + $0x9a] sm:$0xff] }
  0x34   : > { %2724 = vmatmul.msk.bf16.gmra.mxu2 %vm330_vm1, %v322_v41  ;;  %v900_v41 = vld [vmem:[%s3157_s28 + $0x52] sm:$0xff] }
  0x35   : > { %2714 = vmatmul.msk.bf16.gmra.mxu0 %vm330_vm1, %v312_v42  ;;  %2729 = vmatmul.msk.bf16.gmra.mxu3 %vm330_vm1, %v327_v45  ;;  %v901_v42 = vld [vmem:[%s3157_s28 + $0x5a] sm:$0xff] }
  0x36   : > { %v932_v43 = vpack.c.bf16 %v901_v42, %v900_v41  ;;  %v226_v45 = vld [vmem:[%s3157_s28 + $0x38] sm:$0xff]  ;;  %v3369_v41 = vpack.c.bf16 %v909_v38, %v908_v37 }
  0x37   : > { %v258_v48 = vpack.c.bf16 %v226_v45, %v225_v44 }
  0x43   : > { %2720 = vmatmul.msk.bf16.gmra.mxu1 %vm330_vm1, %v318_v52  ;;  %v903_v52 = vld [vmem:[%s3157_s28 + $0x6a] sm:$0xff] }
  0x44   : > { %2725 = vmatmul.msk.bf16.gmra.mxu2 %vm330_vm1, %v323_v53 }
  0x45   : > { %2715 = vmatmul.msk.bf16.gmra.mxu0 %vm330_vm1, %v313_v54  ;;  %2768 = vmatmul.msk.bf16.vlgmr.msrb.gmra.mxu3 %vm330_vm1, %v928_v57  ;;  %v3282_v54 = vpack.c.bf16 %v903_v52, %v902_v51  ;;  %v262_v52 = vpack.c.bf16 %v234_v47, %v233_v46 }
  0x53   : > { %2721 = vmatmul.msk.bf16.gmra.mxu1 %vm330_vm1, %v319_v8 }
  0x54   : > { %2726 = vmatmul.msk.bf16.gmra.mxu2 %vm330_vm1, %v324_v9 }
  0x55   : > { %2716 = vmatmul.msk.bf16.gmra.mxu0 %vm330_vm1, %v314_v10  ;;  %2769 = vmatmul.msk.bf16.gmra.mxu3 %vm330_vm1, %v929_v13 }
  0x63   : > { %2730 = vmatmul.msk.bf16.vlgmr.msrb.gmra.mxu1 %vm330_vm1, %v255_v20  ;;  %v906_v20 = vld [vmem:[%s3157_s28 + $0x82] sm:$0xff] }
  0x64   : > { %2749 = vmatmul.msk.bf16.vlgmr.msrb.gmra.mxu2 %vm330_vm1, %v680_v21  ;;  %v907_v21 = vld [vmem:[%s3157_s28 + $0x8a] sm:$0xff] }
  0x65   : > { %2787 = vmatmul.msk.bf16.vlgmr.msrb.gmra.mxu0 %vm330_vm1, %v1176_v22  ;;  %2770 = vmatmul.msk.bf16.gmra.mxu3 %vm330_vm1, %v930_v25  ;;  %v3340_v24 = vpack.c.bf16 %v907_v21, %v906_v20 }
  0x73   : > { %2731 = vmatmul.msk.bf16.gmra.mxu1 %vm330_vm1, %v256_v30  ;;  %v232_v30 = vld [vmem:[%s3157_s28 + $0x68] sm:$0xff] }
  0x74   : > { %2750 = vmatmul.msk.bf16.gmra.mxu2 %vm330_vm1, %v928_v57 }
  0x75   : > { %2788 = vmatmul.msk.bf16.gmra.mxu0 %vm330_vm1, %v1177_v31  ;;  %2771 = vmatmul.msk.bf16.gmra.mxu3 %vm330_vm1, %v931_v34  ;;  %v1152_v31 = vld [vmem:[%s3157_s28 + $0x73] sm:$0xff] }
  0x76   : > { %v1182_v36 = vpack.c.bf16 %v1153_v32, %v1152_v31  ;;  %v913_v31 = vld [vmem:[%s3157_s28 + $0xba] sm:$0xff] }
  0x83   : > { %2732 = vmatmul.msk.bf16.gmra.mxu1 %vm330_vm1, %v257_v39 }
  0x84   : > { %2751 = vmatmul.msk.bf16.gmra.mxu2 %vm330_vm1, %v929_v13  ;;  %v230_v13 = vld [vmem:[%s3157_s28 + $0x58] sm:$0xff] }
  0x85   : > { %2789 = vmatmul.msk.bf16.gmra.mxu0 %vm330_vm1, %v1178_v40  ;;  %2772 = vmatmul.msk.bf16.gmra.mxu3 %vm330_vm1, %v932_v43  ;;  %v260_v17 = vpack.c.bf16 %v230_v13, %v229_v12 }
  0x90   : > { %v3275_v49 = vpop.f32.mrf.mxu1 }
  0x92   : > { %v3279_v53 = vpop.f32.mrf.mxu0 }
  0x93   : > { %2733 = vmatmul.msk.bf16.gmra.mxu1 %vm330_vm1, %v258_v48  ;;  %v1154_v48 = vld [vmem:[%s3157_s28 + $0x83] sm:$0xff] }
  0x94   : > { %2752 = vmatmul.msk.bf16.gmra.mxu2 %vm330_vm1, %v930_v25 }
  0x95   : > { %2790 = vmatmul.msk.bf16.gmra.mxu0 %vm330_vm1, %v1179_v50  ;;  %2773 = vmatmul.msk.bf16.gmra.mxu3 %vm330_vm1, %v3282_v54  ;;  %v1155_v50 = vld [vmem:[%s3157_s28 + $0x8b] sm:$0xff] }
  0x96   : > { %v1183_v59 = vpack.c.bf16 %v1155_v50, %v1154_v48 }
  0x97   : > { %v3286_v55 = vpop.f32.mrf.mxu2 }
  0x98   : > { %v3290_v56 = vpop.f32.mrf.mxu1  ;;  %v3294_v58 = vpop.f32.mrf.mxu3 }
  0x9a   : > { %v3292_v57 = vpop.f32.mrf.mxu0 }
  0x9f   : > { %v3300_v63 = vpop.f32.mrf.mxu2 }
  0xa0   : > { %v3302_v1 = vpop.f32.mrf.mxu1  ;;  %v3308_v6 = vpop.f32.mrf.mxu3 }
  0xa2   : > { %v3306_v5 = vpop.f32.mrf.mxu0 }
  0xa3   : > { %2734 = vmatmul.msk.bf16.gmra.mxu1 %vm330_vm1, %v259_v0 }
  0xa4   : > { %2753 = vmatmul.msk.bf16.gmra.mxu2 %vm330_vm1, %v931_v34  ;;  %v261_v34 = vpack.c.bf16 %v232_v30, %v231_v29  ;;  %v912_v30 = vld [vmem:[%s3157_s28 + $0xb2] sm:$0xff] }
  0xa5   : > { %2791 = vmatmul.msk.bf16.gmra.mxu0 %vm330_vm1, %v1180_v2  ;;  %2774 = vmatmul.msk.bf16.gmra.mxu3 %vm330_vm1, %v3311_v7  ;;  %v3395_v2 = vpack.c.bf16 %v911_v61, %v910_v60  ;;  %v238_v60 = vld [vmem:[%s3157_s28 + $0x98] sm:$0xff] }
  0xa7   : > { %v3315_v8 = vpop.f32.mrf.mxu2 }
  0xa8   : > { %v3319_v9 = vpop.f32.mrf.mxu1  ;;  %v3323_v11 = vpop.f32.mrf.mxu3 }
  0xaa   : > { %v3321_v10 = vpop.f32.mrf.mxu0 }
  0xaf   : > { %v3329_v16 = vpop.f32.mrf.mxu2 }
  0xb0   : > { %v3331_v18 = vpop.f32.mrf.mxu1  ;;  %v3337_v23 = vpop.f32.mrf.mxu3 }
  0xb2   : > { %v3335_v22 = vpop.f32.mrf.mxu0 }
  0xb3   : > { %2735 = vmatmul.msk.bf16.gmra.mxu1 %vm330_vm1, %v260_v17  ;;  %v1156_v17 = vld [vmem:[%s3157_s28 + $0x93] sm:$0xff] }
  0xb4   : > { %2754 = vmatmul.msk.bf16.gmra.mxu2 %vm330_vm1, %v932_v43 }
  0xb5   : > { %2792 = vmatmul.msk.bf16.gmra.mxu0 %vm330_vm1, %v1181_v19  ;;  %2775 = vmatmul.msk.bf16.gmra.mxu3 %vm330_vm1, %v3340_v24  ;;  %v1157_v19 = vld [vmem:[%s3157_s28 + $0x9b] sm:$0xff] }
  0xb6   : > { %v1184_v29 = vpack.c.bf16 %v1157_v19, %v1156_v17 }
  0xb7   : > { %v3344_v25 = vpop.f32.mrf.mxu2 }
  0xb8   : > { %v3348_v26 = vpop.f32.mrf.mxu1  ;;  %v3352_v28 = vpop.f32.mrf.mxu3 }
  0xba   : > { %v3350_v27 = vpop.f32.mrf.mxu0 }
  0xbf   : > { %v3358_v33 = vpop.f32.mrf.mxu2 }
  0xc0   : > { %v3360_v35 = vpop.f32.mrf.mxu1  ;;  %v3366_v40 = vpop.f32.mrf.mxu3 }
  0xc2   : > { %v3364_v39 = vpop.f32.mrf.mxu0 }
  0xc3   : > { %2736 = vmatmul.msk.bf16.gmra.mxu1 %vm330_vm1, %v261_v34 }
  0xc4   : > { %2755 = vmatmul.msk.bf16.gmra.mxu2 %vm330_vm1, %v3282_v54 }
  0xc5   : > { %2793 = vmatmul.msk.bf16.gmra.mxu0 %vm330_vm1, %v1182_v36  ;;  %2776 = vmatmul.msk.bf16.gmra.mxu3 %vm330_vm1, %v3369_v41  ;;  %v3417_v36 = vpack.c.bf16 %v913_v31, %v912_v30  ;;  %v915_v30 = vld [vmem:[%s3157_s28 + $0xca] sm:$0xff] }
  0xc7   : > { %v3374_v42 = vpop.f32.mrf.mxu2 }
  0xc8   : > { %v3378_v43 = vpop.f32.mrf.mxu1  ;;  %v1014_v45 = vpop.f32.mrf.mxu3 }
  0xca   : > { %v3380_v44 = vpop.f32.mrf.mxu0 }
  0xcf   : > { %v3386_v51 = vpop.f32.mrf.mxu2 }
  0xd0   : > { %v3388_v54 = vpop.f32.mrf.mxu1  ;;  %v1016_v0 = vpop.f32.mrf.mxu3 }
  0xd2   : > { %v3392_v62 = vpop.f32.mrf.mxu0 }
  0xd3   : > { %2737 = vmatmul.msk.bf16.gmra.mxu1 %vm330_vm1, %v262_v52 }
  0xd4   : > { %2756 = vmatmul.msk.bf16.gmra.mxu2 %vm330_vm1, %v3311_v7  ;;  %v263_v7 = vpack.c.bf16 %v236_v15, %v235_v14  ;;  %v1159_v14 = vld [vmem:[%s3157_s28 + $0xab] sm:$0xff] }
  0xd5   : > { %2794 = vmatmul.msk.bf16.gmra.mxu0 %vm330_vm1, %v1183_v59  ;;  %2777 = vmatmul.msk.bf16.gmra.mxu3 %vm330_vm1, %v3395_v2  ;;  %v237_v59 = vld [vmem:[%s3157_s28 + $0x90] sm:$0xff] }
  0xd6   : > { %v264_v17 = vpack.c.bf16 %v238_v60, %v237_v59 }
  0xd7   : > { %v3400_v3 = vpop.f32.mrf.mxu2 }
  0xd8   : > { %v3404_v4 = vpop.f32.mrf.mxu1  ;;  %v1019_v13 = vpop.f32.mrf.mxu3 }
  0xda   : > { %v3406_v12 = vpop.f32.mrf.mxu0 }
  0xdf   : > { %v3412_v20 = vpop.f32.mrf.mxu2 }
  0xe0   : > { %v554_v21 = vpop.f32.mrf.mxu1  ;;  %v1021_v34 = vpop.f32.mrf.mxu3 }
  0xe1   : > { %v555_v37 = vadd.f32 %v554_v21, %v3279_v53 }
  0xe2   : > { %v1262_v32 = vpop.f32.mrf.mxu0 }
  0xe3   : > { %2738 = vmatmul.msk.bf16.gmra.mxu1 %vm330_vm1, %v263_v7 }
  0xe4   : > { %2757 = vmatmul.msk.bf16.gmra.mxu2 %vm330_vm1, %v3340_v24  ;;  %v1158_v24 = vld [vmem:[%s3157_s28 + $0xa3] sm:$0xff] }
  0xe5   : > { %2795 = vmatmul.msk.bf16.gmra.mxu0 %vm330_vm1, %v1184_v29  ;;  %2778 = vmatmul.msk.bf16.gmra.mxu3 %vm330_vm1, %v3417_v36  ;;  %v1185_v21 = vpack.c.bf16 %v1159_v14, %v1158_v24  ;;  %v914_v29 = vld [vmem:[%s3157_s28 + $0xc2] sm:$0xff] }
  0xe6   : > { %v239_v24 = vld [vmem:[%s3157_s28 + $0xa0] sm:$0xff]  ;;  %v240_v14 = vld [vmem:[%s3157_s28 + $0xa8] sm:$0xff] }
  0xe7   : > { %v766_v38 = vpop.f32.mrf.mxu2 }
  0xe8   : > { %v856_v46 = vadd.f32 %v766_v38, %v555_v37  ;;  %v556_v47 = vpop.f32.mrf.mxu1  ;;  %v1024_v52 = vpop.f32.mrf.mxu3 }
  0xe9   : > { %v557_v15 = vadd.f32 %v556_v47, %v3292_v57 }
  0xea   : > { %v1264_v48 = vpop.f32.mrf.mxu0  ;;  %v1104_v50 = vadd.f32 %v1014_v45, %v856_v46 }
  0xec   : > { %v3427_v61 = vadd.f32 %v1262_v32, %v1104_v50  ;;  %v3435_v32 = vpack.c.bf16 %v915_v30, %v914_v29  ;;  %v916_v29 = vld [vmem:[%s3157_s28 + $0xd2] sm:$0xff]  ;;  %v917_v30 = vld [vmem:[%s3157_s28 + $0xda] sm:$0xff] }
  0xef   : > { %v768_v53 = vpop.f32.mrf.mxu2 }
  0xf0   : > { %v857_v19 = vadd.f32 %v768_v53, %v557_v15  ;;  %v559_v7 = vpop.f32.mrf.mxu1  ;;  %v1026_v45 = vpop.f32.mrf.mxu3  ;;  %v1160_v15 = vld [vmem:[%s3157_s28 + $0xb3] sm:$0xff] }
  0xf1   : > { %v560_v38 = vadd.f32 %v559_v7, %v3306_v5 }
  0xf2   : > { %v1267_v31 = vpop.f32.mrf.mxu0  ;;  %v1105_v37 = vadd.f32 %v1016_v0, %v857_v19 }
  0xf3   : > { %2739 = vmatmul.msk.bf16.gmra.mxu1 %vm330_vm1, %v264_v17  ;;  %v265_v17 = vpack.c.bf16 %v240_v14, %v239_v24 }
  0xf4   : > { %2758 = vmatmul.msk.bf16.gmra.mxu2 %vm330_vm1, %v3369_v41  ;;  %v3440_v57 = vadd.f32 %v1264_v48, %v1105_v37  ;;  %v1161_v48 = vld [vmem:[%s3157_s28 + $0xbb] sm:$0xff] }
  0xf5   : > { %2796 = vmatmul.msk.bf16.gmra.mxu0 %vm330_vm1, %v1185_v21  ;;  %2779 = vmatmul.msk.bf16.gmra.mxu3 %vm330_vm1, %v3435_v32  ;;  %v1186_v21 = vpack.c.bf16 %v1161_v48, %v1160_v15  ;;  %v241_v15 = vld [vmem:[%s3157_s28 + $0xb0] sm:$0xff]  ;;  %v242_v48 = vld [vmem:[%s3157_s28 + $0xb8] sm:$0xff] }
  0xf7   : > { %v771_v46 = vpop.f32.mrf.mxu2 }
  0xf8   : > { %v858_v0 = vadd.f32 %v771_v46, %v560_v38  ;;  %v561_v47 = vpop.f32.mrf.mxu1  ;;  %v1029_v60 = vpop.f32.mrf.mxu3 }
  0xf9   : > { %v562_v53 = vadd.f32 %v561_v47, %v3321_v10 }
  0xfa   : > { %v1269_v50 = vpop.f32.mrf.mxu0  ;;  %v1106_v59 = vadd.f32 %v1019_v13, %v858_v0 }
  0xfc   : > { %v3447_v41 = vadd.f32 %v1267_v31, %v1106_v59  ;;  %v3455_v31 = vpack.c.bf16 %v917_v30, %v916_v29  ;;  %v918_v29 = vld [vmem:[%s3157_s28 + $0xe2] sm:$0xff]  ;;  %v919_v30 = vld [vmem:[%s3157_s28 + $0xea] sm:$0xff] }
  0xff   : > { %v773_v5 = vpop.f32.mrf.mxu2 }
 0x100   : > { %v859_v19 = vadd.f32 %v773_v5, %v562_v53  ;;  %v564_v7 = vpop.f32.mrf.mxu1  ;;  %v1031_v13 = vpop.f32.mrf.mxu3  ;;  %v1162_v53 = vld [vmem:[%s3157_s28 + $0xc3] sm:$0xff] }
 0x101   : > { %v565_v46 = vadd.f32 %v564_v7, %v3335_v22 }
 0x102   : > { %v1272_v37 = vpop.f32.mrf.mxu0  ;;  %v1107_v38 = vadd.f32 %v1021_v34, %v859_v19 }
 0x103   : > { %2740 = vmatmul.msk.bf16.gmra.mxu1 %vm330_vm1, %v265_v17  ;;  %v266_v17 = vpack.c.bf16 %v242_v48, %v241_v15 }
 0x104   : > { %2759 = vmatmul.msk.bf16.gmra.mxu2 %vm330_vm1, %v3395_v2  ;;  %v3460_v10 = vadd.f32 %v1269_v50, %v1107_v38  ;;  %v1163_v50 = vld [vmem:[%s3157_s28 + $0xcb] sm:$0xff] }
 0x105   : > { %2797 = vmatmul.msk.bf16.gmra.mxu0 %vm330_vm1, %v1186_v21  ;;  %2780 = vmatmul.msk.bf16.gmra.mxu3 %vm330_vm1, %v3455_v31  ;;  %v1187_v21 = vpack.c.bf16 %v1163_v50, %v1162_v53  ;;  %v243_v53 = vld [vmem:[%s3157_s28 + $0xc0] sm:$0xff]  ;;  %v244_v50 = vld [vmem:[%s3157_s28 + $0xc8] sm:$0xff] }
 0x107   : > { %v776_v0 = vpop.f32.mrf.mxu2 }
 0x108   : > { %v860_v34 = vadd.f32 %v776_v0, %v565_v46  ;;  %v566_v47 = vpop.f32.mrf.mxu1  ;;  %v1034_v14 = vpop.f32.mrf.mxu3 }
 0x109   : > { %v567_v5 = vadd.f32 %v566_v47, %v3350_v27 }
 0x10a   : > { %v1274_v59 = vpop.f32.mrf.mxu0  ;;  %v1108_v24 = vadd.f32 %v1024_v52, %v860_v34 }
 0x10c   : > { %v3467_v2 = vadd.f32 %v1272_v37, %v1108_v24  ;;  %v3475_v37 = vpack.c.bf16 %v919_v30, %v918_v29  ;;  %v920_v29 = vld [vmem:[%s3157_s28 + $0xf2] sm:$0xff]  ;;  %v921_v30 = vld [vmem:[%s3157_s28 + $0xfa] sm:$0xff] }
 0x10f   : > { %v778_v22 = vpop.f32.mrf.mxu2 }
 0x110   : > { %v861_v19 = vadd.f32 %v778_v22, %v567_v5  ;;  %v569_v7 = vpop.f32.mrf.mxu1  ;;  %v1036_v52 = vpop.f32.mrf.mxu3  ;;  %v1164_v5 = vld [vmem:[%s3157_s28 + $0xd3] sm:$0xff] }
 0x111   : > { %v570_v0 = vadd.f32 %v569_v7, %v3364_v39 }
 0x112   : > { %v1277_v38 = vpop.f32.mrf.mxu0  ;;  %v1109_v46 = vadd.f32 %v1026_v45, %v861_v19 }
 0x113   : > { %2741 = vmatmul.msk.bf16.gmra.mxu1 %vm330_vm1, %v266_v17  ;;  %v267_v17 = vpack.c.bf16 %v244_v50, %v243_v53 }
 0x114   : > { %2760 = vmatmul.msk.bf16.gmra.mxu2 %vm330_vm1, %v3417_v36  ;;  %v3480_v27 = vadd.f32 %v1274_v59, %v1109_v46  ;;  %v1165_v59 = vld [vmem:[%s3157_s28 + $0xdb] sm:$0xff] }
 0x115   : > { %2798 = vmatmul.msk.bf16.gmra.mxu0 %vm330_vm1, %v1187_v21  ;;  %2781 = vmatmul.msk.bf16.gmra.mxu3 %vm330_vm1, %v3475_v37  ;;  %v1188_v21 = vpack.c.bf16 %v1165_v59, %v1164_v5  ;;  %v245_v5 = vld [vmem:[%s3157_s28 + $0xd0] sm:$0xff]  ;;  %v246_v59 = vld [vmem:[%s3157_s28 + $0xd8] sm:$0xff] }
 0x117   : > { %v781_v34 = vpop.f32.mrf.mxu2 }
 0x118   : > { %v862_v45 = vadd.f32 %v781_v34, %v570_v0  ;;  %v571_v47 = vpop.f32.mrf.mxu1  ;;  %v1039_v48 = vpop.f32.mrf.mxu3 }
 0x119   : > { %v572_v22 = vadd.f32 %v571_v47, %v3380_v44 }
 0x11a   : > { %v1279_v24 = vpop.f32.mrf.mxu0  ;;  %v1110_v15 = vadd.f32 %v1029_v60, %v862_v45 }
 0x11c   : > { %v3487_v36 = vadd.f32 %v1277_v38, %v1110_v15  ;;  %v3495_v38 = vpack.c.bf16 %v921_v30, %v920_v29  ;;  %v922_v29 = vld [vmem:[%s3157_s28 + $0x102] sm:$0xff]  ;;  %v923_v30 = vld [vmem:[%s3157_s28 + $0x10a] sm:$0xff] }
 0x11f   : > { %v783_v39 = vpop.f32.mrf.mxu2 }
 0x120   : > { %v863_v19 = vadd.f32 %v783_v39, %v572_v22  ;;  %v574_v7 = vpop.f32.mrf.mxu1  ;;  %v1041_v60 = vpop.f32.mrf.mxu3  ;;  %v1166_v22 = vld [vmem:[%s3157_s28 + $0xe3] sm:$0xff] }
 0x121   : > { %v575_v34 = vadd.f32 %v574_v7, %v3392_v62 }
 0x122   : > { %v1282_v46 = vpop.f32.mrf.mxu0  ;;  %v1111_v0 = vadd.f32 %v1031_v13, %v863_v19 }
 0x123   : > { %2742 = vmatmul.msk.bf16.gmra.mxu1 %vm330_vm1, %v267_v17  ;;  %v268_v17 = vpack.c.bf16 %v246_v59, %v245_v5 }
 0x124   : > { %2761 = vmatmul.msk.bf16.gmra.mxu2 %vm330_vm1, %v3435_v32  ;;  %v3500_v44 = vadd.f32 %v1279_v24, %v1111_v0  ;;  %v1167_v24 = vld [vmem:[%s3157_s28 + $0xeb] sm:$0xff] }
 0x125   : > { %2799 = vmatmul.msk.bf16.gmra.mxu0 %vm330_vm1, %v1188_v21  ;;  %2782 = vmatmul.msk.bf16.gmra.mxu3 %vm330_vm1, %v3495_v38  ;;  %v1189_v21 = vpack.c.bf16 %v1167_v24, %v1166_v22  ;;  %v247_v22 = vld [vmem:[%s3157_s28 + $0xe0] sm:$0xff]  ;;  %v248_v24 = vld [vmem:[%s3157_s28 + $0xe8] sm:$0xff] }
 0x127   : > { %v786_v45 = vpop.f32.mrf.mxu2 }
 0x128   : > { %v864_v13 = vadd.f32 %v786_v45, %v575_v34  ;;  %v576_v47 = vpop.f32.mrf.mxu1  ;;  %v1044_v50 = vpop.f32.mrf.mxu3 }
 0x129   : > { %v577_v39 = vadd.f32 %v576_v47, %v3406_v12 }
 0x12a   : > { %v1284_v15 = vpop.f32.mrf.mxu0  ;;  %v1112_v53 = vadd.f32 %v1034_v14, %v864_v13 }
 0x12c   : > { %v3507_v32 = vadd.f32 %v1282_v46, %v1112_v53  ;;  %v3515_v46 = vpack.c.bf16 %v923_v30, %v922_v29  ;;  %v924_v29 = vld [vmem:[%s3157_s28 + $0x112] sm:$0xff]  ;;  %v925_v30 = vld [vmem:[%s3157_s28 + $0x11a] sm:$0xff] }
 0x12f   : > { %v788_v62 = vpop.f32.mrf.mxu2 }
 0x130   : > { %v865_v19 = vadd.f32 %v788_v62, %v577_v39  ;;  %v579_v7 = vpop.f32.mrf.mxu1  ;;  %v1046_v14 = vpop.f32.mrf.mxu3  ;;  %v1168_v39 = vld [vmem:[%s3157_s28 + $0xf3] sm:$0xff] }
 0x131   : > { %v580_v45 = vadd.f32 %v579_v7, %v3275_v49 }
 0x132   : > { %v1287_v0 = vpop.f32.mrf.mxu0  ;;  %v1113_v34 = vadd.f32 %v1036_v52, %v865_v19 }
 0x133   : > { %2743 = vmatmul.msk.bf16.gmra.mxu1 %vm330_vm1, %v268_v17  ;;  %v269_v17 = vpack.c.bf16 %v248_v24, %v247_v22 }
 0x134   : > { %2762 = vmatmul.msk.bf16.gmra.mxu2 %vm330_vm1, %v3455_v31  ;;  %v3520_v12 = vadd.f32 %v1284_v15, %v1113_v34  ;;  %v1169_v15 = vld [vmem:[%s3157_s28 + $0xfb] sm:$0xff] }
 0x135   : > { %2800 = vmatmul.msk.bf16.gmra.mxu0 %vm330_vm1, %v1189_v21  ;;  %2783 = vmatmul.msk.bf16.gmra.mxu3 %vm330_vm1, %v3515_v46  ;;  %v1190_v21 = vpack.c.bf16 %v1169_v15, %v1168_v39  ;;  %v249_v39 = vld [vmem:[%s3157_s28 + $0xf0] sm:$0xff]  ;;  %v250_v15 = vld [vmem:[%s3157_s28 + $0xf8] sm:$0xff] }
 0x137   : > { %v791_v13 = vpop.f32.mrf.mxu2 }
 0x138   : > { %v866_v52 = vadd.f32 %v791_v13, %v580_v45  ;;  %v581_v47 = vpop.f32.mrf.mxu1  ;;  %v1049_v59 = vpop.f32.mrf.mxu3 }
 0x139   : > { %v582_v62 = vadd.f32 %v581_v47, %v3290_v56 }
 0x13a   : > { %v1289_v53 = vpop.f32.mrf.mxu0  ;;  %v1114_v5 = vadd.f32 %v1039_v48, %v866_v52 }
 0x13c   : > { %v3527_v31 = vadd.f32 %v1287_v0, %v1114_v5  ;;  %v3535_v0 = vpack.c.bf16 %v925_v30, %v924_v29  ;;  %v926_v29 = vld [vmem:[%s3157_s28 + $0x122] sm:$0xff]  ;;  %v927_v30 = vld [vmem:[%s3157_s28 + $0x12a] sm:$0xff] }
 0x13f   : > { %v793_v49 = vpop.f32.mrf.mxu2 }
 0x140   : > { %v867_v19 = vadd.f32 %v793_v49, %v582_v62  ;;  %v584_v7 = vpop.f32.mrf.mxu1  ;;  %v1051_v48 = vpop.f32.mrf.mxu3  ;;  %v1170_v62 = vld [vmem:[%s3157_s28 + $0x103] sm:$0xff] }
 0x141   : > { %v585_v13 = vadd.f32 %v584_v7, %v3302_v1 }
 0x142   : > { %v1292_v34 = vpop.f32.mrf.mxu0  ;;  %v1115_v45 = vadd.f32 %v1041_v60, %v867_v19 }
 0x143   : > { %2744 = vmatmul.msk.bf16.gmra.mxu1 %vm330_vm1, %v269_v17  ;;  %v270_v17 = vpack.c.bf16 %v250_v15, %v249_v39 }
 0x144   : > { %2763 = vmatmul.msk.bf16.gmra.mxu2 %vm330_vm1, %v3475_v37  ;;  %v3540_v56 = vadd.f32 %v1289_v53, %v1115_v45  ;;  %v1171_v53 = vld [vmem:[%s3157_s28 + $0x10b] sm:$0xff] }
 0x145   : > { %2801 = vmatmul.msk.bf16.gmra.mxu0 %vm330_vm1, %v1190_v21  ;;  %2784 = vmatmul.msk.bf16.gmra.mxu3 %vm330_vm1, %v3535_v0  ;;  %v1191_v21 = vpack.c.bf16 %v1171_v53, %v1170_v62  ;;  %v251_v62 = vld [vmem:[%s3157_s28 + $0x100] sm:$0xff]  ;;  %v252_v53 = vld [vmem:[%s3157_s28 + $0x108] sm:$0xff] }
 0x147   : > { %v796_v52 = vpop.f32.mrf.mxu2 }
 0x148   : > { %v868_v60 = vadd.f32 %v796_v52, %v585_v13  ;;  %v586_v47 = vpop.f32.mrf.mxu1  ;;  %v1054_v24 = vpop.f32.mrf.mxu3 }
 0x149   : > { %v587_v49 = vadd.f32 %v586_v47, %v3319_v9 }
 0x14a   : > { %v1294_v5 = vpop.f32.mrf.mxu0  ;;  %v1116_v22 = vadd.f32 %v1044_v50, %v868_v60 }
 0x14c   : > { %v3547_v37 = vadd.f32 %v1292_v34, %v1116_v22  ;;  %v945_v34 = vpack.c.bf16 %v927_v30, %v926_v29  ;;  %v1884_v29 = vld [vmem:[%s3157_s28 + $0x25] sm:$0xff]  ;;  %v1885_v30 = vld [vmem:[%s3157_s28 + $0x2d] sm:$0xff] }
 0x14f   : > { %v798_v1 = vpop.f32.mrf.mxu2 }
 0x150   : > { %v869_v19 = vadd.f32 %v798_v1, %v587_v49  ;;  %v589_v7 = vpop.f32.mrf.mxu1  ;;  %v1056_v50 = vpop.f32.mrf.mxu3  ;;  %v1173_v1 = vld [vmem:[%s3157_s28 + $0x11b] sm:$0xff] }
 0x151   : > { %v590_v52 = vadd.f32 %v589_v7, %v3331_v18  ;;  %v271_v18 = vpack.c.bf16 %v252_v53, %v251_v62  ;;  %v253_v53 = vld [vmem:[%s3157_s28 + $0x110] sm:$0xff] }
 0x152   : > { %v1297_v45 = vpop.f32.mrf.mxu0  ;;  %v1117_v13 = vadd.f32 %v1046_v14, %v869_v19 }
 0x153   : > { %2745 = vmatmul.msk.bf16.gmra.mxu1 %vm330_vm1, %v270_v17 }
 0x154   : > { %2764 = vmatmul.msk.bf16.gmra.mxu2 %vm330_vm1, %v3495_v38  ;;  %v3558_v9 = vadd.f32 %v1294_v5, %v1117_v13  ;;  %v1172_v38 = vld [vmem:[%s3157_s28 + $0x113] sm:$0xff] }
 0x155   : > { %2802 = vmatmul.msk.bf16.gmra.mxu0 %vm330_vm1, %v1191_v21  ;;  %2785 = vmatmul.msk.bf16.gmra.mxu3 %vm330_vm1, %v945_v34  ;;  %v1192_v21 = vpack.c.bf16 %v1173_v1, %v1172_v38  ;;  %v254_v38 = vld [vmem:[%s3157_s28 + $0x118] sm:$0xff] }
 0x157   : > { %v801_v60 = vpop.f32.mrf.mxu2 }
 0x158   : > { %v870_v14 = vadd.f32 %v801_v60, %v590_v52  ;;  %v591_v47 = vpop.f32.mrf.mxu1  ;;  %v1059_v15 = vpop.f32.mrf.mxu3 }
 0x159   : > { %v592_v5 = vadd.f32 %v591_v47, %v3348_v26 }
 0x15a   : > { %v1299_v22 = vpop.f32.mrf.mxu0  ;;  %v1118_v39 = vadd.f32 %v1049_v59, %v870_v14 }
 0x15c   : > { %v3564_v49 = vadd.f32 %v1297_v45, %v1118_v39  ;;  %v1920_v45 = vpack.c.bf16 %v1885_v30, %v1884_v29  ;;  %v1887_v29 = vld [vmem:[%s3157_s28 + $0x3d] sm:$0xff] }
 0x15f   : > { %v803_v17 = vpop.f32.mrf.mxu2 }
 0x160   : > { %v871_v19 = vadd.f32 %v803_v17, %v592_v5  ;;  %v594_v7 = vpop.f32.mrf.mxu1  ;;  %v1061_v59 = vpop.f32.mrf.mxu3  ;;  %v1175_v5 = vld [vmem:[%s3157_s28 + $0x12b] sm:$0xff] }
 0x161   : > { %v595_v52 = vadd.f32 %v594_v7, %v3360_v35  ;;  %v272_v35 = vpack.c.bf16 %v254_v38, %v253_v53  ;;  %v1388_v53 = vld [vmem:[%s3157_s28 + $0x14] sm:$0xff]  ;;  %v1636_v38 = vld [vmem:[%s3157_s28 + $0x24] sm:$0xff] }
 0x162   : > { %v1302_v13 = vpop.f32.mrf.mxu0  ;;  %v1119_v34 = vadd.f32 %v1051_v48, %v871_v19 }
 0x163   : > { %2746 = vmatmul.msk.bf16.gmra.mxu1 %vm330_vm1, %v271_v18 }
 0x164   : > { %2765 = vmatmul.msk.bf16.gmra.mxu2 %vm330_vm1, %v3515_v46  ;;  %v3575_v26 = vadd.f32 %v1299_v22, %v1119_v34  ;;  %v1174_v46 = vld [vmem:[%s3157_s28 + $0x123] sm:$0xff] }
 0x165   : > { %2803 = vmatmul.msk.bf16.gmra.mxu0 %vm330_vm1, %v1192_v21  ;;  %2844 = vmatmul.msk.bf16.vlgmr.msra.gmra.mxu3 %vm330_vm1, %v1920_v45  ;;  %v1193_v7 = vpack.c.bf16 %v1175_v5, %v1174_v46  ;;  %v1886_v21 = vld [vmem:[%s3157_s28 + $0x35] sm:$0xff]  ;;  %v1637_v5 = vld [vmem:[%s3157_s28 + $0x2c] sm:$0xff] }
 0x167   : > { %v806_v60 = vpop.f32.mrf.mxu2 }
 0x168   : > { %v872_v48 = vadd.f32 %v806_v60, %v595_v52  ;;  %v596_v14 = vpop.f32.mrf.mxu1  ;;  %v1064_v62 = vpop.f32.mrf.mxu3 }
 0x169   : > { %v597_v22 = vadd.f32 %v596_v14, %v3378_v43 }
 0x16a   : > { %v1304_v47 = vpop.f32.mrf.mxu0  ;;  %v1120_v39 = vadd.f32 %v1054_v24, %v872_v48 }
 0x16c   : > { %v3581_v1 = vadd.f32 %v1302_v13, %v1120_v39  ;;  %v1921_v13 = vpack.c.bf16 %v1887_v29, %v1886_v21  ;;  %v1889_v29 = vld [vmem:[%s3157_s28 + $0x4d] sm:$0xff] }
 0x16f   : > { %v808_v17 = vpop.f32.mrf.mxu2 }
 0x170   : > { %v873_v18 = vadd.f32 %v808_v17, %v597_v22  ;;  %v599_v19 = vpop.f32.mrf.mxu1  ;;  %v1066_v24 = vpop.f32.mrf.mxu3  ;;  %v2133_v22 = vld [vmem:[%s3157_s28 + $0x2e] sm:$0xff] }
 0x171   : > { %v600_v45 = vadd.f32 %v599_v19, %v3388_v54 }
 0x172   : > { %v1307_v30 = vpop.f32.mrf.mxu0  ;;  %v1121_v34 = vadd.f32 %v1056_v50, %v873_v18 }
 0x173   : > { %2747 = vmatmul.msk.bf16.gmra.mxu1 %vm330_vm1, %v272_v35 }
 0x174   : > { %2766 = vmatmul.msk.bf16.gmra.mxu2 %vm330_vm1, %v3535_v0  ;;  %v3592_v43 = vadd.f32 %v1304_v47, %v1121_v34  ;;  %v1389_v0 = vld [vmem:[%s3157_s28 + $0x1c] sm:$0xff]  ;;  %v2132_v47 = vld [vmem:[%s3157_s28 + $0x26] sm:$0xff] }
 0x175   : > { %2804 = vmatmul.msk.bf16.gmra.mxu0 %vm330_vm1, %v1193_v7  ;;  %2845 = vmatmul.msk.bf16.gmra.mxu3 %vm330_vm1, %v1921_v13  ;;  %v1424_v35 = vpack.c.bf16 %v1389_v0, %v1388_v53  ;;  %v1672_v7 = vpack.c.bf16 %v1637_v5, %v1636_v38  ;;  %v2168_v21 = vpack.c.bf16 %v2133_v22, %v2132_v47  ;;  %v1638_v38 = vld [vmem:[%s3157_s28 + $0x34] sm:$0xff]  ;;  %v1639_v47 = vld [vmem:[%s3157_s28 + $0x3c] sm:$0xff] }
 0x176   : > { %v2134_v22 = vld [vmem:[%s3157_s28 + $0x36] sm:$0xff] }
 0x177   : > { %v811_v52 = vpop.f32.mrf.mxu2 }
 0x178   : > { %v874_v50 = vadd.f32 %v811_v52, %v600_v45  ;;  %v601_v60 = vpop.f32.mrf.mxu1  ;;  %v1069_v39 = vpop.f32.mrf.mxu3 }
 0x179   : > { %v602_v54 = vadd.f32 %v601_v60, %v3404_v4 }
 0x17a   : > { %v1309_v48 = vpop.f32.mrf.mxu0  ;;  %v1122_v14 = vadd.f32 %v1059_v15, %v874_v50  ;;  %v1888_v15 = vld [vmem:[%s3157_s28 + $0x45] sm:$0xff] }
 0x17c   : > { %v3599_v46 = vadd.f32 %v1307_v30, %v1122_v14  ;;  %v1922_v30 = vpack.c.bf16 %v1889_v29, %v1888_v15  ;;  %v1891_v15 = vld [vmem:[%s3157_s28 + $0x5d] sm:$0xff] }
 0x17f   : > { %v813_v17 = vpop.f32.mrf.mxu2 }
 0x180   : > { %v875_v18 = vadd.f32 %v813_v17, %v602_v54  ;;  %v604_v19 = vpop.f32.mrf.mxu1  ;;  %v1071_v45 = vpop.f32.mrf.mxu3  ;;  %v2135_v54 = vld [vmem:[%s3157_s28 + $0x3e] sm:$0xff] }
 0x181   : > { %v605_v52 = vadd.f32 %v604_v19, %v3286_v55  ;;  %v2169_v19 = vpack.c.bf16 %v2135_v54, %v2134_v22  ;;  %v2136_v22 = vld [vmem:[%s3157_s28 + $0x46] sm:$0xff]  ;;  %v2137_v54 = vld [vmem:[%s3157_s28 + $0x4e] sm:$0xff] }
 0x182   : > { %v1312_v34 = vpop.f32.mrf.mxu0  ;;  %v1123_v13 = vadd.f32 %v1061_v59, %v875_v18  ;;  %v1673_v18 = vpack.c.bf16 %v1639_v47, %v1638_v38  ;;  %v1641_v47 = vld [vmem:[%s3157_s28 + $0x4c] sm:$0xff] }
 0x183   : > { %2806 = vmatmul.msk.bf16.vlgmr.msra.gmra.mxu1 %vm330_vm1, %v1424_v35 }
 0x184   : > { %2825 = vmatmul.msk.bf16.vlgmr.msra.gmra.mxu2 %vm330_vm1, %v1672_v7  ;;  %v3610_v4 = vadd.f32 %v1309_v48, %v1123_v13 }
 0x185   : > { %2863 = vmatmul.msk.bf16.vlgmr.msra.gmra.mxu0 %vm330_vm1, %v2168_v21  ;;  %2846 = vmatmul.msk.bf16.gmra.mxu3 %vm330_vm1, %v1922_v30  ;;  %v1890_v21 = vld [vmem:[%s3157_s28 + $0x55] sm:$0xff] }
 0x187   : > { %v816_v50 = vpop.f32.mrf.mxu2 }
 0x188   : > { %v876_v60 = vadd.f32 %v816_v50, %v605_v52  ;;  %v606_v59 = vpop.f32.mrf.mxu1  ;;  %v1074_v0 = vpop.f32.mrf.mxu3 }
 0x189   : > { %v607_v48 = vadd.f32 %v606_v59, %v3300_v63 }
 0x18a   : > { %v1314_v14 = vpop.f32.mrf.mxu0  ;;  %v1124_v53 = vadd.f32 %v1064_v62, %v876_v60 }
 0x18c   : > { %v3615_v5 = vadd.f32 %v1312_v34, %v1124_v53  ;;  %v1923_v34 = vpack.c.bf16 %v1891_v15, %v1890_v21  ;;  %v1640_v53 = vld [vmem:[%s3157_s28 + $0x44] sm:$0xff]  ;;  %v1893_v21 = vld [vmem:[%s3157_s28 + $0x6d] sm:$0xff] }
 0x18f   : > { %v818_v17 = vpop.f32.mrf.mxu2 }
 0x190   : > { %v877_v55 = vadd.f32 %v818_v17, %v607_v48  ;;  %v609_v35 = vpop.f32.mrf.mxu1  ;;  %v1076_v62 = vpop.f32.mrf.mxu3 }
 0x191   : > { %v610_v30 = vadd.f32 %v609_v35, %v3315_v8  ;;  %v2170_v35 = vpack.c.bf16 %v2137_v54, %v2136_v22  ;;  %v2138_v22 = vld [vmem:[%s3157_s28 + $0x56] sm:$0xff]  ;;  %v2139_v54 = vld [vmem:[%s3157_s28 + $0x5e] sm:$0xff] }
 0x192   : > { %v1317_v29 = vpop.f32.mrf.mxu0  ;;  %v1125_v13 = vadd.f32 %v1066_v24, %v877_v55  ;;  %v1674_v55 = vpack.c.bf16 %v1641_v47, %v1640_v53  ;;  %v1643_v47 = vld [vmem:[%s3157_s28 + $0x5c] sm:$0xff] }
 0x193   : > { %2807 = vmatmul.msk.bf16.gmra.mxu1 %vm330_vm1, %v1672_v7 }
 0x194   : > { %2826 = vmatmul.msk.bf16.gmra.mxu2 %vm330_vm1, %v1673_v18  ;;  %v3626_v63 = vadd.f32 %v1314_v14, %v1125_v13 }
 0x195   : > { %2864 = vmatmul.msk.bf16.gmra.mxu0 %vm330_vm1, %v2169_v19  ;;  %2847 = vmatmul.msk.bf16.gmra.mxu3 %vm330_vm1, %v1923_v34  ;;  %v1892_v19 = vld [vmem:[%s3157_s28 + $0x65] sm:$0xff] }
 0x197   : > { %v821_v52 = vpop.f32.mrf.mxu2 }
 0x198   : > { %v878_v50 = vadd.f32 %v821_v52, %v610_v30  ;;  %v611_v24 = vpop.f32.mrf.mxu1  ;;  %v1079_v59 = vpop.f32.mrf.mxu3 }
 0x199   : > { %v612_v14 = vadd.f32 %v611_v24, %v3329_v16 }
 0x19a   : > { %v1319_v60 = vpop.f32.mrf.mxu0  ;;  %v1126_v7 = vadd.f32 %v1069_v39, %v878_v50 }
 0x19c   : > { %v3631_v38 = vadd.f32 %v1317_v29, %v1126_v7  ;;  %v1924_v29 = vpack.c.bf16 %v1893_v21, %v1892_v19  ;;  %v1642_v7 = vld [vmem:[%s3157_s28 + $0x54] sm:$0xff]  ;;  %v1895_v19 = vld [vmem:[%s3157_s28 + $0x7d] sm:$0xff] }
 0x19f   : > { %v823_v48 = vpop.f32.mrf.mxu2 }
 0x1a0   : > { %v879_v8 = vadd.f32 %v823_v48, %v612_v14  ;;  %v614_v17 = vpop.f32.mrf.mxu1  ;;  %v1081_v39 = vpop.f32.mrf.mxu3 }
 0x1a1   : > { %v615_v34 = vadd.f32 %v614_v17, %v3344_v25  ;;  %v2171_v17 = vpack.c.bf16 %v2139_v54, %v2138_v22  ;;  %v2140_v22 = vld [vmem:[%s3157_s28 + $0x66] sm:$0xff]  ;;  %v2141_v54 = vld [vmem:[%s3157_s28 + $0x6e] sm:$0xff] }
 0x1a2   : > { %v1322_v15 = vpop.f32.mrf.mxu0  ;;  %v1127_v13 = vadd.f32 %v1071_v45, %v879_v8  ;;  %v1675_v8 = vpack.c.bf16 %v1643_v47, %v1642_v7  ;;  %v1645_v47 = vld [vmem:[%s3157_s28 + $0x6c] sm:$0xff] }
 0x1a3   : > { %2808 = vmatmul.msk.bf16.gmra.mxu1 %vm330_vm1, %v1673_v18 }
 0x1a4   : > { %2827 = vmatmul.msk.bf16.gmra.mxu2 %vm330_vm1, %v1674_v55  ;;  %v3642_v16 = vadd.f32 %v1319_v60, %v1127_v13 }
 0x1a5   : > { %2865 = vmatmul.msk.bf16.gmra.mxu0 %vm330_vm1, %v2170_v35  ;;  %2848 = vmatmul.msk.bf16.gmra.mxu3 %vm330_vm1, %v1924_v29  ;;  %v1894_v35 = vld [vmem:[%s3157_s28 + $0x75] sm:$0xff] }
 0x1a7   : > { %v826_v30 = vpop.f32.mrf.mxu2 }
 0x1a8   : > { %v880_v52 = vadd.f32 %v826_v30, %v615_v34  ;;  %v616_v45 = vpop.f32.mrf.mxu1  ;;  %v1084_v24 = vpop.f32.mrf.mxu3 }
 0x1a9   : > { %v617_v60 = vadd.f32 %v616_v45, %v3358_v33 }
 0x1aa   : > { %v1324_v50 = vpop.f32.mrf.mxu0  ;;  %v1128_v18 = vadd.f32 %v1074_v0, %v880_v52 }
 0x1ac   : > { %v3647_v53 = vadd.f32 %v1322_v15, %v1128_v18  ;;  %v1925_v15 = vpack.c.bf16 %v1895_v19, %v1894_v35  ;;  %v1644_v18 = vld [vmem:[%s3157_s28 + $0x64] sm:$0xff]  ;;  %v1897_v35 = vld [vmem:[%s3157_s28 + $0x8d] sm:$0xff] }
 0x1af   : > { %v828_v14 = vpop.f32.mrf.mxu2 }
 0x1b0   : > { %v881_v25 = vadd.f32 %v828_v14, %v617_v60  ;;  %v619_v48 = vpop.f32.mrf.mxu1  ;;  %v1086_v0 = vpop.f32.mrf.mxu3 }
 0x1b1   : > { %v620_v29 = vadd.f32 %v619_v48, %v3374_v42  ;;  %v2172_v48 = vpack.c.bf16 %v2141_v54, %v2140_v22  ;;  %v2142_v22 = vld [vmem:[%s3157_s28 + $0x76] sm:$0xff]  ;;  %v2143_v54 = vld [vmem:[%s3157_s28 + $0x7e] sm:$0xff] }
 0x1b2   : > { %v1327_v21 = vpop.f32.mrf.mxu0  ;;  %v1129_v13 = vadd.f32 %v1076_v62, %v881_v25  ;;  %v1676_v25 = vpack.c.bf16 %v1645_v47, %v1644_v18  ;;  %v1647_v47 = vld [vmem:[%s3157_s28 + $0x7c] sm:$0xff] }
 0x1b3   : > { %2809 = vmatmul.msk.bf16.gmra.mxu1 %vm330_vm1, %v1674_v55 }
 0x1b4   : > { %2828 = vmatmul.msk.bf16.gmra.mxu2 %vm330_vm1, %v1675_v8  ;;  %v3658_v33 = vadd.f32 %v1324_v50, %v1129_v13 }
 0x1b5   : > { %2866 = vmatmul.msk.bf16.gmra.mxu0 %vm330_vm1, %v2171_v17  ;;  %2849 = vmatmul.msk.bf16.gmra.mxu3 %vm330_vm1, %v1925_v15  ;;  %v1896_v17 = vld [vmem:[%s3157_s28 + $0x85] sm:$0xff] }
 0x1b7   : > { %v831_v34 = vpop.f32.mrf.mxu2 }
 0x1b8   : > { %v882_v30 = vadd.f32 %v831_v34, %v620_v29  ;;  %v621_v62 = vpop.f32.mrf.mxu1  ;;  %v1089_v45 = vpop.f32.mrf.mxu3 }
 0x1b9   : > { %v622_v50 = vadd.f32 %v621_v62, %v3386_v51 }
 0x1ba   : > { %v1329_v52 = vpop.f32.mrf.mxu0  ;;  %v1130_v55 = vadd.f32 %v1079_v59, %v882_v30 }
 0x1bc   : > { %v3663_v7 = vadd.f32 %v1327_v21, %v1130_v55  ;;  %v1926_v21 = vpack.c.bf16 %v1897_v35, %v1896_v17  ;;  %v1646_v55 = vld [vmem:[%s3157_s28 + $0x74] sm:$0xff]  ;;  %v1899_v17 = vld [vmem:[%s3157_s28 + $0x9d] sm:$0xff] }
 0x1bf   : > { %v833_v60 = vpop.f32.mrf.mxu2 }
 0x1c0   : > { %v883_v42 = vadd.f32 %v833_v60, %v622_v50  ;;  %v624_v14 = vpop.f32.mrf.mxu1  ;;  %v1091_v59 = vpop.f32.mrf.mxu3 }
 0x1c1   : > { %v625_v15 = vadd.f32 %v624_v14, %v3400_v3  ;;  %v2173_v14 = vpack.c.bf16 %v2143_v54, %v2142_v22  ;;  %v2144_v22 = vld [vmem:[%s3157_s28 + $0x86] sm:$0xff]  ;;  %v2145_v54 = vld [vmem:[%s3157_s28 + $0x8e] sm:$0xff] }
 0x1c2   : > { %v1332_v19 = vpop.f32.mrf.mxu0  ;;  %v1131_v13 = vadd.f32 %v1081_v39, %v883_v42  ;;  %v1677_v42 = vpack.c.bf16 %v1647_v47, %v1646_v55  ;;  %v1649_v47 = vld [vmem:[%s3157_s28 + $0x8c] sm:$0xff] }
 0x1c3   : > { %2810 = vmatmul.msk.bf16.gmra.mxu1 %vm330_vm1, %v1675_v8 }
 0x1c4   : > { %2829 = vmatmul.msk.bf16.gmra.mxu2 %vm330_vm1, %v1676_v25  ;;  %v3674_v51 = vadd.f32 %v1329_v52, %v1131_v13 }
 0x1c5   : > { %2867 = vmatmul.msk.bf16.gmra.mxu0 %vm330_vm1, %v2172_v48  ;;  %2850 = vmatmul.msk.bf16.gmra.mxu3 %vm330_vm1, %v1926_v21  ;;  %v1898_v48 = vld [vmem:[%s3157_s28 + $0x95] sm:$0xff] }
 0x1c7   : > { %v836_v29 = vpop.f32.mrf.mxu2 }
 0x1c8   : > { %v884_v34 = vadd.f32 %v836_v29, %v625_v15  ;;  %v626_v39 = vpop.f32.mrf.mxu1  ;;  %v1094_v62 = vpop.f32.mrf.mxu3 }
 0x1c9   : > { %v627_v52 = vadd.f32 %v626_v39, %v3412_v20 }
 0x1ca   : > { %v1334_v30 = vpop.f32.mrf.mxu0  ;;  %v1132_v8 = vadd.f32 %v1084_v24, %v884_v34 }
 0x1cc   : > { %v3679_v18 = vadd.f32 %v1332_v19, %v1132_v8  ;;  %v1927_v19 = vpack.c.bf16 %v1899_v17, %v1898_v48  ;;  %v1648_v8 = vld [vmem:[%s3157_s28 + $0x84] sm:$0xff]  ;;  %v1901_v48 = vld [vmem:[%s3157_s28 + $0xad] sm:$0xff] }
 0x1cf   : > { %v838_v50 = vpop.f32.mrf.mxu2 }
 0x1d0   : > { %v885_v3 = vadd.f32 %v838_v50, %v627_v52  ;;  %v629_v60 = vpop.f32.mrf.mxu1  ;;  %v1096_v24 = vpop.f32.mrf.mxu3 }
 0x1d1   : > { %v630_v21 = vadd.f32 %v629_v60, %v3294_v58  ;;  %v2174_v60 = vpack.c.bf16 %v2145_v54, %v2144_v22  ;;  %v2146_v22 = vld [vmem:[%s3157_s28 + $0x96] sm:$0xff]  ;;  %v2147_v54 = vld [vmem:[%s3157_s28 + $0x9e] sm:$0xff] }
 0x1d2   : > { %v1337_v35 = vpop.f32.mrf.mxu0  ;;  %v1133_v13 = vadd.f32 %v1086_v0, %v885_v3  ;;  %v1678_v3 = vpack.c.bf16 %v1649_v47, %v1648_v8  ;;  %v1651_v47 = vld [vmem:[%s3157_s28 + $0x9c] sm:$0xff] }
 0x1d3   : > { %2811 = vmatmul.msk.bf16.gmra.mxu1 %vm330_vm1, %v1676_v25 }
 0x1d4   : > { %2830 = vmatmul.msk.bf16.gmra.mxu2 %vm330_vm1, %v1677_v42  ;;  %v3690_v20 = vadd.f32 %v1334_v30, %v1133_v13 }
 0x1d5   : > { %2868 = vmatmul.msk.bf16.gmra.mxu0 %vm330_vm1, %v2173_v14  ;;  %2851 = vmatmul.msk.bf16.gmra.mxu3 %vm330_vm1, %v1927_v19  ;;  %v1900_v14 = vld [vmem:[%s3157_s28 + $0xa5] sm:$0xff] }
 0x1d7   : > { %v841_v15 = vpop.f32.mrf.mxu2 }
 0x1d8   : > { %v886_v29 = vadd.f32 %v841_v15, %v630_v21  ;;  %v631_v0 = vpop.f32.mrf.mxu1  ;;  %v1099_v39 = vpop.f32.mrf.mxu3 }
 0x1d9   : > { %v632_v30 = vadd.f32 %v631_v0, %v3308_v6 }
 0x1da   : > { %v1339_v34 = vpop.f32.mrf.mxu0  ;;  %v1134_v25 = vadd.f32 %v1089_v45, %v886_v29 }
 0x1dc   : > { %v3695_v55 = vadd.f32 %v1337_v35, %v1134_v25  ;;  %v1928_v35 = vpack.c.bf16 %v1901_v48, %v1900_v14  ;;  %v1650_v25 = vld [vmem:[%s3157_s28 + $0x94] sm:$0xff]  ;;  %v1903_v14 = vld [vmem:[%s3157_s28 + $0xbd] sm:$0xff] }
 0x1df   : > { %v843_v52 = vpop.f32.mrf.mxu2 }
 0x1e0   : > { %v887_v58 = vadd.f32 %v843_v52, %v632_v30  ;;  %v634_v50 = vpop.f32.mrf.mxu1  ;;  %v1101_v45 = vpop.f32.mrf.mxu3 }
 0x1e1   : > { %v635_v19 = vadd.f32 %v634_v50, %v3323_v11  ;;  %v2175_v50 = vpack.c.bf16 %v2147_v54, %v2146_v22  ;;  %v2148_v22 = vld [vmem:[%s3157_s28 + $0xa6] sm:$0xff] }
 0x1e2   : > { %v1342_v17 = vpop.f32.mrf.mxu0  ;;  %v1135_v13 = vadd.f32 %v1091_v59, %v887_v58  ;;  %v1679_v58 = vpack.c.bf16 %v1651_v47, %v1650_v25  ;;  %v1653_v47 = vld [vmem:[%s3157_s28 + $0xac] sm:$0xff] }
 0x1e3   : > { %2812 = vmatmul.msk.bf16.gmra.mxu1 %vm330_vm1, %v1677_v42 }
 0x1e4   : > { %2831 = vmatmul.msk.bf16.gmra.mxu2 %vm330_vm1, %v1678_v3  ;;  %v3706_v6 = vadd.f32 %v1339_v34, %v1135_v13 }
 0x1e5   : > { %2869 = vmatmul.msk.bf16.gmra.mxu0 %vm330_vm1, %v2174_v60  ;;  %2852 = vmatmul.msk.bf16.gmra.mxu3 %vm330_vm1, %v1928_v35  ;;  %v1902_v60 = vld [vmem:[%s3157_s28 + $0xb5] sm:$0xff] }
 0x1e7   : > { %v846_v21 = vpop.f32.mrf.mxu2 }
 0x1e8   : > { %v888_v15 = vadd.f32 %v846_v21, %v635_v19  ;;  %v636_v59 = vpop.f32.mrf.mxu1  ;;  %v2006_v0 = vpop.f32.mrf.mxu3 }
 0x1e9   : > { %v637_v34 = vadd.f32 %v636_v59, %v3337_v23 }
 0x1ea   : > { %v1344_v29 = vpop.f32.mrf.mxu0  ;;  %v1136_v42 = vadd.f32 %v1094_v62, %v888_v15 }
 0x1ec   : > { %v3711_v8 = vadd.f32 %v1342_v17, %v1136_v42  ;;  %v1929_v17 = vpack.c.bf16 %v1903_v14, %v1902_v60  ;;  %v1652_v42 = vld [vmem:[%s3157_s28 + $0xa4] sm:$0xff]  ;;  %v1905_v60 = vld [vmem:[%s3157_s28 + $0xcd] sm:$0xff] }
 0x1ef   : > { %v848_v30 = vpop.f32.mrf.mxu2 }
 0x1f0   : > { %v889_v11 = vadd.f32 %v848_v30, %v637_v34  ;;  %v639_v52 = vpop.f32.mrf.mxu1  ;;  %v3719_v62 = vpop.f32.mrf.mxu3 }
 0x1f1   : > { %v640_v35 = vadd.f32 %v639_v52, %v3352_v28 }
 0x1f2   : > { %v1347_v48 = vpop.f32.mrf.mxu0  ;;  %v1137_v13 = vadd.f32 %v1096_v24, %v889_v11  ;;  %v1680_v11 = vpack.c.bf16 %v1653_v47, %v1652_v42  ;;  %v2151_v42 = vld [vmem:[%s3157_s28 + $0xbe] sm:$0xff] }
 0x1f3   : > { %2813 = vmatmul.msk.bf16.gmra.mxu1 %vm330_vm1, %v1678_v3 }
 0x1f4   : > { %2832 = vmatmul.msk.bf16.gmra.mxu2 %vm330_vm1, %v1679_v58  ;;  %v3724_v23 = vadd.f32 %v1344_v29, %v1137_v13  ;;  %v2149_v29 = vld [vmem:[%s3157_s28 + $0xae] sm:$0xff] }
 0x1f5   : > { %2870 = vmatmul.msk.bf16.gmra.mxu0 %vm330_vm1, %v2175_v50  ;;  %2853 = vmatmul.msk.bf16.gmra.mxu3 %vm330_vm1, %v1929_v17  ;;  %v2176_v52 = vpack.c.bf16 %v2149_v29, %v2148_v22  ;;  %v1904_v50 = vld [vmem:[%s3157_s28 + $0xc5] sm:$0xff] }
 0x1f6   : > { %v2884_v29 = vld [vmem:[%s3756_s18] sm:$0xff]  }
 0x1f7   : > { %v851_v19 = vpop.f32.mrf.mxu2 }
 0x1f8   : > { %v890_v24 = vadd.f32 %v851_v19, %v640_v35  ;;  %v641_v21 = vpop.f32.mrf.mxu1  ;;  %v3728_v59 = vpop.f32.mrf.mxu3 }
 0x1f9   : > { %v642_v54 = vadd.f32 %v641_v21, %v3366_v40 }
 0x1fa   : > { %v1349_v15 = vpop.f32.mrf.mxu0  ;;  %v1138_v3 = vadd.f32 %v1099_v39, %v890_v24 }
 0x1fc   : > { %v3731_v25 = vadd.f32 %v1347_v48, %v1138_v3  ;;  %v1930_v48 = vpack.c.bf16 %v1905_v60, %v1904_v50  ;;  %v2150_v3 = vld [vmem:[%s3157_s28 + $0xb6] sm:$0xff] }
 0x1fd   : > { %v1906_v50 = vld [vmem:[%s3157_s28 + $0xd5] sm:$0xff]  ;;  %v1907_v60 = vld [vmem:[%s3157_s28 + $0xdd] sm:$0xff] }
 0x1ff   : > { %v853_v28 = vpop.f32.mrf.mxu2 }
 0x200   : > { %v891_v34 = vadd.f32 %v853_v28, %v642_v54  ;;  %v1510_v30 = vpop.f32.mrf.mxu1  ;;  %v3739_v13 = vpop.f32.mrf.mxu3 }
 0x201   : > { %v1600_v17 = vadd.f32 %v1510_v30, %v3427_v61  ;;  %v1654_v61 = vld [vmem:[%s3157_s28 + $0xb4] sm:$0xff] }
 0x202   : > { %v2254_v14 = vpop.f32.mrf.mxu0  ;;  %v1139_v39 = vadd.f32 %v1101_v45, %v891_v34 }
 0x203   : > { %2814 = vmatmul.msk.bf16.gmra.mxu1 %vm330_vm1, %v1679_v58 }
 0x204   : > { %2833 = vmatmul.msk.bf16.gmra.mxu2 %vm330_vm1, %v1680_v11  ;;  %v3744_v40 = vadd.f32 %v1349_v15, %v1139_v39  ;;  %v1655_v15 = vld [vmem:[%s3157_s28 + $0xbc] sm:$0xff] }
 0x205   : > { %2871 = vmatmul.msk.bf16.gmra.mxu0 %vm330_vm1, %v2176_v52  ;;  %2854 = vmatmul.msk.bf16.gmra.mxu3 %vm330_vm1, %v1930_v48  ;;  %v1681_v30 = vpack.c.bf16 %v1655_v15, %v1654_v61  ;;  %v2177_v52 = vpack.c.bf16 %v2151_v42, %v2150_v3 }
 0x207   : > { %v1758_v35 = vpop.f32.mrf.mxu2 }
 0x208   : > { %v1848_v45 = vadd.f32 %v1758_v35, %v1600_v17  ;;  %v1512_v19 = vpop.f32.mrf.mxu1  ;;  %v3749_v21 = vpop.f32.mrf.mxu3  ;;  %v2885_v17 = vunpack.c.l.bf16 %v2884_v29 }
 0x209   : > { %v1601_v22 = vadd.f32 %v1512_v19, %v3440_v57  ;;  %v2886_v19 = vunpack.c.h.bf16 %v2884_v29 }
 0x20a   : > { %v2256_v24 = vpop.f32.mrf.mxu0  ;;  %v2096_v58 = vadd.f32 %v2006_v0, %v1848_v45  ;;  %v3765_v0 = vld [vmem:[%s4012_s2] ss:$0 sm:$0xff]  ;;  %v1931_v45 = vpack.c.bf16 %v1907_v60, %v1906_v50  ;;  %v2153_v50 = vld [vmem:[%s3157_s28 + $0xce] sm:$0xff] }
 0x20c   : > { %v2344_v47 = vadd.f32 %v2254_v14, %v2096_v58 }
 0x20e   : > { %v2384_v48 = vadd.f32 %v3765_v0, %v2344_v47 }
 0x20f   : > { %v1760_v54 = vpop.f32.mrf.mxu2 }
 0x210   : > { %v1849_v28 = vadd.f32 %v1760_v54, %v1601_v22  ;;  %v1515_v34 = vpop.f32.mrf.mxu1  ;;  %v3773_v35 = vpop.f32.mrf.mxu3  ;;  %v2492_v58 = vadd.f32 %v2885_v17, %v2384_v48  ;;  %v3045_v48 = vld [vmem:[%s3756_s18 + $0x8] sm:$0xff]  }
 0x212   : > { %v2259_v39 = vpop.f32.mrf.mxu0  ;;  %v2097_v14 = vadd.f32 %v3719_v62, %v1849_v28  ;;  %v1602_v62 = vadd.f32 %v1515_v34, %v3447_v41  ;;  %v2528_v47 = vmax.f32 %v2492_v58, 0.0  ;;  %v1656_v28 = vld [vmem:[%s3157_s28 + $0xc4] sm:$0xff]  ;;  %v1657_v34 = vld [vmem:[%s3157_s28 + $0xcc] sm:$0xff] }
 0x213   : > { %2815 = vmatmul.msk.bf16.gmra.mxu1 %vm330_vm1, %v1680_v11  ;;  %v1908_v58 = vld [vmem:[%s3157_s28 + $0xe5] sm:$0xff] }
 0x214   : > { %v2345_v57 = vadd.f32 %v2256_v24, %v2097_v14  ;;  %2834 = vmatmul.msk.bf16.gmra.mxu2 %vm330_vm1, %v1681_v30 }
 0x215   : > { %2872 = vmatmul.msk.bf16.gmra.mxu0 %vm330_vm1, %v2177_v52  ;;  %2855 = vmatmul.msk.bf16.gmra.mxu3 %vm330_vm1, %v1931_v45  ;;  %v2152_v52 = vld [vmem:[%s3157_s28 + $0xc6] sm:$0xff] }
 0x216   : > { %v2385_v61 = vadd.f32 %v3765_v0, %v2345_v57  ;;  %v1682_v57 = vpack.c.bf16 %v1657_v34, %v1656_v28 }
 0x217   : > { %v1763_v15 = vpop.f32.mrf.mxu2 }
 0x218   : > { %v2493_v11 = vadd.f32 %v2886_v19, %v2385_v61  ;;  %v1850_v24 = vadd.f32 %v1763_v15, %v1602_v62  ;;  %v1517_v3 = vpop.f32.mrf.mxu1  ;;  %v3782_v54 = vpop.f32.mrf.mxu3  ;;  %v2178_v19 = vpack.c.bf16 %v2153_v50, %v2152_v52  ;;  %v1909_v61 = vld [vmem:[%s3157_s28 + $0xed] sm:$0xff] }
 0x21a   : > { %v2261_v42 = vpop.f32.mrf.mxu0  ;;  %v2529_v22 = vmax.f32 %v2493_v11, 0.0  ;;  %v2098_v29 = vadd.f32 %v3728_v59, %v1850_v24  ;;  %v1603_v59 = vadd.f32 %v1517_v3, %v3460_v10  ;;  %v2889_v11 = vunpack.c.l.bf16 %v3045_v48 }
 0x21b   : > { %v2890_v3 = vunpack.c.h.bf16 %v3045_v48 }
 0x21c   : > { %v2958_v41 = vpack.c.bf16 %v2529_v22, %v2528_v47  ;;  %v2346_v60 = vadd.f32 %v2259_v39, %v2098_v29  ;;  %v1932_v39 = vpack.c.bf16 %v1909_v61, %v1908_v58  ;;  %v3046_v61 = vld [vmem:[%s3756_s18 + $0x10] sm:$0xff]  }
 0x21e   : > { %2959 = vst [vmem:[%s3789_s23] sm:$0xff] %v2958_v41   ;;  %v2386_v15 = vadd.f32 %v3765_v0, %v2346_v60 }
 0x21f   : > { %v1765_v17 = vpop.f32.mrf.mxu2 }
 0x220   : > { %v1851_v14 = vadd.f32 %v1765_v17, %v1603_v59  ;;  %v1520_v45 = vpop.f32.mrf.mxu1  ;;  %v3802_v47 = vpop.f32.mrf.mxu3  ;;  %v2494_v22 = vadd.f32 %v2889_v11, %v2386_v15  ;;  %v1658_v17 = vld [vmem:[%s3157_s28 + $0xd4] sm:$0xff] }
 0x222   : > { %v2264_v62 = vpop.f32.mrf.mxu0  ;;  %v2099_v24 = vadd.f32 %v3739_v13, %v1851_v14  ;;  %v1604_v13 = vadd.f32 %v1520_v45, %v3467_v2  ;;  %v2530_v52 = vmax.f32 %v2494_v22, 0.0  ;;  %v1659_v2 = vld [vmem:[%s3157_s28 + $0xdc] sm:$0xff] }
 0x223   : > { %2816 = vmatmul.msk.bf16.gmra.mxu1 %vm330_vm1, %v1681_v30  ;;  %v2154_v14 = vld [vmem:[%s3157_s28 + $0xd6] sm:$0xff]  ;;  %v2155_v45 = vld [vmem:[%s3157_s28 + $0xde] sm:$0xff] }
 0x224   : > { %v2347_v10 = vadd.f32 %v2261_v42, %v2099_v24  ;;  %2835 = vmatmul.msk.bf16.gmra.mxu2 %vm330_vm1, %v1682_v57 }
 0x225   : > { %2873 = vmatmul.msk.bf16.gmra.mxu0 %vm330_vm1, %v2178_v19  ;;  %2856 = vmatmul.msk.bf16.gmra.mxu3 %vm330_vm1, %v1932_v39  ;;  %v1683_v39 = vpack.c.bf16 %v1659_v2, %v1658_v17 }
 0x226   : > { %v2387_v29 = vadd.f32 %v3765_v0, %v2347_v10  ;;  %v2179_v10 = vpack.c.bf16 %v2155_v45, %v2154_v14 }
 0x227   : > { %v1768_v41 = vpop.f32.mrf.mxu2 }
 0x228   : > { %v2495_v30 = vadd.f32 %v2890_v3, %v2387_v29  ;;  %v1852_v42 = vadd.f32 %v1768_v41, %v1604_v13  ;;  %v1522_v28 = vpop.f32.mrf.mxu1  ;;  %v3811_v59 = vpop.f32.mrf.mxu3  ;;  %v1911_v3 = vld [vmem:[%s3157_s28 + $0xfd] sm:$0xff]  ;;  %v2893_v13 = vunpack.c.l.bf16 %v3046_v61 }
 0x229   : > { %v1605_v58 = vadd.f32 %v1522_v28, %v3480_v27 }
 0x22a   : > { %v2266_v34 = vpop.f32.mrf.mxu0  ;;  %v2531_v50 = vmax.f32 %v2495_v30, 0.0  ;;  %v2100_v60 = vadd.f32 %v3749_v21, %v1852_v42  ;;  %v1910_v21 = vld [vmem:[%s3157_s28 + $0xf5] sm:$0xff]  ;;  %v2894_v42 = vunpack.c.h.bf16 %v3046_v61  ;;  %v2156_v61 = vld [vmem:[%s3157_s28 + $0xe6] sm:$0xff] }
 0x22c   : > { %v2963_v48 = vpack.c.bf16 %v2531_v50, %v2530_v52  ;;  %v2348_v19 = vadd.f32 %v2264_v62, %v2100_v60  ;;  %v1933_v62 = vpack.c.bf16 %v1911_v3, %v1910_v21 }
 0x22e   : > { %3062 = vst [vmem:[%s3789_s23 + $0x8] sm:$0xff] %v2963_v48   ;;  %v2388_v29 = vadd.f32 %v3765_v0, %v2348_v19 }
 0x22f   : > { %v1770_v15 = vpop.f32.mrf.mxu2 }
 0x230   : > { %v1853_v11 = vadd.f32 %v1770_v15, %v1605_v58  ;;  %v1525_v24 = vpop.f32.mrf.mxu1  ;;  %v3824_v30 = vpop.f32.mrf.mxu3  ;;  %v2496_v28 = vadd.f32 %v2893_v13, %v2388_v29  ;;  %v1660_v58 = vld [vmem:[%s3157_s28 + $0xe4] sm:$0xff]  ;;  %v2157_v15 = vld [vmem:[%s3157_s28 + $0xee] sm:$0xff] }
 0x232   : > { %v2269_v22 = vpop.f32.mrf.mxu0  ;;  %v2101_v41 = vadd.f32 %v3773_v35, %v1853_v11  ;;  %v1606_v35 = vadd.f32 %v1525_v24, %v3487_v36  ;;  %v2532_v17 = vmax.f32 %v2496_v28, 0.0  ;;  %v1661_v36 = vld [vmem:[%s3157_s28 + $0xec] sm:$0xff] }
 0x233   : > { %2817 = vmatmul.msk.bf16.gmra.mxu1 %vm330_vm1, %v1682_v57  ;;  %v1684_v13 = vpack.c.bf16 %v1661_v36, %v1660_v58 }
 0x234   : > { %v2349_v27 = vadd.f32 %v2266_v34, %v2101_v41  ;;  %2836 = vmatmul.msk.bf16.gmra.mxu2 %vm330_vm1, %v1683_v39  ;;  %v2180_v41 = vpack.c.bf16 %v2157_v15, %v2156_v61  ;;  %v1662_v15 = vld [vmem:[%s3157_s28 + $0xf4] sm:$0xff] }
 0x235   : > { %2874 = vmatmul.msk.bf16.gmra.mxu0 %vm330_vm1, %v2179_v10  ;;  %2857 = vmatmul.msk.bf16.gmra.mxu3 %vm330_vm1, %v1933_v62  ;;  %v3047_v10 = vld [vmem:[%s3756_s18 + $0x18] sm:$0xff]   ;;  %v1913_v62 = vld [vmem:[%s3157_s28 + $0x10d] sm:$0xff] }
 0x236   : > { %v2389_v52 = vadd.f32 %v3765_v0, %v2349_v27  ;;  %v2897_v28 = vunpack.c.l.bf16 %v3047_v10 }
 0x237   : > { %v1773_v50 = vpop.f32.mrf.mxu2 }
 0x238   : > { %v2497_v57 = vadd.f32 %v2894_v42, %v2389_v52  ;;  %v1854_v34 = vadd.f32 %v1773_v50, %v1606_v35  ;;  %v1527_v60 = vpop.f32.mrf.mxu1  ;;  %v3833_v45 = vpop.f32.mrf.mxu3  ;;  %v2898_v50 = vunpack.c.h.bf16 %v3047_v10 }
 0x239   : > { %v1607_v24 = vadd.f32 %v1527_v60, %v3500_v44 }
 0x23a   : > { %v2271_v48 = vpop.f32.mrf.mxu0  ;;  %v2533_v2 = vmax.f32 %v2497_v57, 0.0  ;;  %v2102_v14 = vadd.f32 %v3782_v54, %v1854_v34  ;;  %v1912_v54 = vld [vmem:[%s3157_s28 + $0x105] sm:$0xff] }
 0x23c   : > { %v2968_v19 = vpack.c.bf16 %v2533_v2, %v2532_v17  ;;  %v2350_v11 = vadd.f32 %v2269_v22, %v2102_v14  ;;  %v1934_v22 = vpack.c.bf16 %v1913_v62, %v1912_v54 }
 0x23e   : > { %3063 = vst [vmem:[%s3789_s23 + $0x10] sm:$0xff] %v2968_v19   ;;  %v2390_v42 = vadd.f32 %v3765_v0, %v2350_v11  ;;  %v2158_v11 = vld [vmem:[%s3157_s28 + $0xf6] sm:$0xff] }
 0x23f   : > { %v1775_v21 = vpop.f32.mrf.mxu2 }
 0x240   : > { %v1855_v3 = vadd.f32 %v1775_v21, %v1607_v24  ;;  %v1530_v29 = vpop.f32.mrf.mxu1  ;;  %v3846_v35 = vpop.f32.mrf.mxu3  ;;  %v2498_v57 = vadd.f32 %v2897_v28, %v2390_v42  ;;  %v2159_v24 = vld [vmem:[%s3157_s28 + $0xfe] sm:$0xff] }
 0x241   : > { %v2181_v42 = vpack.c.bf16 %v2159_v24, %v2158_v11  ;;  %v1915_v28 = vld [vmem:[%s3157_s28 + $0x11d] sm:$0xff]  ;;  %v2160_v11 = vld [vmem:[%s3157_s28 + $0x106] sm:$0xff]  ;;  %v2161_v24 = vld [vmem:[%s3157_s28 + $0x10e] sm:$0xff] }
 0x242   : > { %v2274_v27 = vpop.f32.mrf.mxu0  ;;  %v2103_v52 = vadd.f32 %v3802_v47, %v1855_v3  ;;  %v1608_v47 = vadd.f32 %v1530_v29, %v3507_v32  ;;  %v2534_v14 = vmax.f32 %v2498_v57, 0.0  ;;  %v1663_v32 = vld [vmem:[%s3157_s28 + $0xfc] sm:$0xff] }
 0x243   : > { %2818 = vmatmul.msk.bf16.gmra.mxu1 %vm330_vm1, %v1683_v39  ;;  %v3048_v3 = vld [vmem:[%s3756_s18 + $0x20] sm:$0xff]   ;;  %v1685_v62 = vpack.c.bf16 %v1663_v32, %v1662_v15 }
 0x244   : > { %v2351_v44 = vadd.f32 %v2271_v48, %v2103_v52  ;;  %2837 = vmatmul.msk.bf16.gmra.mxu2 %vm330_vm1, %v1684_v13  ;;  %v1664_v32 = vld [vmem:[%s3157_s28 + $0x104] sm:$0xff] }
 0x245   : > { %2875 = vmatmul.msk.bf16.gmra.mxu0 %vm330_vm1, %v2180_v41  ;;  %2858 = vmatmul.msk.bf16.gmra.mxu3 %vm330_vm1, %v1934_v22 }
 0x246   : > { %v2391_v34 = vadd.f32 %v3765_v0, %v2351_v44  ;;  %v2901_v44 = vunpack.c.l.bf16 %v3048_v3 }
 0x247   : > { %v1778_v60 = vpop.f32.mrf.mxu2 }
 0x248   : > { %v2499_v39 = vadd.f32 %v2898_v50, %v2391_v34  ;;  %v1856_v48 = vadd.f32 %v1778_v60, %v1608_v47  ;;  %v1532_v17 = vpop.f32.mrf.mxu1  ;;  %v3855_v36 = vpop.f32.mrf.mxu3  ;;  %v2902_v34 = vunpack.c.h.bf16 %v3048_v3  ;;  %v3049_v3 = vld [vmem:[%s3756_s18 + $0x28] sm:$0xff]  }
 0x249   : > { %v1609_v21 = vadd.f32 %v1532_v17, %v3520_v12 }
 0x24a   : > { %v2276_v2 = vpop.f32.mrf.mxu0  ;;  %v2535_v19 = vmax.f32 %v2499_v39, 0.0  ;;  %v2104_v58 = vadd.f32 %v3811_v59, %v1856_v48  ;;  %v1914_v59 = vld [vmem:[%s3157_s28 + $0x115] sm:$0xff] }
 0x24c   : > { %v2973_v61 = vpack.c.bf16 %v2535_v19, %v2534_v14  ;;  %v2352_v10 = vadd.f32 %v2274_v27, %v2104_v58  ;;  %v1935_v27 = vpack.c.bf16 %v1915_v28, %v1914_v59  ;;  %v2182_v59 = vpack.c.bf16 %v2161_v24, %v2160_v11  ;;  %v1917_v28 = vld [vmem:[%s3157_s28 + $0x12d] sm:$0xff] }
 0x24e   : > { %3064 = vst [vmem:[%s3789_s23 + $0x18] sm:$0xff] %v2973_v61   ;;  %v2392_v22 = vadd.f32 %v3765_v0, %v2352_v10 }
 0x24f   : > { %v1780_v29 = vpop.f32.mrf.mxu2 }
 0x250   : > { %v1857_v41 = vadd.f32 %v1780_v29, %v1609_v21  ;;  %v1535_v54 = vpop.f32.mrf.mxu1  ;;  %v3868_v57 = vpop.f32.mrf.mxu3  ;;  %v2500_v47 = vadd.f32 %v2901_v44, %v2392_v22 }
 0x252   : > { %v2279_v52 = vpop.f32.mrf.mxu0  ;;  %v2105_v50 = vadd.f32 %v3824_v30, %v1857_v41  ;;  %v1610_v30 = vadd.f32 %v1535_v54, %v3527_v31  ;;  %v2536_v14 = vmax.f32 %v2500_v47, 0.0  ;;  %v1665_v31 = vld [vmem:[%s3157_s28 + $0x10c] sm:$0xff] }
 0x253   : > { %2819 = vmatmul.msk.bf16.gmra.mxu1 %vm330_vm1, %v1684_v13 }
 0x254   : > { %v2353_v12 = vadd.f32 %v2276_v2, %v2105_v50  ;;  %2838 = vmatmul.msk.bf16.gmra.mxu2 %vm330_vm1, %v1685_v62  ;;  %v2905_v50 = vunpack.c.l.bf16 %v3049_v3 }
 0x255   : > { %2876 = vmatmul.msk.bf16.gmra.mxu0 %vm330_vm1, %v2181_v42  ;;  %2859 = vmatmul.msk.bf16.gmra.mxu3 %vm330_vm1, %v1935_v27  ;;  %v1686_v42 = vpack.c.bf16 %v1665_v31, %v1664_v32  ;;  %v2162_v32 = vld [vmem:[%s3157_s28 + $0x116] sm:$0xff]  ;;  %v2163_v31 = vld [vmem:[%s3157_s28 + $0x11e] sm:$0xff] }
 0x256   : > { %v2393_v60 = vadd.f32 %v3765_v0, %v2353_v12 }
 0x257   : > { %v1783_v39 = vpop.f32.mrf.mxu2 }
 0x258   : > { %v2501_v13 = vadd.f32 %v2902_v34, %v2393_v60  ;;  %v1858_v48 = vadd.f32 %v1783_v39, %v1610_v30  ;;  %v1537_v17 = vpop.f32.mrf.mxu1  ;;  %v3877_v61 = vpop.f32.mrf.mxu3  ;;  %v2906_v34 = vunpack.c.h.bf16 %v3049_v3 }
 0x259   : > { %v1611_v21 = vadd.f32 %v1537_v17, %v3540_v56 }
 0x25a   : > { %v2281_v2 = vpop.f32.mrf.mxu0  ;;  %v2537_v19 = vmax.f32 %v2501_v13, 0.0  ;;  %v2106_v58 = vadd.f32 %v3833_v45, %v1858_v48  ;;  %v1916_v45 = vld [vmem:[%s3157_s28 + $0x125] sm:$0xff] }
 0x25c   : > { %v2978_v15 = vpack.c.bf16 %v2537_v19, %v2536_v14  ;;  %v2354_v10 = vadd.f32 %v2279_v52, %v2106_v58  ;;  %v1936_v52 = vpack.c.bf16 %v1917_v28, %v1916_v45 }
 0x25e   : > { %3065 = vst [vmem:[%s3789_s23 + $0x20] sm:$0xff] %v2978_v15   ;;  %v2394_v44 = vadd.f32 %v3765_v0, %v2354_v10  ;;  %v1666_v15 = vld [vmem:[%s3157_s28 + $0x114] sm:$0xff] }
 0x25f   : > { %v1785_v29 = vpop.f32.mrf.mxu2  ;;  %v3050_v10 = vld [vmem:[%s3756_s18 + $0x30] sm:$0xff]  }
 0x260   : > { %v1859_v41 = vadd.f32 %v1785_v29, %v1611_v21  ;;  %v1540_v54 = vpop.f32.mrf.mxu1  ;;  %v3890_v12 = vpop.f32.mrf.mxu3  ;;  %v2502_v47 = vadd.f32 %v2905_v50, %v2394_v44  ;;  %v2909_v44 = vunpack.c.l.bf16 %v3050_v10 }
 0x262   : > { %v2284_v22 = vpop.f32.mrf.mxu0  ;;  %v2107_v27 = vadd.f32 %v3846_v35, %v1859_v41  ;;  %v1612_v35 = vadd.f32 %v1540_v54, %v3547_v37  ;;  %v2538_v17 = vmax.f32 %v2502_v47, 0.0  ;;  %v1667_v37 = vld [vmem:[%s3157_s28 + $0x11c] sm:$0xff]  ;;  %v2183_v54 = vpack.c.bf16 %v2163_v31, %v2162_v32 }
 0x263   : > { %2820 = vmatmul.msk.bf16.gmra.mxu1 %vm330_vm1, %v1685_v62  ;;  %v1687_v41 = vpack.c.bf16 %v1667_v37, %v1666_v15  ;;  %v3051_v32 = vld [vmem:[%s3756_s18 + $0x38] sm:$0xff]  }
 0x264   : > { %v2355_v56 = vadd.f32 %v2281_v2, %v2107_v27  ;;  %2839 = vmatmul.msk.bf16.gmra.mxu2 %vm330_vm1, %v1686_v42 }
 0x265   : > { %2877 = vmatmul.msk.bf16.gmra.mxu0 %vm330_vm1, %v2182_v59  ;;  %2860 = vmatmul.msk.bf16.gmra.mxu3 %vm330_vm1, %v1936_v52  ;;  %v1919_v59 = vld [vmem:[%s3157_s28 + $0x13d] sm:$0xff]  ;;  %v2910_v52 = vunpack.c.h.bf16 %v3050_v10 }
 0x266   : > { %v2395_v60 = vadd.f32 %v3765_v0, %v2355_v56 }
 0x267   : > { %v1788_v30 = vpop.f32.mrf.mxu2 }
 0x268   : > { %v2503_v62 = vadd.f32 %v2906_v34, %v2395_v60  ;;  %v1860_v39 = vadd.f32 %v1788_v30, %v1612_v35  ;;  %v1542_v13 = vpop.f32.mrf.mxu1  ;;  %v3899_v19 = vpop.f32.mrf.mxu3 }
 0x269   : > { %v1613_v24 = vadd.f32 %v1542_v13, %v3558_v9 }
 0x26a   : > { %v2286_v48 = vpop.f32.mrf.mxu0  ;;  %v2539_v2 = vmax.f32 %v2503_v62, 0.0  ;;  %v2108_v14 = vadd.f32 %v3855_v36, %v1860_v39  ;;  %v1918_v36 = vld [vmem:[%s3157_s28 + $0x135] sm:$0xff] }
 0x26c   : > { %v2983_v58 = vpack.c.bf16 %v2539_v2, %v2538_v17  ;;  %v2356_v11 = vadd.f32 %v2284_v22, %v2108_v14  ;;  %v1937_v22 = vpack.c.bf16 %v1919_v59, %v1918_v36  ;;  %v1668_v2 = vld [vmem:[%s3157_s28 + $0x124] sm:$0xff]  ;;  %v1669_v14 = vld [vmem:[%s3157_s28 + $0x12c] sm:$0xff] }
 0x26d   : > { %v1688_v10 = vpack.c.bf16 %v1669_v14, %v1668_v2 }
 0x26e   : > { %3066 = vst [vmem:[%s3789_s23 + $0x28] sm:$0xff] %v2983_v58   ;;  %v2396_v28 = vadd.f32 %v3765_v0, %v2356_v11  ;;  %v2164_v58 = vld [vmem:[%s3157_s28 + $0x126] sm:$0xff] }
 0x26f   : > { %v1790_v21 = vpop.f32.mrf.mxu2 }
 0x270   : > { %v1861_v3 = vadd.f32 %v1790_v21, %v1613_v24  ;;  %v1545_v29 = vpop.f32.mrf.mxu1  ;;  %v3912_v27 = vpop.f32.mrf.mxu3  ;;  %v2504_v56 = vadd.f32 %v2909_v44, %v2396_v28 }
 0x272   : > { %v2289_v45 = vpop.f32.mrf.mxu0  ;;  %v2109_v50 = vadd.f32 %v3868_v57, %v1861_v3  ;;  %v1614_v57 = vadd.f32 %v1545_v29, %v3564_v49  ;;  %v2540_v62 = vmax.f32 %v2504_v56, 0.0  ;;  %v2165_v49 = vld [vmem:[%s3157_s28 + $0x12e] sm:$0xff]  ;;  %v2913_v29 = vunpack.c.l.bf16 %v3051_v32 }
 0x273   : > { %2821 = vmatmul.msk.bf16.gmra.mxu1 %vm330_vm1, %v1686_v42  ;;  %v2184_v21 = vpack.c.bf16 %v2165_v49, %v2164_v58 }
 0x274   : > { %v2357_v9 = vadd.f32 %v2286_v48, %v2109_v50  ;;  %2840 = vmatmul.msk.bf16.gmra.mxu2 %vm330_vm1, %v1687_v41 }
 0x275   : > { %2878 = vmatmul.msk.bf16.gmra.mxu0 %vm330_vm1, %v2183_v54  ;;  %2861 = vmatmul.msk.bf16.gmra.mxu3 %vm330_vm1, %v1937_v22 }
 0x276   : > { %v2397_v34 = vadd.f32 %v3765_v0, %v2357_v9 }
 0x277   : > { %v1793_v47 = vpop.f32.mrf.mxu2 }
 0x278   : > { %v2505_v42 = vadd.f32 %v2910_v52, %v2397_v34  ;;  %v1862_v60 = vadd.f32 %v1793_v47, %v1614_v57  ;;  %v1547_v35 = vpop.f32.mrf.mxu1  ;;  %v3921_v48 = vpop.f32.mrf.mxu3 }
 0x279   : > { %v1615_v37 = vadd.f32 %v1547_v35, %v3575_v26  ;;  %v2166_v35 = vld [vmem:[%s3157_s28 + $0x136] sm:$0xff] }
 0x27a   : > { %v2291_v30 = vpop.f32.mrf.mxu0  ;;  %v2541_v39 = vmax.f32 %v2505_v42, 0.0  ;;  %v2110_v13 = vadd.f32 %v3877_v61, %v1862_v60  ;;  %v1670_v42 = vld [vmem:[%s3157_s28 + $0x134] sm:$0xff]  ;;  %v1671_v60 = vld [vmem:[%s3157_s28 + $0x13c] sm:$0xff] }
 0x27b   : > { %v1689_v14 = vpack.c.bf16 %v1671_v60, %v1670_v42 }
 0x27c   : > { %v2988_v17 = vpack.c.bf16 %v2541_v39, %v2540_v62  ;;  %v2358_v15 = vadd.f32 %v2289_v45, %v2110_v13  ;;  %v2914_v45 = vunpack.c.h.bf16 %v3051_v32  ;;  %v3052_v39 = vld [vmem:[%s3756_s18 + $0x40] sm:$0xff]  }
 0x27e   : > { %3067 = vst [vmem:[%s3789_s23 + $0x30] sm:$0xff] %v2988_v17   ;;  %v2398_v61 = vadd.f32 %v3765_v0, %v2358_v15 }
 0x27f   : > { %v1795_v31 = vpop.f32.mrf.mxu2 }
 0x280   : > { %v1863_v11 = vadd.f32 %v1795_v31, %v1615_v37  ;;  %v1550_v24 = vpop.f32.mrf.mxu1  ;;  %v3932_v36 = vpop.f32.mrf.mxu3  ;;  %v2506_v26 = vadd.f32 %v2913_v29, %v2398_v61  ;;  %v2918_v31 = vunpack.c.h.bf16 %v3052_v39 }
 0x282   : > { %v2294_v3 = vpop.f32.mrf.mxu0  ;;  %v2111_v54 = vadd.f32 %v3890_v12, %v1863_v11  ;;  %v1616_v12 = vadd.f32 %v1550_v24, %v3581_v1  ;;  %v2542_v52 = vmax.f32 %v2506_v26, 0.0 }
 0x283   : > { %2822 = vmatmul.msk.bf16.gmra.mxu1 %vm330_vm1, %v1687_v41 }
 0x284   : > { %v2359_v59 = vadd.f32 %v2291_v30, %v2111_v54  ;;  %2841 = vmatmul.msk.bf16.gmra.mxu2 %vm330_vm1, %v1688_v10  ;;  %v2167_v30 = vld [vmem:[%s3157_s28 + $0x13e] sm:$0xff] }
 0x285   : > { %2879 = vmatmul.msk.bf16.gmra.mxu0 %vm330_vm1, %v2184_v21  ;;  %v2185_v58 = vpack.c.bf16 %v2167_v30, %v2166_v35 }
 0x286   : > { %v2399_v28 = vadd.f32 %v3765_v0, %v2359_v59 }
 0x287   : > { %v1798_v44 = vpop.f32.mrf.mxu2 }
 0x288   : > { %v2507_v50 = vadd.f32 %v2914_v45, %v2399_v28  ;;  %v1864_v41 = vadd.f32 %v1798_v44, %v1616_v12  ;;  %v1552_v22 = vpop.f32.mrf.mxu1  ;;  %v2056_v57 = vpop.f32.mrf.mxu3  ;;  %v3053_v44 = vld [vmem:[%s3756_s18 + $0x48] sm:$0xff]  }
 0x289   : > { %v1617_v1 = vadd.f32 %v1552_v22, %v3592_v43  ;;  %v2922_v42 = vunpack.c.h.bf16 %v3053_v44 }
 0x28a   : > { %v2296_v9 = vpop.f32.mrf.mxu0  ;;  %v2543_v56 = vmax.f32 %v2507_v50, 0.0  ;;  %v2112_v34 = vadd.f32 %v3899_v19, %v1864_v41  ;;  %v2917_v19 = vunpack.c.l.bf16 %v3052_v39 }
 0x28c   : > { %v2993_v47 = vpack.c.bf16 %v2543_v56, %v2542_v52  ;;  %v2360_v62 = vadd.f32 %v2294_v3, %v2112_v34  ;;  %v2921_v56 = vunpack.c.l.bf16 %v3053_v44 }
 0x28e   : > { %3068 = vst [vmem:[%s3789_s23 + $0x38] sm:$0xff] %v2993_v47   ;;  %v2400_v15 = vadd.f32 %v3765_v0, %v2360_v62 }
 0x28f   : > { %v1800_v13 = vpop.f32.mrf.mxu2 }
 0x290   : > { %v1865_v17 = vadd.f32 %v1800_v13, %v1617_v1  ;;  %v1555_v2 = vpop.f32.mrf.mxu1  ;;  %v2058_v43 = vpop.f32.mrf.mxu3  ;;  %v2508_v11 = vadd.f32 %v2917_v19, %v2400_v15  ;;  %v3054_v15 = vld [vmem:[%s3756_s18 + $0x50] sm:$0xff]  }
 0x291   : > { %v1618_v21 = vadd.f32 %v1555_v2, %v3599_v46 }
 0x292   : > { %v2299_v49 = vpop.f32.mrf.mxu0  ;;  %v2113_v37 = vadd.f32 %v3912_v27, %v1865_v17 }
 0x293   : > { %2823 = vmatmul.msk.bf16.gmra.mxu1 %vm330_vm1, %v1688_v10  ;;  %v2544_v10 = vmax.f32 %v2508_v11, 0.0  ;;  %v2925_v11 = vunpack.c.l.bf16 %v3054_v15 }
 0x294   : > { %v2361_v32 = vadd.f32 %v2296_v9, %v2113_v37  ;;  %2842 = vmatmul.msk.bf16.gmra.mxu2 %vm330_vm1, %v1689_v14 }
 0x295   : > { %2880 = vmatmul.msk.bf16.gmra.mxu0 %vm330_vm1, %v2185_v58 }
 0x296   : > { %v2401_v24 = vadd.f32 %v3765_v0, %v2361_v32 }
 0x297   : > { %v1803_v3 = vpop.f32.mrf.mxu2 }
 0x298   : > { %v2509_v61 = vadd.f32 %v2918_v31, %v2401_v24  ;;  %v1866_v29 = vadd.f32 %v1803_v3, %v1618_v21  ;;  %v1557_v27 = vpop.f32.mrf.mxu1  ;;  %v2061_v41 = vpop.f32.mrf.mxu3 }
 0x299   : > { %v1619_v12 = vadd.f32 %v1557_v27, %v3610_v4 }
 0x29a   : > { %v2301_v54 = vpop.f32.mrf.mxu0  ;;  %v2545_v59 = vmax.f32 %v2509_v61, 0.0  ;;  %v2114_v45 = vadd.f32 %v3921_v48, %v1866_v29  ;;  %v2926_v61 = vunpack.c.h.bf16 %v3054_v15  ;;  %v3056_v15 = vld [vmem:[%s3756_s18 + $0x60] sm:$0xff]  }
 0x29c   : > { %v2998_v26 = vpack.c.bf16 %v2545_v59, %v2544_v10  ;;  %v2362_v28 = vadd.f32 %v2299_v49, %v2114_v45 }
 0x29e   : > { %3069 = vst [vmem:[%s3789_s23 + $0x40] sm:$0xff] %v2998_v26   ;;  %v2402_v52 = vadd.f32 %v3765_v0, %v2362_v28 }
 0x29f   : > { %v1805_v50 = vpop.f32.mrf.mxu2 }
 0x2a0   : > { %v1867_v22 = vadd.f32 %v1805_v50, %v1619_v12  ;;  %v1560_v9 = vpop.f32.mrf.mxu1  ;;  %v2510_v48 = vadd.f32 %v2921_v56, %v2402_v52  ;;  %v2063_v13 = vpop.f32.mrf.mxu3 }
 0x2a1   : > { %v1620_v4 = vadd.f32 %v1560_v9, %v3615_v5  ;;  %v3055_v9 = vld [vmem:[%s3756_s18 + $0x58] sm:$0xff]  }
 0x2a2   : > { %v2304_v46 = vpop.f32.mrf.mxu0  ;;  %v2115_v34 = vadd.f32 %v3932_v36, %v1867_v22  ;;  %v2546_v17 = vmax.f32 %v2510_v48, 0.0 }
 0x2a4   : > { %v2363_v47 = vadd.f32 %v2301_v54, %v2115_v34 }
 0x2a6   : > { %v2403_v60 = vadd.f32 %v3765_v0, %v2363_v47  ;;  %v2929_v47 = vunpack.c.l.bf16 %v3055_v9 }
 0x2a7   : > { %v1808_v35 = vpop.f32.mrf.mxu2 }
 0x2a8   : > { %v2511_v30 = vadd.f32 %v2922_v42, %v2403_v60  ;;  %v1868_v62 = vadd.f32 %v1808_v35, %v1620_v4  ;;  %v1562_v1 = vpop.f32.mrf.mxu1  ;;  %v2066_v21 = vpop.f32.mrf.mxu3  ;;  %v2930_v60 = vunpack.c.h.bf16 %v3055_v9 }
 0x2a9   : > { %v1621_v49 = vadd.f32 %v1562_v1, %v3626_v63 }
 0x2aa   : > { %v2306_v39 = vpop.f32.mrf.mxu0  ;;  %v2547_v2 = vmax.f32 %v2511_v30, 0.0  ;;  %v2116_v14 = vadd.f32 %v2056_v57, %v1868_v62 }
 0x2ac   : > { %v3003_v58 = vpack.c.bf16 %v2547_v2, %v2546_v17  ;;  %v2364_v36 = vadd.f32 %v2304_v46, %v2116_v14 }
 0x2ae   : > { %3070 = vst [vmem:[%s3789_s23 + $0x48] sm:$0xff] %v3003_v58   ;;  %v2404_v5 = vadd.f32 %v3765_v0, %v2364_v36 }
 0x2af   : > { %v1810_v19 = vpop.f32.mrf.mxu2 }
 0x2b0   : > { %v1869_v37 = vadd.f32 %v1810_v19, %v1621_v49  ;;  %v1565_v32 = vpop.f32.mrf.mxu1  ;;  %v2512_v29 = vadd.f32 %v2925_v11, %v2404_v5  ;;  %v2933_v11 = vunpack.c.l.bf16 %v3056_v15 }
 0x2b1   : > { %v1622_v27 = vadd.f32 %v1565_v32, %v3631_v38 }
 0x2b2   : > { %v2309_v31 = vpop.f32.mrf.mxu0  ;;  %v2117_v24 = vadd.f32 %v2058_v43, %v1869_v37  ;;  %v2548_v26 = vmax.f32 %v2512_v29, 0.0  ;;  %v2068_v43 = vpop.f32.mrf.mxu3 }
 0x2b4   : > { %v2365_v3 = vadd.f32 %v2306_v39, %v2117_v24 }
 0x2b6   : > { %v2405_v57 = vadd.f32 %v3765_v0, %v2365_v3 }
 0x2b7   : > { %v1813_v63 = vpop.f32.mrf.mxu2 }
 0x2b8   : > { %v2513_v54 = vadd.f32 %v2926_v61, %v2405_v57  ;;  %v1870_v10 = vadd.f32 %v1813_v63, %v1622_v27  ;;  %v1567_v59 = vpop.f32.mrf.mxu1  ;;  %v2934_v61 = vunpack.c.h.bf16 %v3056_v15 }
 0x2b9   : > { %v1623_v22 = vadd.f32 %v1567_v59, %v3642_v16 }
 0x2ba   : > { %v2311_v45 = vpop.f32.mrf.mxu0  ;;  %v2549_v28 = vmax.f32 %v2513_v54, 0.0  ;;  %v2118_v12 = vadd.f32 %v2061_v41, %v1870_v10  ;;  %v2071_v16 = vpop.f32.mrf.mxu3 }
 0x2bc   : > { %v3008_v44 = vpack.c.bf16 %v2549_v28, %v2548_v26  ;;  %v2366_v50 = vadd.f32 %v2309_v31, %v2118_v12 }
 0x2be   : > { %3071 = vst [vmem:[%s3789_s23 + $0x50] sm:$0xff] %v3008_v44   ;;  %v2406_v38 = vadd.f32 %v3765_v0, %v2366_v50  ;;  %v3057_v50 = vld [vmem:[%s3756_s18 + $0x68] sm:$0xff]  }
 0x2bf   : > { %v1815_v46 = vpop.f32.mrf.mxu2 }
 0x2c0   : > { %v1871_v52 = vadd.f32 %v1815_v46, %v1623_v22  ;;  %v1570_v56 = vpop.f32.mrf.mxu1  ;;  %v2514_v4 = vadd.f32 %v2929_v47, %v2406_v38  ;;  %v2938_v47 = vunpack.c.h.bf16 %v3057_v50 }
 0x2c1   : > { %v1624_v35 = vadd.f32 %v1570_v56, %v3647_v53  ;;  %v2937_v56 = vunpack.c.l.bf16 %v3057_v50 }
 0x2c2   : > { %v2314_v34 = vpop.f32.mrf.mxu0  ;;  %v2119_v42 = vadd.f32 %v2063_v13, %v1871_v52  ;;  %v2550_v2 = vmax.f32 %v2514_v4, 0.0  ;;  %v2073_v53 = vpop.f32.mrf.mxu3 }
 0x2c4   : > { %v2367_v48 = vadd.f32 %v2311_v45, %v2119_v42 }
 0x2c6   : > { %v2407_v41 = vadd.f32 %v3765_v0, %v2367_v48 }
 0x2c7   : > { %v1818_v30 = vpop.f32.mrf.mxu2 }
 0x2c8   : > { %v2515_v62 = vadd.f32 %v2930_v60, %v2407_v41  ;;  %v1872_v1 = vadd.f32 %v1818_v30, %v1624_v35  ;;  %v1572_v39 = vpop.f32.mrf.mxu1 }
 0x2c9   : > { %v1625_v49 = vadd.f32 %v1572_v39, %v3658_v33 }
 0x2ca   : > { %v2316_v17 = vpop.f32.mrf.mxu0  ;;  %v2551_v14 = vmax.f32 %v2515_v62, 0.0  ;;  %v2120_v58 = vadd.f32 %v2066_v21, %v1872_v1  ;;  %v2076_v28 = vpop.f32.mrf.mxu3 }
 0x2cc   : > { %v3013_v36 = vpack.c.bf16 %v2551_v14, %v2550_v2  ;;  %v2368_v13 = vadd.f32 %v2314_v34, %v2120_v58  ;;  %v3058_v58 = vld [vmem:[%s3756_s18 + $0x70] sm:$0xff]  }
 0x2ce   : > { %3072 = vst [vmem:[%s3789_s23 + $0x58] sm:$0xff] %v3013_v36   ;;  %v2408_v5 = vadd.f32 %v3765_v0, %v2368_v13 }
 0x2cf   : > { %v1820_v19 = vpop.f32.mrf.mxu2 }
 0x2d0   : > { %v1873_v37 = vadd.f32 %v1820_v19, %v1625_v49  ;;  %v1575_v32 = vpop.f32.mrf.mxu1  ;;  %v2516_v29 = vadd.f32 %v2933_v11, %v2408_v5 }
 0x2d1   : > { %v1626_v57 = vadd.f32 %v1575_v32, %v3663_v7 }
 0x2d2   : > { %v2319_v31 = vpop.f32.mrf.mxu0  ;;  %v2121_v24 = vadd.f32 %v2068_v43, %v1873_v37  ;;  %v2552_v59 = vmax.f32 %v2516_v29, 0.0  ;;  %v2078_v42 = vpop.f32.mrf.mxu3  ;;  %v2941_v37 = vunpack.c.l.bf16 %v3058_v58 }
 0x2d4   : > { %v2369_v3 = vadd.f32 %v2316_v17, %v2121_v24 }
 0x2d6   : > { %v2409_v21 = vadd.f32 %v3765_v0, %v2369_v3 }
 0x2d7   : > { %v1823_v33 = vpop.f32.mrf.mxu2 }
 0x2d8   : > { %v2517_v27 = vadd.f32 %v2934_v61, %v2409_v21  ;;  %v1874_v63 = vadd.f32 %v1823_v33, %v1626_v57  ;;  %v1577_v54 = vpop.f32.mrf.mxu1 }
 0x2d9   : > { %v1627_v43 = vadd.f32 %v1577_v54, %v3674_v51 }
 0x2da   : > { %v2321_v10 = vpop.f32.mrf.mxu0  ;;  %v2553_v45 = vmax.f32 %v2517_v27, 0.0  ;;  %v2122_v26 = vadd.f32 %v2071_v16, %v1874_v63  ;;  %v2081_v13 = vpop.f32.mrf.mxu3 }
 0x2dc   : > { %v3018_v12 = vpack.c.bf16 %v2553_v45, %v2552_v59  ;;  %v2370_v44 = vadd.f32 %v2319_v31, %v2122_v26  ;;  %v3059_v45 = vld [vmem:[%s3756_s18 + $0x78] sm:$0xff]  }
 0x2de   : > { %3073 = vst [vmem:[%s3789_s23 + $0x60] sm:$0xff] %v3018_v12   ;;  %v2410_v7 = vadd.f32 %v3765_v0, %v2370_v44  ;;  %v2945_v44 = vunpack.c.l.bf16 %v3059_v45 }
 0x2df   : > { %v1825_v22 = vpop.f32.mrf.mxu2 }
 0x2e0   : > { %v1875_v9 = vadd.f32 %v1825_v22, %v1627_v43  ;;  %v1580_v46 = vpop.f32.mrf.mxu1  ;;  %v2518_v48 = vadd.f32 %v2937_v56, %v2410_v7 }
 0x2e1   : > { %v1628_v4 = vadd.f32 %v1580_v46, %v3679_v18 }
 0x2e2   : > { %v2324_v52 = vpop.f32.mrf.mxu0  ;;  %v2123_v34 = vadd.f32 %v2073_v53, %v1875_v9  ;;  %v2554_v62 = vmax.f32 %v2518_v48, 0.0  ;;  %v2942_v53 = vunpack.c.h.bf16 %v3058_v58  ;;  %v2083_v21 = vpop.f32.mrf.mxu3  ;;  %v2946_v9 = vunpack.c.h.bf16 %v3059_v45 }
 0x2e4   : > { %v2371_v38 = vadd.f32 %v2321_v10, %v2123_v34 }
 0x2e6   : > { %v2411_v60 = vadd.f32 %v3765_v0, %v2371_v38 }
 0x2e7   : > { %v1828_v51 = vpop.f32.mrf.mxu2 }
 0x2e8   : > { %v2519_v41 = vadd.f32 %v2938_v47, %v2411_v60  ;;  %v1876_v35 = vadd.f32 %v1828_v51, %v1628_v4  ;;  %v1582_v30 = vpop.f32.mrf.mxu1 }
 0x2e9   : > { %v1629_v14 = vadd.f32 %v1582_v30, %v3690_v20  ;;  %v3060_v30 = vld [vmem:[%s3756_s18 + $0x80] sm:$0xff]  }
 0x2ea   : > { %v2326_v16 = vpop.f32.mrf.mxu0  ;;  %v2555_v1 = vmax.f32 %v2519_v41, 0.0  ;;  %v2124_v39 = vadd.f32 %v2076_v28, %v1876_v35  ;;  %v2086_v50 = vpop.f32.mrf.mxu3  ;;  %v2950_v58 = vunpack.c.h.bf16 %v3060_v30 }
 0x2ec   : > { %v3023_v17 = vpack.c.bf16 %v2555_v1, %v2554_v62  ;;  %v2372_v2 = vadd.f32 %v2324_v52, %v2124_v39 }
 0x2ee   : > { %3074 = vst [vmem:[%s3789_s23 + $0x68] sm:$0xff] %v3023_v17   ;;  %v2412_v18 = vadd.f32 %v3765_v0, %v2372_v2 }
 0x2ef   : > { %v1830_v36 = vpop.f32.mrf.mxu2 }
 0x2f0   : > { %v1877_v49 = vadd.f32 %v1830_v36, %v1629_v14  ;;  %v1585_v15 = vpop.f32.mrf.mxu1  ;;  %v2520_v5 = vadd.f32 %v2941_v37, %v2412_v18 }
 0x2f1   : > { %v1630_v24 = vadd.f32 %v1585_v15, %v3695_v55  ;;  %v3093_v55 = vld [vmem:[%s4012_s2] ss:$0 sm:$0xff] }
 0x2f2   : > { %v2329_v19 = vpop.f32.mrf.mxu0  ;;  %v2125_v32 = vadd.f32 %v2078_v42, %v1877_v49  ;;  %v2556_v57 = vmax.f32 %v2520_v5, 0.0  ;;  %v2088_v51 = vpop.f32.mrf.mxu3 }
 0x2f4   : > { %v2373_v31 = vadd.f32 %v2326_v16, %v2125_v32 }
 0x2f6   : > { %v2413_v11 = vadd.f32 %v3765_v0, %v2373_v31 }
 0x2f7   : > { %v1833_v20 = vpop.f32.mrf.mxu2 }
 0x2f8   : > { %v2521_v3 = vadd.f32 %v2942_v53, %v2413_v11  ;;  %v1878_v61 = vadd.f32 %v1833_v20, %v1630_v24  ;;  %v1587_v29 = vpop.f32.mrf.mxu1 }
 0x2f9   : > { %v1631_v59 = vadd.f32 %v1587_v29, %v3706_v6 }
 0x2fa   : > { %v2557_v33 = vmax.f32 %v2521_v3, 0.0  ;;  %v2126_v27 = vadd.f32 %v2081_v13, %v1878_v61  ;;  %v2331_v63 = vpop.f32.mrf.mxu0  ;;  %v2091_v15 = vpop.f32.mrf.mxu3  ;;  %v3061_v3 = vld [vmem:[%s3756_s18 + $0x88] sm:$0xff]  }
 0x2fc   : > { %v3028_v54 = vpack.c.bf16 %v2557_v33, %v2556_v57  ;;  %v2374_v10 = vadd.f32 %v2329_v19, %v2126_v27  ;;  %v2953_v57 = vunpack.c.l.bf16 %v3061_v3 }
 0x2fe   : > { %3075 = vst [vmem:[%s3789_s23 + $0x70] sm:$0xff] %v3028_v54   ;;  %v2414_v12 = vadd.f32 %v3093_v55, %v2374_v10  ;;  %v2954_v54 = vunpack.c.h.bf16 %v3061_v3 }
 0x2ff   : > { %v1835_v26 = vpop.f32.mrf.mxu2 }
 0x300   : > { %v1879_v28 = vadd.f32 %v1835_v26, %v1631_v59  ;;  %v1590_v0 = vpop.f32.mrf.mxu1  ;;  %v2522_v52 = vadd.f32 %v2945_v44, %v2414_v12 }
 0x301   : > { %v1632_v6 = vadd.f32 %v1590_v0, %v3711_v8  ;;  %v2949_v8 = vunpack.c.l.bf16 %v3060_v30 }
 0x302   : > { %v2127_v43 = vadd.f32 %v2083_v21, %v1879_v28  ;;  %v2334_v46 = vpop.f32.mrf.mxu0  ;;  %v2558_v42 = vmax.f32 %v2522_v52, 0.0  ;;  %v2093_v21 = vpop.f32.mrf.mxu3 }
 0x304   : > { %v2375_v22 = vadd.f32 %v2331_v63, %v2127_v43 }
 0x306   : > { %v2415_v7 = vadd.f32 %v3093_v55, %v2375_v22 }
 0x307   : > { %v1838_v56 = vpop.f32.mrf.mxu2 }
 0x308   : > { %v2523_v34 = vadd.f32 %v2946_v9, %v2415_v7  ;;  %v1880_v38 = vadd.f32 %v1838_v56, %v1632_v6  ;;  %v1592_v47 = vpop.f32.mrf.mxu1 }
 0x309   : > { %v1633_v35 = vadd.f32 %v1592_v47, %v3724_v23 }
 0x30a   : > { %v2559_v48 = vmax.f32 %v2523_v34, 0.0  ;;  %v2128_v60 = vadd.f32 %v2086_v50, %v1880_v38  ;;  %v2336_v16 = vpop.f32.mrf.mxu0 }
 0x30c   : > { %v3033_v4 = vpack.c.bf16 %v2559_v48, %v2558_v42  ;;  %v2376_v41 = vadd.f32 %v2334_v46, %v2128_v60 }
 0x30e   : > { %3076 = vst [vmem:[%s3789_s23 + $0x78] sm:$0xff] %v3033_v4   ;;  %v2416_v17 = vadd.f32 %v3093_v55, %v2376_v41 }
 0x30f   : > { %v1840_v62 = vpop.f32.mrf.mxu2 }
 0x310   : > { %v1881_v1 = vadd.f32 %v1840_v62, %v1633_v35  ;;  %v1595_v39 = vpop.f32.mrf.mxu1  ;;  %v2524_v36 = vadd.f32 %v2949_v8, %v2416_v17 }
 0x311   : > { %v1634_v49 = vadd.f32 %v1595_v39, %v3731_v25 }
 0x312   : > { %v2129_v2 = vadd.f32 %v2088_v51, %v1881_v1  ;;  %v2339_v37 = vpop.f32.mrf.mxu0  ;;  %v2560_v32 = vmax.f32 %v2524_v36, 0.0 }
 0x314   : > { %v2377_v14 = vadd.f32 %v2336_v16, %v2129_v2 }
 0x316   : > { %v2417_v13 = vadd.f32 %v3093_v55, %v2377_v14 }
 0x317   : > { %v1843_v19 = vpop.f32.mrf.mxu2 }
 0x318   : > { %v2525_v18 = vadd.f32 %v2950_v58, %v2417_v13  ;;  %v1882_v23 = vadd.f32 %v1843_v19, %v1634_v49  ;;  %v1597_v5 = vpop.f32.mrf.mxu1 }
 0x319   : > { %v1635_v20 = vadd.f32 %v1597_v5, %v3744_v40 }
 0x31a   : > { %v2561_v31 = vmax.f32 %v2525_v18, 0.0  ;;  %v2130_v53 = vadd.f32 %v2091_v15, %v1882_v23  ;;  %v2341_v27 = vpop.f32.mrf.mxu0 }
 0x31c   : > { %v3038_v11 = vpack.c.bf16 %v2561_v31, %v2560_v32  ;;  %v2378_v24 = vadd.f32 %v2339_v37, %v2130_v53 }
 0x31e   : > { %3077 = vst [vmem:[%s3789_s23 + $0x80] sm:$0xff] %v3038_v11   ;;  %v2418_v25 = vadd.f32 %v3093_v55, %v2378_v24 }
 0x31f   : > { %v1845_v61 = vpop.f32.mrf.mxu2 }
 0x320   : > { %v1883_v29 = vadd.f32 %v1845_v61, %v1635_v20  ;;  %v2526_v10 = vadd.f32 %v2953_v57, %v2418_v25 }
 0x322   : > { %v2131_v33 = vadd.f32 %v2093_v21, %v1883_v29  ;;  %v2562_v26 = vmax.f32 %v2526_v10, 0.0 }
 0x324   : > { %v2379_v63 = vadd.f32 %v2341_v27, %v2131_v33 }
 0x326   : > { %v2419_v59 = vadd.f32 %v3093_v55, %v2379_v63 }
 0x328   : > { %v2527_v45 = vadd.f32 %v2954_v54, %v2419_v59 }
 0x32a   : > { %v2563_v28 = vmax.f32 %v2527_v45, 0.0 }
 0x32c   : > { %v3043_v0 = vpack.c.bf16 %v2563_v28, %v2562_v26 }
 0x32e   : > { %3078 = vst [vmem:[%s3789_s23 + $0x88] sm:$0xff] %v3043_v0  }
 0x32f PF: > { %s14_s15 = sadd.s32 1, %s3100_s15  }
 0x330   : > { %p11_p4 = scmp.ge.s32.totalorder %s14_s15, 4  }
 0x332   :  { %13 = sbr.rel (!%p11_p4) target bundleno = 1 (0x1), region = 77 }

</bundles_post_ra>
